<compile_context>
chip_gen: v5e
topology: v5e:2x2
jax: 0.10.0
libtpu: 0.0.40
codegen_flags: <defaults>
</compile_context>

<pallas_src>
import jax
import jax.numpy as jnp
from jax.experimental import pallas as pl
from jax.experimental.pallas import tpu as pltpu

F = 2901  # fixed by the module's __init__
D = 32    # trailing dim the weights broadcast across


def _round_up(v, m):
    return ((v + m - 1) // m) * m


def merge_kernel(x_ref, ha_ref, w1_ref, w2_ref, o_ref):
    # x/ha/o blocks: (block_f, D); weight blocks: (block_f, 1) broadcast across
    # lanes in-kernel. Accumulate in f32, cast only on the store.
    x = x_ref[...].astype(jnp.float32)
    ha = ha_ref[...].astype(jnp.float32)
    w1 = w1_ref[...].astype(jnp.float32)
    w2 = w2_ref[...].astype(jnp.float32)
    o_ref[...] = (x * w1 + ha * w2).astype(o_ref.dtype)


def merge_layer(x, ha, w1, w2):
    f, d = x.shape
    assert ha.shape == (f, d)
    assert w1.shape == (f, 1) and w2.shape == (f, 1)
    out_dtype = x.dtype

    # Row-axis blocking:
    #   * >= 2 grid steps so v7x can shard the "parallel" axis across its two
    #     TensorCores (on v5e/v6e the steps just pipeline on one core).
    #   * block rows are a multiple of 8 sublanes; trailing block dim is the
    #     full D, so the (8,128) BlockSpec rule is satisfied with no padding
    #     copies. The partial last block is handled by Pallas.
    #   * cap the data block around ~4 MiB so double-buffered VMEM stays far
    #     below the scoped limits even for much larger inputs.
    max_block_f = max(8, _round_up((4 * 1024 * 1024) // max(1, d * 4), 8))
    block_f = min(_round_up(pl.cdiv(f, 2), 8), _round_up(f, 8), max_block_f)
    grid_f = pl.cdiv(f, block_f)

    data_spec = pl.BlockSpec((block_f, d), lambda i: (i, 0))
    weight_spec = pl.BlockSpec((block_f, 1), lambda i: (i, 0))

    out = pl.pallas_call(
        merge_kernel,
        out_shape=jax.ShapeDtypeStruct((f, d), out_dtype),
        grid=(grid_f,),
        in_specs=[data_spec, data_spec, weight_spec, weight_spec],
        out_specs=data_spec,
        compiler_params=pltpu.CompilerParams(
            dimension_semantics=("parallel",)),  # shard row blocks across v7x TCs
    )(x, ha, w1, w2)

    return out


if __name__ == "__main__":
    key = jax.random.PRNGKey(0)
    kx, kh = jax.random.split(key)

    x = jax.random.normal(kx, (F, D), dtype=jnp.float32)
    ha = jax.random.normal(kh, (F, D), dtype=jnp.float32)

    # reset_parameters(): init.ones_ on both weights
    weight_1 = jnp.ones((F, 1), dtype=jnp.float32)
    weight_2 = jnp.ones((F, 1), dtype=jnp.float32)

    out = jax.block_until_ready(merge_layer(x, ha, weight_1, weight_2))

    # Reference check (plain JAX, same broadcasting as PyTorch)
    ref = x * weight_1 + ha * weight_2
    assert out.shape == (F, D)
    assert jnp.allclose(out, ref, atol=1e-6), "mismatch vs reference"

    print("KERNEL_OK")
</pallas_src>

<mosaic_0001>
module attributes {stable_mosaic.version = 11 : i64} {
  func.func @merge_kernel(%arg0: i32, %arg1: memref<1456x32xf32, #tpu.memory_space<vmem>>, %arg2: memref<1456x32xf32, #tpu.memory_space<vmem>>, %arg3: memref<1456x1xf32, #tpu.memory_space<vmem>>, %arg4: memref<1456x1xf32, #tpu.memory_space<vmem>>, %arg5: memref<1456x32xf32, #tpu.memory_space<vmem>>) attributes {dimension_semantics = [#tpu.dimension_semantics<parallel>], iteration_bounds = array<i64: 2>, scalar_prefetch = 0 : i64, scratch_operands = 0 : i64, tpu.core_type = #tpu.core_type<tc>, window_params = [{transform_indices = @transform_0, window_bounds = array<i64: 1456, 32>}, {transform_indices = @transform_1, window_bounds = array<i64: 1456, 32>}, {transform_indices = @transform_2, window_bounds = array<i64: 1456, 1>}, {transform_indices = @transform_3, window_bounds = array<i64: 1456, 1>}, {transform_indices = @transform_4, window_bounds = array<i64: 1456, 32>}]} {
    %c0 = arith.constant 0 : index
    %c0_0 = arith.constant 0 : index
    %0 = vector.load %arg1[%c0, %c0_0] : memref<1456x32xf32, #tpu.memory_space<vmem>>, vector<1456x32xf32>
    %c0_1 = arith.constant 0 : index
    %c0_2 = arith.constant 0 : index
    %1 = vector.load %arg2[%c0_1, %c0_2] : memref<1456x32xf32, #tpu.memory_space<vmem>>, vector<1456x32xf32>
    %c0_3 = arith.constant 0 : index
    %c0_4 = arith.constant 0 : index
    %2 = vector.load %arg3[%c0_3, %c0_4] : memref<1456x1xf32, #tpu.memory_space<vmem>>, vector<1456x1xf32>
    %c0_5 = arith.constant 0 : index
    %c0_6 = arith.constant 0 : index
    %3 = vector.load %arg4[%c0_5, %c0_6] : memref<1456x1xf32, #tpu.memory_space<vmem>>, vector<1456x1xf32>
    %4 = vector.broadcast %2 : vector<1456x1xf32> to vector<1456x32xf32>
    %5 = arith.mulf %0, %4 : vector<1456x32xf32>
    %6 = vector.broadcast %3 : vector<1456x1xf32> to vector<1456x32xf32>
    %7 = arith.mulf %1, %6 : vector<1456x32xf32>
    %8 = arith.addf %5, %7 : vector<1456x32xf32>
    %c0_7 = arith.constant 0 : index
    %c0_8 = arith.constant 0 : index
    %9 = vector.load %arg5[%c0_7, %c0_8] : memref<1456x32xf32, #tpu.memory_space<vmem>>, vector<1456x32xf32>
    tpu.vector_store %arg5[%c0_7, %c0_8], %8 {strides = array<i32>} : memref<1456x32xf32, #tpu.memory_space<vmem>>, vector<1456x32xf32>,
    return
  }
  func.func @transform_0(%arg0: i32) -> (i32, i32) {
    %c0_i32 = arith.constant 0 : i32
    %c0_i32_0 = arith.constant 0 : i32
    return %arg0, %c0_i32 : i32, i32
  }
  func.func @transform_1(%arg0: i32) -> (i32, i32) {
    %c0_i32 = arith.constant 0 : i32
    %c0_i32_0 = arith.constant 0 : i32
    return %arg0, %c0_i32 : i32, i32
  }
  func.func @transform_2(%arg0: i32) -> (i32, i32) {
    %c0_i32 = arith.constant 0 : i32
    %c0_i32_0 = arith.constant 0 : i32
    return %arg0, %c0_i32 : i32, i32
  }
  func.func @transform_3(%arg0: i32) -> (i32, i32) {
    %c0_i32 = arith.constant 0 : i32
    %c0_i32_0 = arith.constant 0 : i32
    return %arg0, %c0_i32 : i32, i32
  }
  func.func @transform_4(%arg0: i32) -> (i32, i32) {
    %c0_i32 = arith.constant 0 : i32
    %c0_i32_0 = arith.constant 0 : i32
    return %arg0, %c0_i32 : i32, i32
  }
}

</mosaic_0001>

<bundles_post_ra>
// kernel: tpu_custom_call.1
= control target key start
LH: loop header
LB: loop body
LE: loop exit
PB: predicated region body
PF: predicated region fallthrough
CT: control target
= control target key end

     0   :  { %s4231_s15 = smov 0   ;;  %s4233_s16 = smov 0   ;;  %s6074_s0 = inlined_call_operand.vmem [shape: f32[2901,32], index: 0, kind: input, shape index: {}]   ;;  %s6075_s1 = inlined_call_operand.vmem [shape: f32[2901,32], index: 1, kind: input, shape index: {}]   ;;  %s6076_s2 = inlined_call_operand.vmem [shape: f32[2901,1], index: 2, kind: input, shape index: {}]   ;;  %s6077_s3 = inlined_call_operand.vmem [shape: f32[2901,1], index: 3, kind: input, shape index: {}]   ;;  %s6078_s4 = inlined_call_operand.vmem [shape: f32[2901,32], index: 4, kind: output, shape index: {}]  }
   0x1   :  { %s4235_s17 = smov 0  }
   0x2 LB: > { %s4244_s18 = sadd.s32 4294967295, %s4171_s17   ;;  %s4246_s19 = sadd.s32 1, %s4171_s17   ;;  %s4171_s17 = sphi %s4235_s17, %s6355_s17   ;;  %s4167_s16 = sphi %s4233_s16, %s6354_s16   ;;  %s4163_s15 = sphi %s4231_s15, %s6353_s15  }
   0x3   : > { %s122_s20 = ssub.s32 %s4171_s17, %s4246_s19  ;;  %s125_s21 = sadd.s32 1, %s4167_s16 }
   0x4   : > { %p123_p0 = scmp.eq.s32.totalorder %s122_s20, 0  ;;  %p135_p1 = scmp.ne.s32.totalorder %s4167_s16, %s4163_s15 }
   0x5   : > { %p136_p2 = scmp.eq.s32.totalorder %s4244_s18, 1  ;;  %p4001_p3 = scmp.ge.s32.totalorder %s4171_s17, 1 }
   0x6   : > { %s4254_s22 = scalar_select %p123_p0, %s4167_s16, %s125_s21  }
   0x7   : > { %p4256_p4 = por %p136_p2, %p135_p1  ;;  %p228_p5 = scmp.lt.s32.totalorder %s4171_s17, 3 }
   0x9   : > { %p229_p6 = pnand %p4001_p3, %p228_p5 }
   0xb   : > { %232 = sbr.rel (%p229_p6) target bundleno = 1178 (0x49a), region = 36 }
  0x10   : > { %s4261_s24 = smul.u32 182, %s4244_s18  ;;  %v4205_v0 = vmov 0   ;;  %s281_s10 = sand.u32 1, %s4163_s15   ;;  %vm3439_vm0 = vcmask 261120  }
  0x11   : > { %4116 = vset.pattern.permute.xlu2 %v4205_v0  ;;  %4115 = vset.pattern.permute.xlu1 %v4205_v0  ;;  %s4024_s14 = smul.u32 1456, %s281_s10 }
  0x12   : > { %4114 = vset.pattern.permute.xlu0 %v4205_v0  ;;  %p289_p7 = scmp.lt.s32.totalorder %s4261_s24, 362  ;;  %s3630_s17 = ssub.s32 (%p4256_p4), 363, %s4261_s24 }
  0x13   : > { %s4866_s15 = scalar_lea.vmem [#allocation2], %s4024_s14   ;;  %s4021_s20 = smul.u32 (%p4256_p4), 1456, %s4244_s18 }
  0x14   : > { %s290_s25 = scalar_select %p289_p7, %s4261_s24, 362 }
  0x15   : > { %p3631_p8 = scmp.lt.s32.totalorder (%p4256_p4), %s3630_s17, 182 }
  0x16   : > { %s4265_s26 = sshll.u32 %s290_s25, 3 }
  0x17   : > { %s4271_s29 = scalar_lea.vmem %s6076_s2, %s4265_s26  ;;  %s4737_s6 = scalar_lea.vmem %s6077_s3, %s4265_s26 }
  0x18   : > { %v713_v1 = vld [vmem:[%s4271_s29 + $0x20] sm:$0xff]  ;;  %v711_v2 = vld [vmem:[%s4271_s29 + $0x10] sm:$0xff]  ;;  %v714_v4 = vld [vmem:[%s4271_s29 + $0x28] sm:$0xff]  ;;  %s4844_s9 = scalar_lea.vmem %s6074_s0, %s4265_s26  ;;  %s4853_s13 = scalar_lea.vmem %s6075_s1, %s4265_s26 }
  0x19   : > { %v709_v3 = vld [vmem:[%s4271_s29] sm:$0xff]  ;;  %1095 = vperm.xlu2 %4116, %v713_v1   ;;  %1085 = vperm.xlu1 %4115, %v711_v2   ;;  %v712_v5 = vld [vmem:[%s4271_s29 + $0x18] sm:$0xff]  ;;  %v710_v6 = vld [vmem:[%s4271_s29 + $0x8] sm:$0xff]  ;;  %s5939_s26 = scalar_lea.vmem (%p4256_p4), %s6078_s4, %s4021_s20  }
  0x1a   : > { %1075 = vperm.xlu0 %4114, %v709_v3   ;;  %v717_v7 = vld [vmem:[%s4271_s29 + $0x40] sm:$0xff]  ;;  %v716_v8 = vld [vmem:[%s4271_s29 + $0x38] sm:$0xff]  ;;  %v715_v9 = vld [vmem:[%s4271_s29 + $0x30] sm:$0xff] }
  0x1b   : > { %v720_v10 = vld [vmem:[%s4271_s29 + $0x58] sm:$0xff]  ;;  %v719_v11 = vld [vmem:[%s4271_s29 + $0x50] sm:$0xff]  ;;  %v718_v12 = vld [vmem:[%s4271_s29 + $0x48] sm:$0xff] }
  0x1c   : > { %v723_v13 = vld [vmem:[%s4271_s29 + $0x70] sm:$0xff]  ;;  %v722_v14 = vld [vmem:[%s4271_s29 + $0x68] sm:$0xff]  ;;  %v721_v15 = vld [vmem:[%s4271_s29 + $0x60] sm:$0xff] }
  0x1d   : > { %v726_v16 = vld [vmem:[%s4271_s29 + $0x88] sm:$0xff]  ;;  %v725_v17 = vld [vmem:[%s4271_s29 + $0x80] sm:$0xff]  ;;  %v724_v18 = vld [vmem:[%s4271_s29 + $0x78] sm:$0xff] }
  0x1e   : > { %v729_v19 = vld [vmem:[%s4271_s29 + $0xa0] sm:$0xff]  ;;  %v728_v20 = vld [vmem:[%s4271_s29 + $0x98] sm:$0xff]  ;;  %v727_v21 = vld [vmem:[%s4271_s29 + $0x90] sm:$0xff] }
  0x1f   : > { %v732_v22 = vld [vmem:[%s4271_s29 + $0xb8] sm:$0xff]  ;;  %v731_v23 = vld [vmem:[%s4271_s29 + $0xb0] sm:$0xff]  ;;  %v730_v24 = vld [vmem:[%s4271_s29 + $0xa8] sm:$0xff] }
  0x20   : > { %v735_v25 = vld [vmem:[%s4271_s29 + $0xd0] sm:$0xff]  ;;  %v734_v26 = vld [vmem:[%s4271_s29 + $0xc8] sm:$0xff]  ;;  %v733_v27 = vld [vmem:[%s4271_s29 + $0xc0] sm:$0xff] }
  0x21   : > { %1100 = vperm.xlu2 %4116, %v714_v4   ;;  %1090 = vperm.xlu1 %4115, %v712_v5   ;;  %v738_v28 = vld [vmem:[%s4271_s29 + $0xe8] sm:$0xff]  ;;  %v737_v29 = vld [vmem:[%s4271_s29 + $0xe0] sm:$0xff]  ;;  %v736_v30 = vld [vmem:[%s4271_s29 + $0xd8] sm:$0xff] }
  0x22   : > { %1080 = vperm.xlu0 %4114, %v710_v6   ;;  %v741_v31 = vld [vmem:[%s4271_s29 + $0x100] sm:$0xff]  ;;  %v740_v32 = vld [vmem:[%s4271_s29 + $0xf8] sm:$0xff]  ;;  %v739_v33 = vld [vmem:[%s4271_s29 + $0xf0] sm:$0xff] }
  0x23   : > { %v744_v34 = vld [vmem:[%s4271_s29 + $0x118] sm:$0xff]  ;;  %v743_v35 = vld [vmem:[%s4271_s29 + $0x110] sm:$0xff]  ;;  %v742_v36 = vld [vmem:[%s4271_s29 + $0x108] sm:$0xff] }
  0x24   : > { %v747_v38 = vld [vmem:[%s4271_s29 + $0x130] sm:$0xff]  ;;  %v746_v39 = vld [vmem:[%s4271_s29 + $0x128] sm:$0xff]  ;;  %v745_v40 = vld [vmem:[%s4271_s29 + $0x120] sm:$0xff] }
  0x25   : > { %v750_v42 = vld [vmem:[%s4271_s29 + $0x148] sm:$0xff]  ;;  %v749_v43 = vld [vmem:[%s4271_s29 + $0x140] sm:$0xff]  ;;  %v748_v44 = vld [vmem:[%s4271_s29 + $0x138] sm:$0xff] }
  0x26   : > { %v753_v46 = vld [vmem:[%s4271_s29 + $0x160] sm:$0xff]  ;;  %v752_v47 = vld [vmem:[%s4271_s29 + $0x158] sm:$0xff]  ;;  %v751_v48 = vld [vmem:[%s4271_s29 + $0x150] sm:$0xff] }
  0x27   : > { %v756_v52 = vld [vmem:[%s4271_s29 + $0x178] sm:$0xff]  ;;  %v755_v53 = vld [vmem:[%s4271_s29 + $0x170] sm:$0xff]  ;;  %v754_v54 = vld [vmem:[%s4271_s29 + $0x168] sm:$0xff] }
  0x28   : > { %v759_v58 = vld [vmem:[%s4271_s29 + $0x190] sm:$0xff]  ;;  %v758_v59 = vld [vmem:[%s4271_s29 + $0x188] sm:$0xff]  ;;  %v757_v60 = vld [vmem:[%s4271_s29 + $0x180] sm:$0xff] }
  0x29   : > { %1115 = vperm.xlu2 %4116, %v717_v7   ;;  %1110 = vperm.xlu1 %4115, %v716_v8   ;;  %v762_v0 = vld [vmem:[%s4271_s29 + $0x1a8] sm:$0xff]  ;;  %v761_v1 = vld [vmem:[%s4271_s29 + $0x1a0] sm:$0xff]  ;;  %v760_v2 = vld [vmem:[%s4271_s29 + $0x198] sm:$0xff] }
  0x2a   : > { %1105 = vperm.xlu0 %4114, %v715_v9   ;;  %v765_v6 = vld [vmem:[%s4271_s29 + $0x1c0] sm:$0xff]  ;;  %v764_v7 = vld [vmem:[%s4271_s29 + $0x1b8] sm:$0xff]  ;;  %v763_v8 = vld [vmem:[%s4271_s29 + $0x1b0] sm:$0xff] }
  0x31   : > { %1130 = vperm.xlu2 %4116, %v720_v10   ;;  %1125 = vperm.xlu1 %4115, %v719_v11  }
  0x32   : > { %1120 = vperm.xlu0 %4114, %v718_v12   ;;  %v768_v12 = vld [vmem:[%s4271_s29 + $0x1d8] sm:$0xff] }
  0x39   : > { %1145 = vperm.xlu2 %4116, %v723_v13   ;;  %1140 = vperm.xlu1 %4115, %v722_v14   ;;  %v767_v13 = vld [vmem:[%s4271_s29 + $0x1d0] sm:$0xff]  ;;  %v766_v14 = vld [vmem:[%s4271_s29 + $0x1c8] sm:$0xff] }
  0x3a   : > { %1135 = vperm.xlu0 %4114, %v721_v15  }
  0x41   : > { %1160 = vperm.xlu2 %4116, %v726_v16   ;;  %1155 = vperm.xlu1 %4115, %v725_v17  }
  0x42   : > { %1150 = vperm.xlu0 %4114, %v724_v18   ;;  %v771_v18 = vld [vmem:[%s4271_s29 + $0x1f0] sm:$0xff] }
  0x49   : > { %1175 = vperm.xlu2 %4116, %v729_v19   ;;  %1170 = vperm.xlu1 %4115, %v728_v20   ;;  %v770_v19 = vld [vmem:[%s4271_s29 + $0x1e8] sm:$0xff]  ;;  %v769_v20 = vld [vmem:[%s4271_s29 + $0x1e0] sm:$0xff] }
  0x4a   : > { %1165 = vperm.xlu0 %4114, %v727_v21  }
  0x51   : > { %1190 = vperm.xlu2 %4116, %v732_v22   ;;  %1185 = vperm.xlu1 %4115, %v731_v23  }
  0x52   : > { %1180 = vperm.xlu0 %4114, %v730_v24   ;;  %v774_v24 = vld [vmem:[%s4271_s29 + $0x208] sm:$0xff] }
  0x59   : > { %1205 = vperm.xlu2 %4116, %v735_v25   ;;  %1200 = vperm.xlu1 %4115, %v734_v26   ;;  %v773_v25 = vld [vmem:[%s4271_s29 + $0x200] sm:$0xff]  ;;  %v772_v26 = vld [vmem:[%s4271_s29 + $0x1f8] sm:$0xff] }
  0x5a   : > { %1195 = vperm.xlu0 %4114, %v733_v27  }
  0x61   : > { %1220 = vperm.xlu2 %4116, %v738_v28   ;;  %1215 = vperm.xlu1 %4115, %v737_v29  }
  0x62   : > { %1210 = vperm.xlu0 %4114, %v736_v30   ;;  %v777_v30 = vld [vmem:[%s4271_s29 + $0x220] sm:$0xff] }
  0x69   : > { %1235 = vperm.xlu2 %4116, %v741_v31   ;;  %1230 = vperm.xlu1 %4115, %v740_v32   ;;  %v776_v31 = vld [vmem:[%s4271_s29 + $0x218] sm:$0xff]  ;;  %v775_v32 = vld [vmem:[%s4271_s29 + $0x210] sm:$0xff] }
  0x6a   : > { %1225 = vperm.xlu0 %4114, %v739_v33  }
  0x71   : > { %1250 = vperm.xlu2 %4116, %v744_v34   ;;  %1245 = vperm.xlu1 %4115, %v743_v35  }
  0x72   : > { %1240 = vperm.xlu0 %4114, %v742_v36   ;;  %v780_v36 = vld [vmem:[%s4271_s29 + $0x238] sm:$0xff] }
  0x73   : > { %v4309_v37 = vpop.permute.xlu2 %1095 }
  0x79   : > { %1265 = vperm.xlu2 %4116, %v747_v38   ;;  %1260 = vperm.xlu1 %4115, %v746_v39   ;;  %v779_v38 = vld [vmem:[%s4271_s29 + $0x230] sm:$0xff]  ;;  %v778_v39 = vld [vmem:[%s4271_s29 + $0x228] sm:$0xff] }
  0x7a   : > { %1255 = vperm.xlu0 %4114, %v745_v40  }
  0x7b   : > { %v4314_v41 = vpop.permute.xlu2 %1100 }
  0x81   : > { %1280 = vperm.xlu2 %4116, %v750_v42   ;;  %1275 = vperm.xlu1 %4115, %v749_v43  }
  0x82   : > { %1270 = vperm.xlu0 %4114, %v748_v44   ;;  %v783_v44 = vld [vmem:[%s4271_s29 + $0x250] sm:$0xff] }
  0x83   : > { %v4319_v45 = vpop.permute.xlu2 %1115 }
  0x89   : > { %1295 = vperm.xlu2 %4116, %v753_v46   ;;  %1290 = vperm.xlu1 %4115, %v752_v47   ;;  %v782_v46 = vld [vmem:[%s4271_s29 + $0x248] sm:$0xff]  ;;  %v781_v47 = vld [vmem:[%s4271_s29 + $0x240] sm:$0xff] }
  0x8a   : > { %1285 = vperm.xlu0 %4114, %v751_v48  }
  0x8b   : > { %v4324_v49 = vpop.permute.xlu2 %1130  ;;  %v4326_v50 = vpop.permute.xlu1 %1085 }
  0x8c   : > { %v4328_v51 = vpop.permute.xlu0 %1075 }
  0x91   : > { %1310 = vperm.xlu2 %4116, %v756_v52   ;;  %1305 = vperm.xlu1 %4115, %v755_v53  }
  0x92   : > { %1300 = vperm.xlu0 %4114, %v754_v54   ;;  %v786_v54 = vld [vmem:[%s4271_s29 + $0x268] sm:$0xff] }
  0x93   : > { %v4333_v55 = vpop.permute.xlu2 %1145  ;;  %v4335_v56 = vpop.permute.xlu1 %1090 }
  0x94   : > { %v4337_v57 = vpop.permute.xlu0 %1080 }
  0x99   : > { %1325 = vperm.xlu2 %4116, %v759_v58   ;;  %1320 = vperm.xlu1 %4115, %v758_v59   ;;  %v785_v58 = vld [vmem:[%s4271_s29 + $0x260] sm:$0xff]  ;;  %v784_v59 = vld [vmem:[%s4271_s29 + $0x258] sm:$0xff] }
  0x9a   : > { %1315 = vperm.xlu0 %4114, %v757_v60  }
  0x9b   : > { %v4342_v61 = vpop.permute.xlu2 %1160  ;;  %v4344_v62 = vpop.permute.xlu1 %1110 }
  0x9c   : > { %v4346_v63 = vpop.permute.xlu0 %1105 }
  0xa1   : > { %1340 = vperm.xlu2 %4116, %v762_v0   ;;  %1335 = vperm.xlu1 %4115, %v761_v1  }
  0xa2   : > { %1330 = vperm.xlu0 %4114, %v760_v2   ;;  %v789_v2 = vld [vmem:[%s4271_s29 + $0x280] sm:$0xff] }
  0xa3   : > { %v4351_v3 = vpop.permute.xlu2 %1175  ;;  %v4353_v4 = vpop.permute.xlu1 %1125 }
  0xa4   : > { %v4355_v5 = vpop.permute.xlu0 %1120 }
  0xa9   : > { %1355 = vperm.xlu2 %4116, %v765_v6   ;;  %1350 = vperm.xlu1 %4115, %v764_v7   ;;  %v788_v6 = vld [vmem:[%s4271_s29 + $0x278] sm:$0xff]  ;;  %v787_v7 = vld [vmem:[%s4271_s29 + $0x270] sm:$0xff] }
  0xaa   : > { %1345 = vperm.xlu0 %4114, %v763_v8  }
  0xab   : > { %v4360_v9 = vpop.permute.xlu2 %1190  ;;  %v4362_v10 = vpop.permute.xlu1 %1140 }
  0xac   : > { %v4364_v11 = vpop.permute.xlu0 %1135 }
  0xb1   : > { %1370 = vperm.xlu2 %4116, %v768_v12   ;;  %1365 = vperm.xlu1 %4115, %v767_v13  }
  0xb2   : > { %1360 = vperm.xlu0 %4114, %v766_v14   ;;  %v792_v14 = vld [vmem:[%s4271_s29 + $0x298] sm:$0xff] }
  0xb3   : > { %v4369_v15 = vpop.permute.xlu2 %1205  ;;  %v4371_v16 = vpop.permute.xlu1 %1155 }
  0xb4   : > { %v4373_v17 = vpop.permute.xlu0 %1150 }
  0xb9   : > { %1385 = vperm.xlu2 %4116, %v771_v18   ;;  %1380 = vperm.xlu1 %4115, %v770_v19   ;;  %v791_v18 = vld [vmem:[%s4271_s29 + $0x290] sm:$0xff]  ;;  %v790_v19 = vld [vmem:[%s4271_s29 + $0x288] sm:$0xff] }
  0xba   : > { %1375 = vperm.xlu0 %4114, %v769_v20  }
  0xbb   : > { %v4378_v21 = vpop.permute.xlu2 %1220  ;;  %v4380_v22 = vpop.permute.xlu1 %1170 }
  0xbc   : > { %v4382_v23 = vpop.permute.xlu0 %1165 }
  0xc1   : > { %1400 = vperm.xlu2 %4116, %v774_v24   ;;  %1395 = vperm.xlu1 %4115, %v773_v25  }
  0xc2   : > { %1390 = vperm.xlu0 %4114, %v772_v26   ;;  %v795_v26 = vld [vmem:[%s4271_s29 + $0x2b0] sm:$0xff] }
  0xc3   : > { %v4387_v27 = vpop.permute.xlu2 %1235  ;;  %v4389_v28 = vpop.permute.xlu1 %1185 }
  0xc4   : > { %v4391_v29 = vpop.permute.xlu0 %1180 }
  0xc9   : > { %1415 = vperm.xlu2 %4116, %v777_v30   ;;  %1410 = vperm.xlu1 %4115, %v776_v31   ;;  %v794_v30 = vld [vmem:[%s4271_s29 + $0x2a8] sm:$0xff]  ;;  %v793_v31 = vld [vmem:[%s4271_s29 + $0x2a0] sm:$0xff] }
  0xca   : > { %1405 = vperm.xlu0 %4114, %v775_v32  }
  0xcb   : > { %v4396_v33 = vpop.permute.xlu2 %1250  ;;  %v4398_v34 = vpop.permute.xlu1 %1200 }
  0xcc   : > { %v4400_v35 = vpop.permute.xlu0 %1195 }
  0xd1   : > { %1430 = vperm.xlu2 %4116, %v780_v36   ;;  %1425 = vperm.xlu1 %4115, %v779_v38  }
  0xd2   : > { %1420 = vperm.xlu0 %4114, %v778_v39   ;;  %v798_v39 = vld [vmem:[%s4271_s29 + $0x2c8] sm:$0xff] }
  0xd3   : > { %v4405_v40 = vpop.permute.xlu2 %1265  ;;  %v4407_v42 = vpop.permute.xlu1 %1215 }
  0xd4   : > { %v4409_v43 = vpop.permute.xlu0 %1210 }
  0xd9   : > { %1445 = vperm.xlu2 %4116, %v783_v44   ;;  %1440 = vperm.xlu1 %4115, %v782_v46   ;;  %v797_v44 = vld [vmem:[%s4271_s29 + $0x2c0] sm:$0xff]  ;;  %v796_v46 = vld [vmem:[%s4271_s29 + $0x2b8] sm:$0xff] }
  0xda   : > { %1435 = vperm.xlu0 %4114, %v781_v47  }
  0xdb   : > { %v4414_v48 = vpop.permute.xlu2 %1280  ;;  %v4416_v52 = vpop.permute.xlu1 %1230 }
  0xdc   : > { %v4418_v53 = vpop.permute.xlu0 %1225 }
  0xe1   : > { %1460 = vperm.xlu2 %4116, %v786_v54   ;;  %1455 = vperm.xlu1 %4115, %v785_v58  }
  0xe2   : > { %1450 = vperm.xlu0 %4114, %v784_v59   ;;  %v801_v59 = vld [vmem:[%s4271_s29 + $0x2e0] sm:$0xff] }
  0xe3   : > { %v4423_v60 = vpop.permute.xlu2 %1295  ;;  %v4425_v0 = vpop.permute.xlu1 %1245 }
  0xe4   : > { %v4427_v1 = vpop.permute.xlu0 %1240 }
  0xe9   : > { %1475 = vperm.xlu2 %4116, %v789_v2   ;;  %1470 = vperm.xlu1 %4115, %v788_v6   ;;  %v800_v2 = vld [vmem:[%s4271_s29 + $0x2d8] sm:$0xff]  ;;  %v799_v6 = vld [vmem:[%s4271_s29 + $0x2d0] sm:$0xff] }
  0xea   : > { %1465 = vperm.xlu0 %4114, %v787_v7  }
  0xeb   : > { %v4432_v8 = vpop.permute.xlu2 %1310  ;;  %v4434_v12 = vpop.permute.xlu1 %1260 }
  0xec   : > { %6080 = vst [vmem:[#allocation3_spill] sm:$0xff] %v4432_v8  ;;  %v4436_v13 = vpop.permute.xlu0 %1255  ;;  %v938_v8 = vld [vmem:[%s4737_s6 + $0x178] sm:$0xff] }
  0xf1   : > { %1490 = vperm.xlu2 %4116, %v792_v14   ;;  %1485 = vperm.xlu1 %4115, %v791_v18  }
  0xf2   : > { %1480 = vperm.xlu0 %4114, %v790_v19   ;;  %v804_v19 = vld [vmem:[%s4271_s29 + $0x2f8] sm:$0xff] }
  0xf3   : > { %v4441_v20 = vpop.permute.xlu2 %1325  ;;  %v4443_v24 = vpop.permute.xlu1 %1275 }
  0xf4   : > { %6081 = vst [vmem:[#allocation4_spill] sm:$0xff] %v4441_v20  ;;  %v4445_v25 = vpop.permute.xlu0 %1270  ;;  %v927_v20 = vld [vmem:[%s4737_s6 + $0x120] sm:$0xff] }
  0xf9   : > { %1505 = vperm.xlu2 %4116, %v795_v26   ;;  %1500 = vperm.xlu1 %4115, %v794_v30   ;;  %v803_v26 = vld [vmem:[%s4271_s29 + $0x2f0] sm:$0xff]  ;;  %v802_v30 = vld [vmem:[%s4271_s29 + $0x2e8] sm:$0xff] }
  0xfa   : > { %1495 = vperm.xlu0 %4114, %v793_v31  }
  0xfb   : > { %v4450_v32 = vpop.permute.xlu2 %1340  ;;  %v4452_v36 = vpop.permute.xlu1 %1290 }
  0xfc   : > { %6082 = vst [vmem:[#allocation5_spill] sm:$0xff] %v4450_v32  ;;  %v4454_v38 = vpop.permute.xlu0 %1285  ;;  %v818_v32 = vld [vmem:[%s4271_s29 + $0x368] sm:$0xff] }
  0xfd   : > { %6083 = vst [vmem:[#allocation6_spill] sm:$0xff] %v4452_v36 }
 0x101   : > { %1520 = vperm.xlu2 %4116, %v798_v39   ;;  %1515 = vperm.xlu1 %4115, %v797_v44  }
 0x102   : > { %1510 = vperm.xlu0 %4114, %v796_v46   ;;  %v807_v46 = vld [vmem:[%s4271_s29 + $0x310] sm:$0xff] }
 0x103   : > { %v4459_v47 = vpop.permute.xlu2 %1355  ;;  %v4461_v54 = vpop.permute.xlu1 %1305 }
 0x104   : > { %6084 = vst [vmem:[#allocation7_spill] sm:$0xff] %v4459_v47  ;;  %v4463_v58 = vpop.permute.xlu0 %1300  ;;  %v812_v47 = vld [vmem:[%s4271_s29 + $0x338] sm:$0xff] }
 0x105   : > { %6085 = vst [vmem:[#allocation8_spill] sm:$0xff] %v4461_v54  ;;  %v926_v54 = vld [vmem:[%s4737_s6 + $0x118] sm:$0xff] }
 0x109   : > { %1535 = vperm.xlu2 %4116, %v801_v59   ;;  %1530 = vperm.xlu1 %4115, %v800_v2   ;;  %v806_v59 = vld [vmem:[%s4271_s29 + $0x308] sm:$0xff]  ;;  %v805_v2 = vld [vmem:[%s4271_s29 + $0x300] sm:$0xff] }
 0x10a   : > { %1525 = vperm.xlu0 %4114, %v799_v6  }
 0x10b   : > { %v4468_v7 = vpop.permute.xlu2 %1370  ;;  %v4470_v14 = vpop.permute.xlu1 %1320 }
 0x10c   : > { %6086 = vst [vmem:[#allocation9_spill] sm:$0xff] %v4468_v7  ;;  %v4472_v18 = vpop.permute.xlu0 %1315  ;;  %v808_v7 = vld [vmem:[%s4271_s29 + $0x318] sm:$0xff] }
 0x10d   : > { %6087 = vst [vmem:[#allocation10_spill] sm:$0xff] %v4470_v14  ;;  %v821_v14 = vld [vmem:[%s4271_s29 + $0x380] sm:$0xff] }
 0x111   : > { %1550 = vperm.xlu2 %4116, %v804_v19   ;;  %1545 = vperm.xlu1 %4115, %v803_v26  }
 0x112   : > { %1540 = vperm.xlu0 %4114, %v802_v30   ;;  %v810_v30 = vld [vmem:[%s4271_s29 + $0x328] sm:$0xff] }
 0x113   : > { %v4477_v31 = vpop.permute.xlu2 %1385  ;;  %v4479_v39 = vpop.permute.xlu1 %1335 }
 0x114   : > { %6088 = vst [vmem:[#allocation11_spill] sm:$0xff] %v4477_v31  ;;  %v4481_v44 = vpop.permute.xlu0 %1330  ;;  %v809_v31 = vld [vmem:[%s4271_s29 + $0x320] sm:$0xff] }
 0x115   : > { %6089 = vst [vmem:[#allocation12_spill] sm:$0xff] %v4479_v39  ;;  %v815_v39 = vld [vmem:[%s4271_s29 + $0x350] sm:$0xff] }
 0x119   : > { %1565 = vperm.xlu2 %4116, %v807_v46   ;;  %1560 = vperm.xlu1 %4115, %v806_v59  }
 0x11a   : > { %1555 = vperm.xlu0 %4114, %v805_v2  }
 0x11b   : > { %v4486_v6 = vpop.permute.xlu2 %1400  ;;  %v4488_v19 = vpop.permute.xlu1 %1350 }
 0x11c   : > { %6090 = vst [vmem:[#allocation13_spill] sm:$0xff] %v4486_v6  ;;  %v4490_v26 = vpop.permute.xlu0 %1345  ;;  %v813_v6 = vld [vmem:[%s4271_s29 + $0x340] sm:$0xff] }
 0x11d   : > { %6091 = vst [vmem:[#allocation14_spill] sm:$0xff] %v4488_v19  ;;  %v811_v19 = vld [vmem:[%s4271_s29 + $0x330] sm:$0xff] }
 0x121   : > { %1580 = vperm.xlu2 %4116, %v810_v30   ;;  %1575 = vperm.xlu1 %4115, %v809_v31  }
 0x122   : > { %1570 = vperm.xlu0 %4114, %v808_v7  }
 0x123   : > { %v4495_v46 = vpop.permute.xlu2 %1415  ;;  %v4497_v59 = vpop.permute.xlu1 %1365 }
 0x124   : > { %6092 = vst [vmem:[#allocation15_spill] sm:$0xff] %v4495_v46  ;;  %v4499_v2 = vpop.permute.xlu0 %1360  ;;  %v816_v46 = vld [vmem:[%s4271_s29 + $0x358] sm:$0xff] }
 0x125   : > { %6093 = vst [vmem:[#allocation16_spill] sm:$0xff] %v4497_v59  ;;  %v814_v59 = vld [vmem:[%s4271_s29 + $0x348] sm:$0xff] }
 0x126   : > { %6094 = vst [vmem:[#allocation17_spill] sm:$0xff] %v4499_v2  ;;  %v939_v2 = vld [vmem:[%s4737_s6 + $0x180] sm:$0xff] }
 0x129   : > { %1595 = vperm.xlu2 %4116, %v813_v6   ;;  %1590 = vperm.xlu1 %4115, %v812_v47  }
 0x12a   : > { %1585 = vperm.xlu0 %4114, %v811_v19  }
 0x12b   : > { %v4504_v30 = vpop.permute.xlu2 %1430  ;;  %v4506_v31 = vpop.permute.xlu1 %1380 }
 0x12c   : > { %6095 = vst [vmem:[#allocation18_spill] sm:$0xff] %v4504_v30  ;;  %v4508_v7 = vpop.permute.xlu0 %1375  ;;  %v819_v30 = vld [vmem:[%s4271_s29 + $0x370] sm:$0xff] }
 0x12d   : > { %6096 = vst [vmem:[#allocation19_spill] sm:$0xff] %v4506_v31  ;;  %v817_v31 = vld [vmem:[%s4271_s29 + $0x360] sm:$0xff] }
 0x12e   : > { %6097 = vst [vmem:[#allocation20_spill] sm:$0xff] %v4508_v7 }
 0x131   : > { %1610 = vperm.xlu2 %4116, %v816_v46   ;;  %1605 = vperm.xlu1 %4115, %v815_v39  }
 0x132   : > { %1600 = vperm.xlu0 %4114, %v814_v59  }
 0x133   : > { %v4513_v6 = vpop.permute.xlu2 %1445  ;;  %v4515_v47 = vpop.permute.xlu1 %1395 }
 0x134   : > { %6098 = vst [vmem:[#allocation21_spill] sm:$0xff] %v4513_v6  ;;  %v4517_v19 = vpop.permute.xlu0 %1390  ;;  %v822_v6 = vld [vmem:[%s4271_s29 + $0x388] sm:$0xff] }
 0x135   : > { %6099 = vst [vmem:[#allocation22_spill] sm:$0xff] %v4515_v47  ;;  %v820_v47 = vld [vmem:[%s4271_s29 + $0x378] sm:$0xff] }
 0x136   : > { %6100 = vst [vmem:[#allocation23_spill] sm:$0xff] %v4517_v19  ;;  %v824_v19 = vld [vmem:[%s4271_s29 + $0x398] sm:$0xff] }
 0x139   : > { %1625 = vperm.xlu2 %4116, %v819_v30   ;;  %1620 = vperm.xlu1 %4115, %v818_v32  }
 0x13a   : > { %1615 = vperm.xlu0 %4114, %v817_v31  }
 0x13b   : > { %v4522_v46 = vpop.permute.xlu2 %1460  ;;  %v4524_v39 = vpop.permute.xlu1 %1410 }
 0x13c   : > { %6101 = vst [vmem:[#allocation24_spill] sm:$0xff] %v4522_v46  ;;  %v4526_v59 = vpop.permute.xlu0 %1405  ;;  %v825_v46 = vld [vmem:[%s4271_s29 + $0x3a0] sm:$0xff] }
 0x13d   : > { %6102 = vst [vmem:[#allocation25_spill] sm:$0xff] %v4524_v39  ;;  %v823_v39 = vld [vmem:[%s4271_s29 + $0x390] sm:$0xff] }
 0x13e   : > { %6103 = vst [vmem:[#allocation26_spill] sm:$0xff] %v4526_v59  ;;  %v827_v59 = vld [vmem:[%s4271_s29 + $0x3b0] sm:$0xff] }
 0x141   : > { %1640 = vperm.xlu2 %4116, %v822_v6   ;;  %1635 = vperm.xlu1 %4115, %v821_v14  }
 0x142   : > { %1630 = vperm.xlu0 %4114, %v820_v47  }
 0x143   : > { %v4531_v30 = vpop.permute.xlu2 %1475  ;;  %v4533_v32 = vpop.permute.xlu1 %1425 }
 0x144   : > { %6104 = vst [vmem:[#allocation27_spill] sm:$0xff] %v4531_v30  ;;  %v4535_v31 = vpop.permute.xlu0 %1420  ;;  %v828_v30 = vld [vmem:[%s4271_s29 + $0x3b8] sm:$0xff] }
 0x145   : > { %6105 = vst [vmem:[#allocation28_spill] sm:$0xff] %v4533_v32  ;;  %v826_v32 = vld [vmem:[%s4271_s29 + $0x3a8] sm:$0xff] }
 0x146   : > { %6106 = vst [vmem:[#allocation29_spill] sm:$0xff] %v4535_v31  ;;  %v830_v31 = vld [vmem:[%s4271_s29 + $0x3c8] sm:$0xff] }
 0x149   : > { %1655 = vperm.xlu2 %4116, %v825_v46   ;;  %1650 = vperm.xlu1 %4115, %v824_v19  }
 0x14a   : > { %1645 = vperm.xlu0 %4114, %v823_v39  }
 0x14b   : > { %v4540_v6 = vpop.permute.xlu2 %1490  ;;  %v4542_v14 = vpop.permute.xlu1 %1440 }
 0x14c   : > { %6107 = vst [vmem:[#allocation30_spill] sm:$0xff] %v4540_v6  ;;  %v4544_v47 = vpop.permute.xlu0 %1435  ;;  %v831_v6 = vld [vmem:[%s4271_s29 + $0x3d0] sm:$0xff] }
 0x14d   : > { %6108 = vst [vmem:[#allocation31_spill] sm:$0xff] %v4542_v14  ;;  %v829_v14 = vld [vmem:[%s4271_s29 + $0x3c0] sm:$0xff] }
 0x14e   : > { %6109 = vst [vmem:[#allocation32_spill] sm:$0xff] %v4544_v47  ;;  %v833_v47 = vld [vmem:[%s4271_s29 + $0x3e0] sm:$0xff] }
 0x151   : > { %1670 = vperm.xlu2 %4116, %v828_v30   ;;  %1665 = vperm.xlu1 %4115, %v827_v59  }
 0x152   : > { %1660 = vperm.xlu0 %4114, %v826_v32  }
 0x153   : > { %v4549_v46 = vpop.permute.xlu2 %1505  ;;  %v4551_v19 = vpop.permute.xlu1 %1455 }
 0x154   : > { %6110 = vst [vmem:[#allocation33_spill] sm:$0xff] %v4549_v46  ;;  %v4553_v39 = vpop.permute.xlu0 %1450  ;;  %v834_v46 = vld [vmem:[%s4271_s29 + $0x3e8] sm:$0xff] }
 0x155   : > { %6111 = vst [vmem:[#allocation34_spill] sm:$0xff] %v4551_v19  ;;  %v832_v19 = vld [vmem:[%s4271_s29 + $0x3d8] sm:$0xff] }
 0x156   : > { %6112 = vst [vmem:[#allocation35_spill] sm:$0xff] %v4553_v39  ;;  %v836_v39 = vld [vmem:[%s4271_s29 + $0x3f8] sm:$0xff] }
 0x159   : > { %1685 = vperm.xlu2 %4116, %v831_v6   ;;  %1680 = vperm.xlu1 %4115, %v830_v31  }
 0x15a   : > { %1675 = vperm.xlu0 %4114, %v829_v14  }
 0x15b   : > { %v4558_v30 = vpop.permute.xlu2 %1520  ;;  %v4560_v59 = vpop.permute.xlu1 %1470 }
 0x15c   : > { %6113 = vst [vmem:[#allocation36_spill] sm:$0xff] %v4558_v30  ;;  %v4562_v32 = vpop.permute.xlu0 %1465  ;;  %v837_v30 = vld [vmem:[%s4271_s29 + $0x400] sm:$0xff] }
 0x15d   : > { %6114 = vst [vmem:[#allocation37_spill] sm:$0xff] %v4560_v59  ;;  %v835_v59 = vld [vmem:[%s4271_s29 + $0x3f0] sm:$0xff] }
 0x15e   : > { %6115 = vst [vmem:[#allocation38_spill] sm:$0xff] %v4562_v32  ;;  %v839_v32 = vld [vmem:[%s4271_s29 + $0x410] sm:$0xff] }
 0x161   : > { %1700 = vperm.xlu2 %4116, %v834_v46   ;;  %1695 = vperm.xlu1 %4115, %v833_v47  }
 0x162   : > { %1690 = vperm.xlu0 %4114, %v832_v19  }
 0x163   : > { %v4567_v6 = vpop.permute.xlu2 %1535  ;;  %v4569_v31 = vpop.permute.xlu1 %1485 }
 0x164   : > { %6116 = vst [vmem:[#allocation39_spill] sm:$0xff] %v4567_v6  ;;  %v4571_v14 = vpop.permute.xlu0 %1480  ;;  %v840_v6 = vld [vmem:[%s4271_s29 + $0x418] sm:$0xff] }
 0x165   : > { %6117 = vst [vmem:[#allocation40_spill] sm:$0xff] %v4569_v31  ;;  %v838_v31 = vld [vmem:[%s4271_s29 + $0x408] sm:$0xff] }
 0x166   : > { %6118 = vst [vmem:[#allocation41_spill] sm:$0xff] %v4571_v14  ;;  %v842_v14 = vld [vmem:[%s4271_s29 + $0x428] sm:$0xff] }
 0x169   : > { %1715 = vperm.xlu2 %4116, %v837_v30   ;;  %1710 = vperm.xlu1 %4115, %v836_v39  }
 0x16a   : > { %1705 = vperm.xlu0 %4114, %v835_v59  }
 0x16b   : > { %v4576_v46 = vpop.permute.xlu2 %1550  ;;  %v4578_v47 = vpop.permute.xlu1 %1500 }
 0x16c   : > { %6119 = vst [vmem:[#allocation42_spill] sm:$0xff] %v4576_v46  ;;  %v4580_v19 = vpop.permute.xlu0 %1495  ;;  %v843_v46 = vld [vmem:[%s4271_s29 + $0x430] sm:$0xff] }
 0x16d   : > { %6120 = vst [vmem:[#allocation43_spill] sm:$0xff] %v4578_v47  ;;  %v841_v47 = vld [vmem:[%s4271_s29 + $0x420] sm:$0xff] }
 0x16e   : > { %6121 = vst [vmem:[#allocation44_spill] sm:$0xff] %v4580_v19  ;;  %v845_v19 = vld [vmem:[%s4271_s29 + $0x440] sm:$0xff] }
 0x171   : > { %1730 = vperm.xlu2 %4116, %v840_v6   ;;  %1725 = vperm.xlu1 %4115, %v839_v32  }
 0x172   : > { %1720 = vperm.xlu0 %4114, %v838_v31  }
 0x173   : > { %v4585_v30 = vpop.permute.xlu2 %1565  ;;  %v4587_v39 = vpop.permute.xlu1 %1515 }
 0x174   : > { %6122 = vst [vmem:[#allocation45_spill] sm:$0xff] %v4585_v30  ;;  %v4589_v59 = vpop.permute.xlu0 %1510  ;;  %v846_v30 = vld [vmem:[%s4271_s29 + $0x448] sm:$0xff] }
 0x175   : > { %6123 = vst [vmem:[#allocation46_spill] sm:$0xff] %v4587_v39  ;;  %v844_v39 = vld [vmem:[%s4271_s29 + $0x438] sm:$0xff] }
 0x176   : > { %6124 = vst [vmem:[#allocation47_spill] sm:$0xff] %v4589_v59  ;;  %v848_v59 = vld [vmem:[%s4271_s29 + $0x458] sm:$0xff] }
 0x179   : > { %1745 = vperm.xlu2 %4116, %v843_v46   ;;  %1740 = vperm.xlu1 %4115, %v842_v14  }
 0x17a   : > { %1735 = vperm.xlu0 %4114, %v841_v47  }
 0x17b   : > { %v4594_v6 = vpop.permute.xlu2 %1580  ;;  %v4596_v32 = vpop.permute.xlu1 %1530 }
 0x17c   : > { %6125 = vst [vmem:[#allocation48_spill] sm:$0xff] %v4594_v6  ;;  %v4598_v31 = vpop.permute.xlu0 %1525  ;;  %v849_v6 = vld [vmem:[%s4271_s29 + $0x460] sm:$0xff] }
 0x17d   : > { %6126 = vst [vmem:[#allocation49_spill] sm:$0xff] %v4596_v32  ;;  %v847_v32 = vld [vmem:[%s4271_s29 + $0x450] sm:$0xff] }
 0x17e   : > { %6127 = vst [vmem:[#allocation50_spill] sm:$0xff] %v4598_v31  ;;  %v851_v31 = vld [vmem:[%s4271_s29 + $0x470] sm:$0xff] }
 0x181   : > { %1760 = vperm.xlu2 %4116, %v846_v30   ;;  %1755 = vperm.xlu1 %4115, %v845_v19  }
 0x182   : > { %1750 = vperm.xlu0 %4114, %v844_v39  }
 0x183   : > { %v4603_v46 = vpop.permute.xlu2 %1595  ;;  %v4605_v14 = vpop.permute.xlu1 %1545 }
 0x184   : > { %6128 = vst [vmem:[#allocation51_spill] sm:$0xff] %v4603_v46  ;;  %v4607_v47 = vpop.permute.xlu0 %1540  ;;  %v852_v46 = vld [vmem:[%s4271_s29 + $0x478] sm:$0xff] }
 0x185   : > { %6129 = vst [vmem:[#allocation52_spill] sm:$0xff] %v4605_v14  ;;  %v850_v14 = vld [vmem:[%s4271_s29 + $0x468] sm:$0xff] }
 0x186   : > { %6130 = vst [vmem:[#allocation53_spill] sm:$0xff] %v4607_v47  ;;  %v854_v47 = vld [vmem:[%s4271_s29 + $0x488] sm:$0xff] }
 0x189   : > { %1775 = vperm.xlu2 %4116, %v849_v6   ;;  %1770 = vperm.xlu1 %4115, %v848_v59  }
 0x18a   : > { %1765 = vperm.xlu0 %4114, %v847_v32  }
 0x18b   : > { %v4612_v30 = vpop.permute.xlu2 %1610  ;;  %v4614_v19 = vpop.permute.xlu1 %1560 }
 0x18c   : > { %6131 = vst [vmem:[#allocation54_spill] sm:$0xff] %v4612_v30  ;;  %v4616_v39 = vpop.permute.xlu0 %1555  ;;  %v855_v30 = vld [vmem:[%s4271_s29 + $0x490] sm:$0xff] }
 0x18d   : > { %6132 = vst [vmem:[#allocation55_spill] sm:$0xff] %v4614_v19  ;;  %v853_v19 = vld [vmem:[%s4271_s29 + $0x480] sm:$0xff] }
 0x18e   : > { %6133 = vst [vmem:[#allocation56_spill] sm:$0xff] %v4616_v39  ;;  %v857_v39 = vld [vmem:[%s4271_s29 + $0x4a0] sm:$0xff] }
 0x191   : > { %1790 = vperm.xlu2 %4116, %v852_v46   ;;  %1785 = vperm.xlu1 %4115, %v851_v31  }
 0x192   : > { %1780 = vperm.xlu0 %4114, %v850_v14  }
 0x193   : > { %v4621_v6 = vpop.permute.xlu2 %1625  ;;  %v4623_v59 = vpop.permute.xlu1 %1575 }
 0x194   : > { %6134 = vst [vmem:[#allocation57_spill] sm:$0xff] %v4621_v6  ;;  %v4625_v32 = vpop.permute.xlu0 %1570  ;;  %v858_v6 = vld [vmem:[%s4271_s29 + $0x4a8] sm:$0xff] }
 0x195   : > { %6135 = vst [vmem:[#allocation58_spill] sm:$0xff] %v4623_v59  ;;  %v856_v59 = vld [vmem:[%s4271_s29 + $0x498] sm:$0xff] }
 0x196   : > { %6136 = vst [vmem:[#allocation59_spill] sm:$0xff] %v4625_v32  ;;  %v860_v32 = vld [vmem:[%s4271_s29 + $0x4b8] sm:$0xff] }
 0x199   : > { %1805 = vperm.xlu2 %4116, %v855_v30   ;;  %1800 = vperm.xlu1 %4115, %v854_v47  }
 0x19a   : > { %1795 = vperm.xlu0 %4114, %v853_v19  }
 0x19b   : > { %v4630_v46 = vpop.permute.xlu2 %1640  ;;  %v4632_v31 = vpop.permute.xlu1 %1590 }
 0x19c   : > { %6137 = vst [vmem:[#allocation60_spill] sm:$0xff] %v4630_v46  ;;  %v4634_v14 = vpop.permute.xlu0 %1585  ;;  %v861_v46 = vld [vmem:[%s4271_s29 + $0x4c0] sm:$0xff] }
 0x19d   : > { %6138 = vst [vmem:[#allocation61_spill] sm:$0xff] %v4632_v31  ;;  %v859_v31 = vld [vmem:[%s4271_s29 + $0x4b0] sm:$0xff] }
 0x19e   : > { %6139 = vst [vmem:[#allocation62_spill] sm:$0xff] %v4634_v14  ;;  %v863_v14 = vld [vmem:[%s4271_s29 + $0x4d0] sm:$0xff] }
 0x1a1   : > { %1820 = vperm.xlu2 %4116, %v858_v6   ;;  %1815 = vperm.xlu1 %4115, %v857_v39  }
 0x1a2   : > { %1810 = vperm.xlu0 %4114, %v856_v59  }
 0x1a3   : > { %v4639_v30 = vpop.permute.xlu2 %1655  ;;  %v4641_v47 = vpop.permute.xlu1 %1605 }
 0x1a4   : > { %6140 = vst [vmem:[#allocation63_spill] sm:$0xff] %v4639_v30  ;;  %v4643_v19 = vpop.permute.xlu0 %1600  ;;  %v864_v30 = vld [vmem:[%s4271_s29 + $0x4d8] sm:$0xff] }
 0x1a5   : > { %6141 = vst [vmem:[#allocation64_spill] sm:$0xff] %v4641_v47  ;;  %v862_v47 = vld [vmem:[%s4271_s29 + $0x4c8] sm:$0xff] }
 0x1a6   : > { %6142 = vst [vmem:[#allocation65_spill] sm:$0xff] %v4643_v19  ;;  %v866_v19 = vld [vmem:[%s4271_s29 + $0x4e8] sm:$0xff] }
 0x1a9   : > { %1835 = vperm.xlu2 %4116, %v861_v46   ;;  %1830 = vperm.xlu1 %4115, %v860_v32  }
 0x1aa   : > { %1825 = vperm.xlu0 %4114, %v859_v31  }
 0x1ab   : > { %v4648_v6 = vpop.permute.xlu2 %1670  ;;  %v4650_v39 = vpop.permute.xlu1 %1620 }
 0x1ac   : > { %6143 = vst [vmem:[#allocation66_spill] sm:$0xff] %v4648_v6  ;;  %v4652_v59 = vpop.permute.xlu0 %1615  ;;  %v867_v6 = vld [vmem:[%s4271_s29 + $0x4f0] sm:$0xff] }
 0x1ad   : > { %6144 = vst [vmem:[#allocation67_spill] sm:$0xff] %v4650_v39  ;;  %v865_v39 = vld [vmem:[%s4271_s29 + $0x4e0] sm:$0xff] }
 0x1ae   : > { %6145 = vst [vmem:[#allocation68_spill] sm:$0xff] %v4652_v59  ;;  %v869_v59 = vld [vmem:[%s4271_s29 + $0x500] sm:$0xff] }
 0x1b1   : > { %1850 = vperm.xlu2 %4116, %v864_v30   ;;  %1845 = vperm.xlu1 %4115, %v863_v14  }
 0x1b2   : > { %1840 = vperm.xlu0 %4114, %v862_v47  }
 0x1b3   : > { %v4657_v46 = vpop.permute.xlu2 %1685  ;;  %v4659_v32 = vpop.permute.xlu1 %1635 }
 0x1b4   : > { %6146 = vst [vmem:[#allocation69_spill] sm:$0xff] %v4657_v46  ;;  %v4661_v31 = vpop.permute.xlu0 %1630  ;;  %v870_v46 = vld [vmem:[%s4271_s29 + $0x508] sm:$0xff] }
 0x1b5   : > { %6147 = vst [vmem:[#allocation70_spill] sm:$0xff] %v4659_v32  ;;  %v868_v32 = vld [vmem:[%s4271_s29 + $0x4f8] sm:$0xff] }
 0x1b6   : > { %6148 = vst [vmem:[#allocation71_spill] sm:$0xff] %v4661_v31  ;;  %v872_v31 = vld [vmem:[%s4271_s29 + $0x518] sm:$0xff] }
 0x1b9   : > { %1865 = vperm.xlu2 %4116, %v867_v6   ;;  %1860 = vperm.xlu1 %4115, %v866_v19  }
 0x1ba   : > { %1855 = vperm.xlu0 %4114, %v865_v39  }
 0x1bb   : > { %v4666_v30 = vpop.permute.xlu2 %1700  ;;  %v4668_v14 = vpop.permute.xlu1 %1650 }
 0x1bc   : > { %6149 = vst [vmem:[#allocation72_spill] sm:$0xff] %v4666_v30  ;;  %v4670_v47 = vpop.permute.xlu0 %1645  ;;  %v873_v30 = vld [vmem:[%s4271_s29 + $0x520] sm:$0xff] }
 0x1bd   : > { %6150 = vst [vmem:[#allocation73_spill] sm:$0xff] %v4668_v14  ;;  %v871_v14 = vld [vmem:[%s4271_s29 + $0x510] sm:$0xff] }
 0x1be   : > { %6151 = vst [vmem:[#allocation74_spill] sm:$0xff] %v4670_v47  ;;  %v875_v47 = vld [vmem:[%s4271_s29 + $0x530] sm:$0xff] }
 0x1c1   : > { %1880 = vperm.xlu2 %4116, %v870_v46   ;;  %1875 = vperm.xlu1 %4115, %v869_v59  }
 0x1c2   : > { %1870 = vperm.xlu0 %4114, %v868_v32  }
 0x1c3   : > { %v4675_v6 = vpop.permute.xlu2 %1715  ;;  %v4677_v19 = vpop.permute.xlu1 %1665 }
 0x1c4   : > { %6152 = vst [vmem:[#allocation75_spill] sm:$0xff] %v4675_v6  ;;  %v4679_v39 = vpop.permute.xlu0 %1660  ;;  %v876_v6 = vld [vmem:[%s4271_s29 + $0x538] sm:$0xff] }
 0x1c5   : > { %6153 = vst [vmem:[#allocation76_spill] sm:$0xff] %v4677_v19  ;;  %v874_v19 = vld [vmem:[%s4271_s29 + $0x528] sm:$0xff] }
 0x1c6   : > { %6154 = vst [vmem:[#allocation77_spill] sm:$0xff] %v4679_v39  ;;  %v878_v39 = vld [vmem:[%s4271_s29 + $0x548] sm:$0xff] }
 0x1c9   : > { %1895 = vperm.xlu2 %4116, %v873_v30   ;;  %1890 = vperm.xlu1 %4115, %v872_v31  }
 0x1ca   : > { %1885 = vperm.xlu0 %4114, %v871_v14  }
 0x1cb   : > { %v4684_v46 = vpop.permute.xlu2 %1730  ;;  %v4686_v59 = vpop.permute.xlu1 %1680 }
 0x1cc   : > { %6155 = vst [vmem:[#allocation78_spill] sm:$0xff] %v4684_v46  ;;  %v4688_v32 = vpop.permute.xlu0 %1675  ;;  %v879_v46 = vld [vmem:[%s4271_s29 + $0x550] sm:$0xff] }
 0x1cd   : > { %6156 = vst [vmem:[#allocation79_spill] sm:$0xff] %v4686_v59  ;;  %v877_v59 = vld [vmem:[%s4271_s29 + $0x540] sm:$0xff] }
 0x1ce   : > { %6157 = vst [vmem:[#allocation80_spill] sm:$0xff] %v4688_v32  ;;  %v881_v32 = vld [vmem:[%s4271_s29 + $0x560] sm:$0xff] }
 0x1d1   : > { %1910 = vperm.xlu2 %4116, %v876_v6   ;;  %1905 = vperm.xlu1 %4115, %v875_v47  }
 0x1d2   : > { %1900 = vperm.xlu0 %4114, %v874_v19  }
 0x1d3   : > { %v4693_v30 = vpop.permute.xlu2 %1745  ;;  %v4695_v31 = vpop.permute.xlu1 %1695 }
 0x1d4   : > { %6158 = vst [vmem:[#allocation81_spill] sm:$0xff] %v4693_v30  ;;  %v4697_v14 = vpop.permute.xlu0 %1690  ;;  %v882_v30 = vld [vmem:[%s4271_s29 + $0x568] sm:$0xff] }
 0x1d5   : > { %6159 = vst [vmem:[#allocation82_spill] sm:$0xff] %v4695_v31  ;;  %v880_v31 = vld [vmem:[%s4271_s29 + $0x558] sm:$0xff] }
 0x1d6   : > { %6160 = vst [vmem:[#allocation83_spill] sm:$0xff] %v4697_v14  ;;  %v884_v14 = vld [vmem:[%s4271_s29 + $0x578] sm:$0xff] }
 0x1d9   : > { %1925 = vperm.xlu2 %4116, %v879_v46   ;;  %1920 = vperm.xlu1 %4115, %v878_v39  }
 0x1da   : > { %1915 = vperm.xlu0 %4114, %v877_v59  }
 0x1db   : > { %v4702_v6 = vpop.permute.xlu2 %1760  ;;  %v4704_v47 = vpop.permute.xlu1 %1710 }
 0x1dc   : > { %6161 = vst [vmem:[#allocation84_spill] sm:$0xff] %v4702_v6  ;;  %v4706_v19 = vpop.permute.xlu0 %1705  ;;  %v885_v6 = vld [vmem:[%s4271_s29 + $0x580] sm:$0xff] }
 0x1dd   : > { %6162 = vst [vmem:[#allocation85_spill] sm:$0xff] %v4704_v47  ;;  %v883_v47 = vld [vmem:[%s4271_s29 + $0x570] sm:$0xff] }
 0x1de   : > { %6163 = vst [vmem:[#allocation86_spill] sm:$0xff] %v4706_v19  ;;  %v887_v19 = vld [vmem:[%s4271_s29 + $0x590] sm:$0xff] }
 0x1e1   : > { %1940 = vperm.xlu2 %4116, %v882_v30   ;;  %1935 = vperm.xlu1 %4115, %v881_v32  }
 0x1e2   : > { %1930 = vperm.xlu0 %4114, %v880_v31  }
 0x1e3   : > { %v4711_v46 = vpop.permute.xlu2 %1775  ;;  %v4713_v39 = vpop.permute.xlu1 %1725 }
 0x1e4   : > { %6164 = vst [vmem:[#allocation87_spill] sm:$0xff] %v4711_v46  ;;  %v4715_v59 = vpop.permute.xlu0 %1720  ;;  %v888_v46 = vld [vmem:[%s4271_s29 + $0x598] sm:$0xff] }
 0x1e5   : > { %6165 = vst [vmem:[#allocation88_spill] sm:$0xff] %v4713_v39  ;;  %v886_v39 = vld [vmem:[%s4271_s29 + $0x588] sm:$0xff] }
 0x1e6   : > { %6166 = vst [vmem:[#allocation89_spill] sm:$0xff] %v4715_v59 }
 0x1e9   : > { %1955 = vperm.xlu2 %4116, %v885_v6   ;;  %1950 = vperm.xlu1 %4115, %v884_v14   ;;  %v891_v6 = vld [vmem:[%s4737_s6] sm:$0xff] }
 0x1ea   : > { %1945 = vperm.xlu0 %4114, %v883_v47   ;;  %v890_v47 = vld [vmem:[%s4271_s29 + $0x5a8] sm:$0xff] }
 0x1eb   : > { %v4720_v30 = vpop.permute.xlu2 %1790  ;;  %v4722_v32 = vpop.permute.xlu1 %1740 }
 0x1ec   : > { %6167 = vst [vmem:[#allocation90_spill] sm:$0xff] %v4720_v30  ;;  %v4724_v31 = vpop.permute.xlu0 %1735  ;;  %v894_v30 = vld [vmem:[%s4737_s6 + $0x18] sm:$0xff] }
 0x1ed   : > { %6168 = vst [vmem:[#allocation91_spill] sm:$0xff] %v4722_v32  ;;  %v892_v32 = vld [vmem:[%s4737_s6 + $0x8] sm:$0xff] }
 0x1ee   : > { %6169 = vst [vmem:[#allocation92_spill] sm:$0xff] %v4724_v31 }
 0x1f1   : > { %1970 = vperm.xlu2 %4116, %v888_v46   ;;  %1965 = vperm.xlu1 %4115, %v887_v19   ;;  %v889_v46 = vld [vmem:[%s4271_s29 + $0x5a0] sm:$0xff] }
 0x1f2   : > { %1960 = vperm.xlu0 %4114, %v886_v39  }
 0x1f3   : > { %v4729_v59 = vpop.permute.xlu2 %1805  ;;  %v4731_v7 = vpop.permute.xlu1 %1755 }
 0x1f4   : > { %6170 = vst [vmem:[#allocation93_spill] sm:$0xff] %v4729_v59  ;;  %v4739_v14 = vpop.permute.xlu0 %1750 }
 0x1f5   : > { %6171 = vst [vmem:[#allocation94_spill] sm:$0xff] %v4731_v7  ;;  %v893_v7 = vld [vmem:[%s4737_s6 + $0x10] sm:$0xff] }
 0x1f6   : > { %6172 = vst [vmem:[#allocation95_spill] sm:$0xff] %v4739_v14  ;;  %v896_v14 = vld [vmem:[%s4737_s6 + $0x28] sm:$0xff] }
 0x1f9   : > { %2167 = vperm.xlu2 %4116, %v891_v6   ;;  %1980 = vperm.xlu1 %4115, %v890_v47  }
 0x1fa   : > { %1975 = vperm.xlu0 %4114, %v889_v46  }
 0x1fb   : > { %v4744_v19 = vpop.permute.xlu2 %1820  ;;  %v4746_v39 = vpop.permute.xlu1 %1770 }
 0x1fc   : > { %6173 = vst [vmem:[#allocation96_spill] sm:$0xff] %v4744_v19  ;;  %v4748_v59 = vpop.permute.xlu0 %1765  ;;  %v897_v19 = vld [vmem:[%s4737_s6 + $0x30] sm:$0xff] }
 0x1fd   : > { %6174 = vst [vmem:[#allocation97_spill] sm:$0xff] %v4746_v39  ;;  %v895_v39 = vld [vmem:[%s4737_s6 + $0x20] sm:$0xff] }
 0x1fe   : > { %6175 = vst [vmem:[#allocation98_spill] sm:$0xff] %v4748_v59  ;;  %v899_v59 = vld [vmem:[%s4737_s6 + $0x40] sm:$0xff] }
 0x201   : > { %2182 = vperm.xlu2 %4116, %v894_v30   ;;  %2177 = vperm.xlu1 %4115, %v893_v7  }
 0x202   : > { %2172 = vperm.xlu0 %4114, %v892_v32  }
 0x203   : > { %v4753_v6 = vpop.permute.xlu2 %1835  ;;  %v4755_v47 = vpop.permute.xlu1 %1785 }
 0x204   : > { %6176 = vst [vmem:[#allocation99_spill] sm:$0xff] %v4753_v6  ;;  %v4757_v46 = vpop.permute.xlu0 %1780  ;;  %v900_v6 = vld [vmem:[%s4737_s6 + $0x48] sm:$0xff] }
 0x205   : > { %6177 = vst [vmem:[#allocation100_spill] sm:$0xff] %v4755_v47  ;;  %v898_v47 = vld [vmem:[%s4737_s6 + $0x38] sm:$0xff] }
 0x206   : > { %6178 = vst [vmem:[#allocation101_spill] sm:$0xff] %v4757_v46  ;;  %v902_v46 = vld [vmem:[%s4737_s6 + $0x58] sm:$0xff] }
 0x209   : > { %2197 = vperm.xlu2 %4116, %v897_v19   ;;  %2192 = vperm.xlu1 %4115, %v896_v14  }
 0x20a   : > { %2187 = vperm.xlu0 %4114, %v895_v39  }
 0x20b   : > { %v4762_v30 = vpop.permute.xlu2 %1850  ;;  %v4764_v7 = vpop.permute.xlu1 %1800 }
 0x20c   : > { %6179 = vst [vmem:[#allocation102_spill] sm:$0xff] %v4762_v30  ;;  %v4766_v32 = vpop.permute.xlu0 %1795  ;;  %v903_v30 = vld [vmem:[%s4737_s6 + $0x60] sm:$0xff] }
 0x20d   : > { %6180 = vst [vmem:[#allocation103_spill] sm:$0xff] %v4764_v7  ;;  %v901_v7 = vld [vmem:[%s4737_s6 + $0x50] sm:$0xff] }
 0x20e   : > { %6181 = vst [vmem:[#allocation104_spill] sm:$0xff] %v4766_v32  ;;  %v905_v32 = vld [vmem:[%s4737_s6 + $0x70] sm:$0xff] }
 0x211   : > { %2212 = vperm.xlu2 %4116, %v900_v6   ;;  %2207 = vperm.xlu1 %4115, %v899_v59  }
 0x212   : > { %2202 = vperm.xlu0 %4114, %v898_v47  }
 0x213   : > { %v4771_v19 = vpop.permute.xlu2 %1865  ;;  %v4773_v14 = vpop.permute.xlu1 %1815 }
 0x214   : > { %6182 = vst [vmem:[#allocation105_spill] sm:$0xff] %v4771_v19  ;;  %v4775_v39 = vpop.permute.xlu0 %1810  ;;  %v906_v19 = vld [vmem:[%s4737_s6 + $0x78] sm:$0xff] }
 0x215   : > { %6183 = vst [vmem:[#allocation106_spill] sm:$0xff] %v4773_v14  ;;  %v904_v14 = vld [vmem:[%s4737_s6 + $0x68] sm:$0xff] }
 0x216   : > { %6184 = vst [vmem:[#allocation107_spill] sm:$0xff] %v4775_v39  ;;  %v908_v39 = vld [vmem:[%s4737_s6 + $0x88] sm:$0xff] }
 0x219   : > { %2227 = vperm.xlu2 %4116, %v903_v30   ;;  %2222 = vperm.xlu1 %4115, %v902_v46  }
 0x21a   : > { %2217 = vperm.xlu0 %4114, %v901_v7  }
 0x21b   : > { %v4780_v6 = vpop.permute.xlu2 %1880  ;;  %v4782_v59 = vpop.permute.xlu1 %1830 }
 0x21c   : > { %6185 = vst [vmem:[#allocation108_spill] sm:$0xff] %v4780_v6  ;;  %v4784_v47 = vpop.permute.xlu0 %1825  ;;  %v909_v6 = vld [vmem:[%s4737_s6 + $0x90] sm:$0xff] }
 0x21d   : > { %6186 = vst [vmem:[#allocation109_spill] sm:$0xff] %v4782_v59  ;;  %v907_v59 = vld [vmem:[%s4737_s6 + $0x80] sm:$0xff] }
 0x21e   : > { %6187 = vst [vmem:[#allocation110_spill] sm:$0xff] %v4784_v47  ;;  %v911_v47 = vld [vmem:[%s4737_s6 + $0xa0] sm:$0xff] }
 0x221   : > { %2242 = vperm.xlu2 %4116, %v906_v19   ;;  %2237 = vperm.xlu1 %4115, %v905_v32  }
 0x222   : > { %2232 = vperm.xlu0 %4114, %v904_v14  }
 0x223   : > { %v4789_v30 = vpop.permute.xlu2 %1895  ;;  %v4791_v46 = vpop.permute.xlu1 %1845 }
 0x224   : > { %6188 = vst [vmem:[#allocation111_spill] sm:$0xff] %v4789_v30  ;;  %v4793_v7 = vpop.permute.xlu0 %1840  ;;  %v912_v30 = vld [vmem:[%s4737_s6 + $0xa8] sm:$0xff] }
 0x225   : > { %6189 = vst [vmem:[#allocation112_spill] sm:$0xff] %v4791_v46  ;;  %v910_v46 = vld [vmem:[%s4737_s6 + $0x98] sm:$0xff] }
 0x226   : > { %6190 = vst [vmem:[#allocation113_spill] sm:$0xff] %v4793_v7  ;;  %v914_v7 = vld [vmem:[%s4737_s6 + $0xb8] sm:$0xff] }
 0x229   : > { %2257 = vperm.xlu2 %4116, %v909_v6   ;;  %2252 = vperm.xlu1 %4115, %v908_v39  }
 0x22a   : > { %2247 = vperm.xlu0 %4114, %v907_v59  }
 0x22b   : > { %v4798_v19 = vpop.permute.xlu2 %1910  ;;  %v4800_v32 = vpop.permute.xlu1 %1860 }
 0x22c   : > { %6191 = vst [vmem:[#allocation114_spill] sm:$0xff] %v4798_v19  ;;  %v4802_v14 = vpop.permute.xlu0 %1855  ;;  %v915_v19 = vld [vmem:[%s4737_s6 + $0xc0] sm:$0xff] }
 0x22d   : > { %6192 = vst [vmem:[#allocation115_spill] sm:$0xff] %v4800_v32  ;;  %v913_v32 = vld [vmem:[%s4737_s6 + $0xb0] sm:$0xff] }
 0x22e   : > { %6193 = vst [vmem:[#allocation116_spill] sm:$0xff] %v4802_v14  ;;  %v917_v14 = vld [vmem:[%s4737_s6 + $0xd0] sm:$0xff] }
 0x231   : > { %2272 = vperm.xlu2 %4116, %v912_v30   ;;  %2267 = vperm.xlu1 %4115, %v911_v47  }
 0x232   : > { %2262 = vperm.xlu0 %4114, %v910_v46  }
 0x233   : > { %v4807_v6 = vpop.permute.xlu2 %1925  ;;  %v4809_v39 = vpop.permute.xlu1 %1875 }
 0x234   : > { %6194 = vst [vmem:[#allocation117_spill] sm:$0xff] %v4807_v6  ;;  %v4811_v59 = vpop.permute.xlu0 %1870  ;;  %v918_v6 = vld [vmem:[%s4737_s6 + $0xd8] sm:$0xff] }
 0x235   : > { %6195 = vst [vmem:[#allocation118_spill] sm:$0xff] %v4809_v39  ;;  %v916_v39 = vld [vmem:[%s4737_s6 + $0xc8] sm:$0xff] }
 0x236   : > { %6196 = vst [vmem:[#allocation119_spill] sm:$0xff] %v4811_v59 }
 0x239   : > { %2287 = vperm.xlu2 %4116, %v915_v19   ;;  %2282 = vperm.xlu1 %4115, %v914_v7  }
 0x23a   : > { %2277 = vperm.xlu0 %4114, %v913_v32  }
 0x23b   : > { %v4816_v30 = vpop.permute.xlu2 %1940  ;;  %v4818_v47 = vpop.permute.xlu1 %1890 }
 0x23c   : > { %6197 = vst [vmem:[#allocation120_spill] sm:$0xff] %v4816_v30  ;;  %v4820_v46 = vpop.permute.xlu0 %1885  ;;  %v921_v30 = vld [vmem:[%s4737_s6 + $0xf0] sm:$0xff] }
 0x23d   : > { %6198 = vst [vmem:[#allocation121_spill] sm:$0xff] %v4818_v47  ;;  %v920_v47 = vld [vmem:[%s4737_s6 + $0xe8] sm:$0xff] }
 0x23e   : > { %6199 = vst [vmem:[#allocation122_spill] sm:$0xff] %v4820_v46  ;;  %v919_v46 = vld [vmem:[%s4737_s6 + $0xe0] sm:$0xff] }
 0x241   : > { %2302 = vperm.xlu2 %4116, %v918_v6   ;;  %2297 = vperm.xlu1 %4115, %v917_v14  }
 0x242   : > { %2292 = vperm.xlu0 %4114, %v916_v39  }
 0x243   : > { %v4825_v19 = vpop.permute.xlu2 %1955  ;;  %v4827_v7 = vpop.permute.xlu1 %1905 }
 0x244   : > { %6200 = vst [vmem:[#allocation123_spill] sm:$0xff] %v4825_v19  ;;  %v4829_v32 = vpop.permute.xlu0 %1900  ;;  %v924_v19 = vld [vmem:[%s4737_s6 + $0x108] sm:$0xff] }
 0x245   : > { %6201 = vst [vmem:[#allocation124_spill] sm:$0xff] %v4827_v7  ;;  %v923_v7 = vld [vmem:[%s4737_s6 + $0x100] sm:$0xff] }
 0x246   : > { %6202 = vst [vmem:[#allocation125_spill] sm:$0xff] %v4829_v32 }
 0x249   : > { %2317 = vperm.xlu2 %4116, %v921_v30   ;;  %2312 = vperm.xlu1 %4115, %v920_v47   ;;  %v922_v30 = vld [vmem:[%s4737_s6 + $0xf8] sm:$0xff]  ;;  %v345_v47 = vld [vmem:[%s4844_s9] sm:$0xff] }
 0x24a   : > { %2307 = vperm.xlu0 %4114, %v919_v46   ;;  %v527_v46 = vld [vmem:[%s4853_s13] sm:$0xff] }
 0x24b   : > { %v4834_v6 = vpop.permute.xlu2 %1970  ;;  %v4836_v14 = vpop.permute.xlu1 %1920 }
 0x24c   : > { %6203 = vst [vmem:[#allocation126_spill] sm:$0xff] %v4834_v6  ;;  %v4838_v39 = vpop.permute.xlu0 %1915 }
 0x24d   : > { %6204 = vst [vmem:[#allocation127_spill] sm:$0xff] %v4836_v14 }
 0x24e   : > { %6205 = vst [vmem:[#allocation128_spill] sm:$0xff] %v4838_v39  ;;  %v1983_v39 = vmul.f32 %v4328_v51, %v345_v47  ;;  %v530_v51 = vld [vmem:[%s4853_s13 + $0x18] sm:$0xff] }
 0x251   : > { %2332 = vperm.xlu2 %4116, %v924_v19   ;;  %2327 = vperm.xlu1 %4115, %v923_v7   ;;  %v925_v19 = vld [vmem:[%s4737_s6 + $0x110] sm:$0xff]  ;;  %v348_v7 = vld [vmem:[%s4844_s9 + $0x18] sm:$0xff] }
 0x252   : > { %2322 = vperm.xlu0 %4114, %v922_v30  }
 0x253   : > { %v2168_v6 = vpop.permute.xlu2 %2167  ;;  %v4858_v14 = vpop.permute.xlu1 %1935 }
 0x254   : > { %6206 = vst [vmem:[#allocation129_spill] sm:$0xff] %v4858_v14  ;;  %v3075_v32 = vmul.f32 %v2168_v6, %v527_v46  ;;  %v4861_v59 = vpop.permute.xlu0 %1930  ;;  %v930_v14 = vld [vmem:[%s4737_s6 + $0x138] sm:$0xff] }
 0x255   : > { %6207 = vst [vmem:[#allocation130_spill] sm:$0xff] %v4861_v59  ;;  %v928_v59 = vld [vmem:[%s4737_s6 + $0x128] sm:$0xff] }
 0x256   : > { %v3257_v31 = vadd.f32 %v3075_v32, %v1983_v39  ;;  %v1986_v39 = vmul.f32 %v4335_v56, %v348_v7 }
 0x258   : > { %3440 = vst.msk [vmem:[%s4866_s15] sm:$0xff] %vm3439_vm0, %v3257_v31  ;;  %v929_v31 = vld [vmem:[%s4737_s6 + $0x130] sm:$0xff] }
 0x259   : > { %2347 = vperm.xlu2 %4116, %v927_v20   ;;  %2342 = vperm.xlu1 %4115, %v926_v54   ;;  %v351_v20 = vld [vmem:[%s4844_s9 + $0x30] sm:$0xff] }
 0x25a   : > { %2337 = vperm.xlu0 %4114, %v925_v19   ;;  %v533_v54 = vld [vmem:[%s4853_s13 + $0x30] sm:$0xff]  ;;  %v1989_v7 = vmul.f32 %v4346_v63, %v351_v20 }
 0x25b   : > { %v2183_v32 = vpop.permute.xlu2 %2182  ;;  %v4872_v6 = vpop.permute.xlu1 %1950 }
 0x25c   : > { %6208 = vst [vmem:[#allocation131_spill] sm:$0xff] %v4872_v6  ;;  %v3078_v30 = vmul.f32 %v2183_v32, %v530_v51  ;;  %v4875_v47 = vpop.permute.xlu0 %1945  ;;  %v931_v6 = vld [vmem:[%s4737_s6 + $0x140] sm:$0xff] }
 0x25d   : > { %6209 = vst [vmem:[#allocation132_spill] sm:$0xff] %v4875_v47 }
 0x25e   : > { %v3260_v46 = vadd.f32 %v3078_v30, %v1986_v39  ;;  %v933_v30 = vld [vmem:[%s4737_s6 + $0x150] sm:$0xff] }
 0x260   : > { %3443 = vst.msk [vmem:[%s4866_s15 + $0x18] sm:$0xff] %vm3439_vm0, %v3260_v46  ;;  %v932_v46 = vld [vmem:[%s4737_s6 + $0x148] sm:$0xff] }
 0x261   : > { %2362 = vperm.xlu2 %4116, %v930_v14   ;;  %2357 = vperm.xlu1 %4115, %v929_v31   ;;  %v536_v14 = vld [vmem:[%s4853_s13 + $0x48] sm:$0xff] }
 0x262   : > { %2352 = vperm.xlu0 %4114, %v928_v59   ;;  %v354_v59 = vld [vmem:[%s4844_s9 + $0x48] sm:$0xff] }
 0x263   : > { %v2198_v56 = vpop.permute.xlu2 %2197  ;;  %v4884_v19 = vpop.permute.xlu1 %1965  ;;  %v1992_v20 = vmul.f32 %v4355_v5, %v354_v59  ;;  %v528_v5 = vld [vmem:[%s4853_s13 + $0x8] sm:$0xff] }
 0x264   : > { %6210 = vst [vmem:[#allocation133_spill] sm:$0xff] %v4884_v19  ;;  %v3081_v51 = vmul.f32 %v2198_v56, %v533_v54  ;;  %v4887_v32 = vpop.permute.xlu0 %1960  ;;  %v934_v19 = vld [vmem:[%s4737_s6 + $0x158] sm:$0xff] }
 0x265   : > { %6211 = vst [vmem:[#allocation134_spill] sm:$0xff] %v4887_v32  ;;  %v529_v32 = vld [vmem:[%s4853_s13 + $0x10] sm:$0xff] }
 0x266   : > { %v3263_v39 = vadd.f32 %v3081_v51, %v1989_v7  ;;  %v936_v51 = vld [vmem:[%s4737_s6 + $0x168] sm:$0xff] }
 0x268   : > { %3446 = vst.msk [vmem:[%s4866_s15 + $0x30] sm:$0xff] %vm3439_vm0, %v3263_v39  ;;  %v935_v39 = vld [vmem:[%s4737_s6 + $0x160] sm:$0xff] }
 0x269   : > { %2377 = vperm.xlu2 %4116, %v933_v30   ;;  %2372 = vperm.xlu1 %4115, %v932_v46   ;;  %v347_v30 = vld [vmem:[%s4844_s9 + $0x10] sm:$0xff]  ;;  %v357_v46 = vld [vmem:[%s4844_s9 + $0x60] sm:$0xff] }
 0x26a   : > { %2367 = vperm.xlu0 %4114, %v931_v6   ;;  %v539_v6 = vld [vmem:[%s4853_s13 + $0x60] sm:$0xff] }
 0x26b   : > { %v2213_v63 = vpop.permute.xlu2 %2212  ;;  %v4896_v31 = vpop.permute.xlu1 %1980 }
 0x26c   : > { %6212 = vst [vmem:[#allocation135_spill] sm:$0xff] %v4896_v31  ;;  %v3084_v54 = vmul.f32 %v2213_v63, %v536_v14  ;;  %v4899_v56 = vpop.permute.xlu0 %1975  ;;  %v346_v31 = vld [vmem:[%s4844_s9 + $0x8] sm:$0xff]  ;;  %v1985_v63 = vmul.f32 %v4326_v50, %v347_v30  ;;  %v937_v50 = vld [vmem:[%s4737_s6 + $0x170] sm:$0xff] }
 0x26d   : > { %6213 = vst [vmem:[#allocation136_spill] sm:$0xff] %v4899_v56  ;;  %v350_v30 = vld [vmem:[%s4844_s9 + $0x28] sm:$0xff] }
 0x26e   : > { %v3266_v7 = vadd.f32 %v3084_v54, %v1992_v20  ;;  %v1995_v20 = vmul.f32 %v4364_v11, %v357_v46  ;;  %v360_v11 = vld [vmem:[%s4844_s9 + $0x78] sm:$0xff]  ;;  %v531_v46 = vld [vmem:[%s4853_s13 + $0x20] sm:$0xff] }
 0x270   : > { %3449 = vst.msk [vmem:[%s4866_s15 + $0x48] sm:$0xff] %vm3439_vm0, %v3266_v7 }
 0x271   : > { %2392 = vperm.xlu2 %4116, %v936_v51   ;;  %2387 = vperm.xlu1 %4115, %v935_v39   ;;  %v1984_v39 = vmul.f32 %v4337_v57, %v346_v31  ;;  %v532_v57 = vld [vmem:[%s4853_s13 + $0x28] sm:$0xff]  ;;  %v349_v31 = vld [vmem:[%s4844_s9 + $0x20] sm:$0xff] }
 0x272   : > { %2382 = vperm.xlu0 %4114, %v934_v19  }
 0x273   : > { %v2228_v59 = vpop.permute.xlu2 %2227  ;;  %v2178_v14 = vpop.permute.xlu1 %2177 }
 0x274   : > { %v3087_v54 = vmul.f32 %v2228_v59, %v539_v6  ;;  %v3077_v7 = vmul.f32 %v2178_v14, %v529_v32  ;;  %v2173_v51 = vpop.permute.xlu0 %2172  ;;  %v542_v32 = vld [vmem:[%s4853_s13 + $0x78] sm:$0xff] }
 0x275   : > { %v3076_v19 = vmul.f32 %v2173_v51, %v528_v5 }
 0x276   : > { %v3269_v56 = vadd.f32 %v3087_v54, %v1995_v20  ;;  %v3259_v47 = vadd.f32 %v3077_v7, %v1985_v63  ;;  %v942_v54 = vld [vmem:[%s4737_s6 + $0x198] sm:$0xff]  ;;  %v941_v7 = vld [vmem:[%s4737_s6 + $0x190] sm:$0xff] }
 0x277   : > { %v3258_v36 = vadd.f32 %v3076_v19, %v1984_v39  ;;  %v353_v39 = vld [vmem:[%s4844_s9 + $0x40] sm:$0xff]  ;;  %v545_v19 = vld [vmem:[%s4853_s13 + $0x90] sm:$0xff] }
 0x278   : > { %3452 = vst.msk [vmem:[%s4866_s15 + $0x60] sm:$0xff] %vm3439_vm0, %v3269_v56  ;;  %v1988_v56 = vmul.f32 %v4314_v41, %v350_v30  ;;  %v940_v41 = vld [vmem:[%s4737_s6 + $0x188] sm:$0xff]  ;;  %v534_v30 = vld [vmem:[%s4853_s13 + $0x38] sm:$0xff] }
 0x279   : > { %3442 = vst.msk [vmem:[%s4866_s15 + $0x10] sm:$0xff] %vm3439_vm0, %v3259_v47  ;;  %2407 = vperm.xlu2 %4116, %v939_v2   ;;  %2402 = vperm.xlu1 %4115, %v938_v8   ;;  %v1998_v8 = vmul.f32 %v4373_v17, %v360_v11  ;;  %v363_v17 = vld [vmem:[%s4844_s9 + $0x90] sm:$0xff] }
 0x27a   : > { %3441 = vst.msk [vmem:[%s4866_s15 + $0x8] sm:$0xff] %vm3439_vm0, %v3258_v36  ;;  %2397 = vperm.xlu0 %4114, %v937_v50   ;;  %v1987_v36 = vmul.f32 %v4309_v37, %v349_v31  ;;  %v535_v37 = vld [vmem:[%s4853_s13 + $0x40] sm:$0xff]  ;;  %v352_v50 = vld [vmem:[%s4844_s9 + $0x38] sm:$0xff]  ;;  %v2001_v31 = vmul.f32 %v4382_v23, %v363_v17  ;;  %v366_v23 = vld [vmem:[%s4844_s9 + $0xa8] sm:$0xff] }
 0x27b   : > { %v2243_v6 = vpop.permute.xlu2 %2242  ;;  %v2193_v5 = vpop.permute.xlu1 %2192  ;;  %v2004_v17 = vmul.f32 %v4391_v29, %v366_v23  ;;  %v369_v29 = vld [vmem:[%s4844_s9 + $0xc0] sm:$0xff] }
 0x27c   : > { %v3090_v2 = vmul.f32 %v2243_v6, %v542_v32  ;;  %v3080_v47 = vmul.f32 %v2193_v5, %v532_v57  ;;  %v2188_v59 = vpop.permute.xlu0 %2187  ;;  %v1991_v57 = vmul.f32 %v4319_v45, %v353_v39  ;;  %v943_v45 = vld [vmem:[%s4737_s6 + $0x1a0] sm:$0xff] }
 0x27d   : > { %v3079_v14 = vmul.f32 %v2188_v59, %v531_v46  ;;  %v945_v59 = vld [vmem:[%s4737_s6 + $0x1b0] sm:$0xff] }
 0x27e   : > { %v3272_v63 = vadd.f32 %v3090_v2, %v1998_v8  ;;  %v3262_v20 = vadd.f32 %v3080_v47, %v1988_v56  ;;  %v1990_v56 = vmul.f32 %v4344_v62, %v352_v50  ;;  %v538_v62 = vld [vmem:[%s4853_s13 + $0x58] sm:$0xff] }
 0x27f   : > { %v3261_v51 = vadd.f32 %v3079_v14, %v1987_v36  ;;  %v944_v36 = vld [vmem:[%s4737_s6 + $0x1a8] sm:$0xff] }
 0x280   : > { %3455 = vst.msk [vmem:[%s4866_s15 + $0x78] sm:$0xff] %vm3439_vm0, %v3272_v63  ;;  %v356_v63 = vld [vmem:[%s4844_s9 + $0x58] sm:$0xff] }
 0x281   : > { %3445 = vst.msk [vmem:[%s4866_s15 + $0x28] sm:$0xff] %vm3439_vm0, %v3262_v20  ;;  %2422 = vperm.xlu2 %4116, %v942_v54   ;;  %2417 = vperm.xlu1 %4115, %v941_v7   ;;  %v548_v20 = vld [vmem:[%s4853_s13 + $0xa8] sm:$0xff]  ;;  %v355_v54 = vld [vmem:[%s4844_s9 + $0x50] sm:$0xff]  ;;  %v1994_v39 = vmul.f32 %v4324_v49, %v356_v63  ;;  %v946_v49 = vld [vmem:[%s4737_s6 + $0x1b8] sm:$0xff] }
 0x282   : > { %3444 = vst.msk [vmem:[%s4866_s15 + $0x20] sm:$0xff] %vm3439_vm0, %v3261_v51  ;;  %2412 = vperm.xlu0 %4114, %v940_v41   ;;  %v537_v7 = vld [vmem:[%s4853_s13 + $0x50] sm:$0xff] }
 0x283   : > { %v2258_v11 = vpop.permute.xlu2 %2257  ;;  %v2208_v32 = vpop.permute.xlu1 %2207 }
 0x284   : > { %v3093_v46 = vmul.f32 %v2258_v11, %v545_v19  ;;  %v3083_v6 = vmul.f32 %v2208_v32, %v535_v37  ;;  %v2203_v5 = vpop.permute.xlu0 %2202 }
 0x285   : > { %v3082_v8 = vmul.f32 %v2203_v5, %v534_v30  ;;  %v1993_v30 = vmul.f32 %v4353_v4, %v355_v54  ;;  %v359_v5 = vld [vmem:[%s4844_s9 + $0x70] sm:$0xff] }
 0x286   : > { %v3275_v2 = vadd.f32 %v3093_v46, %v2001_v31  ;;  %v3265_v47 = vadd.f32 %v3083_v6, %v1991_v57  ;;  %v948_v31 = vld [vmem:[%s4737_s6 + $0x1c8] sm:$0xff]  ;;  %v947_v46 = vld [vmem:[%s4737_s6 + $0x1c0] sm:$0xff]  ;;  %v541_v4 = vld [vmem:[%s4853_s13 + $0x70] sm:$0xff] }
 0x287   : > { %v3264_v14 = vadd.f32 %v3082_v8, %v1990_v56  ;;  %v551_v56 = vld [vmem:[%s4853_s13 + $0xc0] sm:$0xff]  ;;  %v358_v8 = vld [vmem:[%s4844_s9 + $0x68] sm:$0xff] }
 0x288   : > { %3458 = vst.msk [vmem:[%s4866_s15 + $0x90] sm:$0xff] %vm3439_vm0, %v3275_v2  ;;  %v540_v2 = vld [vmem:[%s4853_s13 + $0x68] sm:$0xff] }
 0x289   : > { %3448 = vst.msk [vmem:[%s4866_s15 + $0x40] sm:$0xff] %vm3439_vm0, %v3265_v47  ;;  %2437 = vperm.xlu2 %4116, %v945_v59   ;;  %2432 = vperm.xlu1 %4115, %v944_v36   ;;  %v1997_v36 = vmul.f32 %v4333_v55, %v359_v5  ;;  %v949_v55 = vld [vmem:[%s4737_s6 + $0x1d0] sm:$0xff] }
 0x28a   : > { %3447 = vst.msk [vmem:[%s4866_s15 + $0x38] sm:$0xff] %vm3439_vm0, %v3264_v14  ;;  %2427 = vperm.xlu0 %4114, %v943_v45   ;;  %v2007_v14 = vmul.f32 %v4400_v35, %v369_v29  ;;  %v372_v35 = vld [vmem:[%s4844_s9 + $0xd8] sm:$0xff] }
 0x28b   : > { %v2273_v51 = vpop.permute.xlu2 %2272  ;;  %v2223_v41 = vpop.permute.xlu1 %2222 }
 0x28c   : > { %v3096_v19 = vmul.f32 %v2273_v51, %v548_v20  ;;  %v3086_v37 = vmul.f32 %v2223_v41, %v538_v62  ;;  %v2218_v50 = vpop.permute.xlu0 %2217  ;;  %v1996_v20 = vmul.f32 %v4362_v10, %v358_v8  ;;  %v951_v51 = vld [vmem:[%s4737_s6 + $0x1e0] sm:$0xff]  ;;  %v950_v41 = vld [vmem:[%s4737_s6 + $0x1d8] sm:$0xff]  ;;  %v544_v10 = vld [vmem:[%s4853_s13 + $0x88] sm:$0xff] }
 0x28d   : > { %v3085_v11 = vmul.f32 %v2218_v50, %v537_v7  ;;  %v543_v50 = vld [vmem:[%s4853_s13 + $0x80] sm:$0xff]  ;;  %v953_v8 = vld [vmem:[%s4737_s6 + $0x1f0] sm:$0xff] }
 0x28e   : > { %v3278_v32 = vadd.f32 %v3096_v19, %v2004_v17  ;;  %v3268_v57 = vadd.f32 %v3086_v37, %v1994_v39  ;;  %v362_v17 = vld [vmem:[%s4844_s9 + $0x88] sm:$0xff]  ;;  %v554_v19 = vld [vmem:[%s4853_s13 + $0xd8] sm:$0xff]  ;;  %v361_v37 = vld [vmem:[%s4844_s9 + $0x80] sm:$0xff] }
 0x28f   : > { %v3267_v6 = vadd.f32 %v3085_v11, %v1993_v30 }
 0x290   : > { %3461 = vst.msk [vmem:[%s4866_s15 + $0xa8] sm:$0xff] %vm3439_vm0, %v3278_v32  ;;  %v2000_v32 = vmul.f32 %v4342_v61, %v362_v17  ;;  %v952_v61 = vld [vmem:[%s4737_s6 + $0x1e8] sm:$0xff]  ;;  %v957_v17 = vld [vmem:[%s4737_s6 + $0x210] sm:$0xff] }
 0x291   : > { %3451 = vst.msk [vmem:[%s4866_s15 + $0x58] sm:$0xff] %vm3439_vm0, %v3268_v57  ;;  %2452 = vperm.xlu2 %4116, %v948_v31   ;;  %2447 = vperm.xlu1 %4115, %v947_v46   ;;  %v2010_v57 = vmul.f32 %v4409_v43, %v372_v35  ;;  %v375_v43 = vld [vmem:[%s4844_s9 + $0xf0] sm:$0xff]  ;;  %v956_v35 = vld [vmem:[%s4737_s6 + $0x208] sm:$0xff] }
 0x292   : > { %3450 = vst.msk [vmem:[%s4866_s15 + $0x50] sm:$0xff] %vm3439_vm0, %v3267_v6  ;;  %2442 = vperm.xlu0 %4114, %v946_v49   ;;  %v1999_v49 = vmul.f32 %v4371_v16, %v361_v37  ;;  %v547_v16 = vld [vmem:[%s4853_s13 + $0xa0] sm:$0xff]  ;;  %v560_v37 = vld [vmem:[%s4853_s13 + $0x108] sm:$0xff] }
 0x293   : > { %v2288_v47 = vpop.permute.xlu2 %2287  ;;  %v2238_v59 = vpop.permute.xlu1 %2237 }
 0x294   : > { %v3099_v45 = vmul.f32 %v2288_v47, %v551_v56  ;;  %v3089_v63 = vmul.f32 %v2238_v59, %v541_v4  ;;  %v2233_v23 = vpop.permute.xlu0 %2232  ;;  %v954_v4 = vld [vmem:[%s4737_s6 + $0x1f8] sm:$0xff]  ;;  %v365_v47 = vld [vmem:[%s4844_s9 + $0xa0] sm:$0xff]  ;;  %v557_v59 = vld [vmem:[%s4853_s13 + $0xf0] sm:$0xff] }
 0x295   : > { %v3088_v62 = vmul.f32 %v2233_v23, %v540_v2  ;;  %v2003_v23 = vmul.f32 %v4351_v3, %v365_v47  ;;  %v955_v3 = vld [vmem:[%s4737_s6 + $0x200] sm:$0xff]  ;;  %v371_v47 = vld [vmem:[%s4844_s9 + $0xd0] sm:$0xff] }
 0x296   : > { %v3281_v54 = vadd.f32 %v3099_v45, %v2007_v14  ;;  %v3271_v7 = vadd.f32 %v3089_v63, %v1997_v36  ;;  %v364_v36 = vld [vmem:[%s4844_s9 + $0x98] sm:$0xff] }
 0x297   : > { %v3270_v39 = vadd.f32 %v3088_v62, %v1996_v20  ;;  %v546_v14 = vld [vmem:[%s4853_s13 + $0x98] sm:$0xff]  ;;  %v2013_v20 = vmul.f32 %v4418_v53, %v375_v43  ;;  %v378_v53 = vld [vmem:[%s4844_s9 + $0x108] sm:$0xff]  ;;  %v563_v43 = vld [vmem:[%s4853_s13 + $0x120] sm:$0xff] }
 0x298   : > { %3464 = vst.msk [vmem:[%s4866_s15 + $0xc0] sm:$0xff] %vm3439_vm0, %v3281_v54 }
 0x299   : > { %3454 = vst.msk [vmem:[%s4866_s15 + $0x70] sm:$0xff] %vm3439_vm0, %v3271_v7  ;;  %2467 = vperm.xlu2 %4116, %v951_v51   ;;  %2462 = vperm.xlu1 %4115, %v950_v41   ;;  %v2002_v51 = vmul.f32 %v4380_v22, %v364_v36  ;;  %v550_v22 = vld [vmem:[%s4853_s13 + $0xb8] sm:$0xff] }
 0x29a   : > { %3453 = vst.msk [vmem:[%s4866_s15 + $0x68] sm:$0xff] %vm3439_vm0, %v3270_v39  ;;  %2457 = vperm.xlu0 %4114, %v949_v55  }
 0x29b   : > { %v2303_v30 = vpop.permute.xlu2 %2302  ;;  %v2253_v11 = vpop.permute.xlu1 %2252 }
 0x29c   : > { %v3102_v31 = vmul.f32 %v2303_v30, %v554_v19  ;;  %v3092_v46 = vmul.f32 %v2253_v11, %v544_v10  ;;  %v2248_v6 = vpop.permute.xlu0 %2247  ;;  %v368_v10 = vld [vmem:[%s4844_s9 + $0xb8] sm:$0xff]  ;;  %v549_v30 = vld [vmem:[%s4853_s13 + $0xb0] sm:$0xff] }
 0x29d   : > { %v3091_v5 = vmul.f32 %v2248_v6, %v543_v50  ;;  %v367_v50 = vld [vmem:[%s4844_s9 + $0xb0] sm:$0xff] }
 0x29e   : > { %v3284_v29 = vadd.f32 %v3102_v31, %v2010_v57  ;;  %v3274_v56 = vadd.f32 %v3092_v46, %v2000_v32  ;;  %v2006_v57 = vmul.f32 %v4360_v9, %v368_v10  ;;  %v2016_v31 = vmul.f32 %v4427_v1, %v378_v53  ;;  %v958_v9 = vld [vmem:[%s4737_s6 + $0x218] sm:$0xff]  ;;  %v381_v1 = vld [vmem:[%s4844_s9 + $0x120] sm:$0xff] }
 0x29f   : > { %v3273_v2 = vadd.f32 %v3091_v5, %v1999_v49  ;;  %v2005_v5 = vmul.f32 %v4389_v28, %v367_v50  ;;  %v553_v28 = vld [vmem:[%s4853_s13 + $0xd0] sm:$0xff]  ;;  %v555_v10 = vld [vmem:[%s4853_s13 + $0xe0] sm:$0xff] }
 0x2a0   : > { %3467 = vst.msk [vmem:[%s4866_s15 + $0xd8] sm:$0xff] %vm3439_vm0, %v3284_v29 }
 0x2a1   : > { %3457 = vst.msk [vmem:[%s4866_s15 + $0x88] sm:$0xff] %vm3439_vm0, %v3274_v56  ;;  %2482 = vperm.xlu2 %4116, %v954_v4   ;;  %2477 = vperm.xlu1 %4115, %v953_v8   ;;  %v960_v8 = vld [vmem:[%s4737_s6 + $0x228] sm:$0xff] }
 0x2a2   : > { %3456 = vst.msk [vmem:[%s4866_s15 + $0x80] sm:$0xff] %vm3439_vm0, %v3273_v2  ;;  %2472 = vperm.xlu0 %4114, %v952_v61   ;;  %v959_v2 = vld [vmem:[%s4737_s6 + $0x220] sm:$0xff] }
 0x2a3   : > { %v2318_v45 = vpop.permute.xlu2 %2317  ;;  %v2268_v63 = vpop.permute.xlu1 %2267 }
 0x2a4   : > { %v3105_v62 = vmul.f32 %v2318_v45, %v557_v59  ;;  %v3095_v54 = vmul.f32 %v2268_v63, %v547_v16  ;;  %v2263_v7 = vpop.permute.xlu0 %2262  ;;  %v370_v59 = vld [vmem:[%s4844_s9 + $0xc8] sm:$0xff]  ;;  %v2009_v45 = vmul.f32 %v4369_v15, %v371_v47  ;;  %v2019_v63 = vmul.f32 %v4436_v13, %v381_v1  ;;  %v961_v15 = vld [vmem:[%s4737_s6 + $0x230] sm:$0xff]  ;;  %v384_v13 = vld [vmem:[%s4844_s9 + $0x138] sm:$0xff] }
 0x2a5   : > { %v3094_v41 = vmul.f32 %v2263_v7, %v546_v14  ;;  %v552_v16 = vld [vmem:[%s4853_s13 + $0xc8] sm:$0xff]  ;;  %v2022_v50 = vmul.f32 %v4445_v25, %v384_v13  ;;  %v387_v25 = vld [vmem:[%s4844_s9 + $0x150] sm:$0xff] }
 0x2a6   : > { %v3287_v39 = vadd.f32 %v3105_v62, %v2013_v20  ;;  %v3277_v55 = vadd.f32 %v3095_v54, %v2003_v23  ;;  %v2008_v54 = vmul.f32 %v4398_v34, %v370_v59  ;;  %v556_v34 = vld [vmem:[%s4853_s13 + $0xe8] sm:$0xff]  ;;  %v2025_v1 = vmul.f32 %v4454_v38, %v387_v25 }
 0x2a7   : > { %v3276_v19 = vadd.f32 %v3094_v41, %v2002_v51  ;;  %v390_v38 = vld [vmem:[%s4844_s9 + $0x168] sm:$0xff] }
 0x2a8   : > { %3470 = vst.msk [vmem:[%s4866_s15 + $0xf0] sm:$0xff] %vm3439_vm0, %v3287_v39  ;;  %v963_v39 = vld [vmem:[%s4737_s6 + $0x240] sm:$0xff] }
 0x2a9   : > { %3460 = vst.msk [vmem:[%s4866_s15 + $0xa0] sm:$0xff] %vm3439_vm0, %v3277_v55  ;;  %2497 = vperm.xlu2 %4116, %v957_v17   ;;  %2492 = vperm.xlu1 %4115, %v956_v35   ;;  %v962_v55 = vld [vmem:[%s4737_s6 + $0x238] sm:$0xff]  ;;  %v374_v35 = vld [vmem:[%s4844_s9 + $0xe8] sm:$0xff] }
 0x2aa   : > { %3459 = vst.msk [vmem:[%s4866_s15 + $0x98] sm:$0xff] %vm3439_vm0, %v3276_v19  ;;  %2487 = vperm.xlu0 %4114, %v955_v3   ;;  %v566_v19 = vld [vmem:[%s4853_s13 + $0x138] sm:$0xff]  ;;  %v373_v3 = vld [vmem:[%s4844_s9 + $0xe0] sm:$0xff] }
 0x2ab   : > { %v2333_v11 = vpop.permute.xlu2 %2332  ;;  %v2283_v32 = vpop.permute.xlu1 %2282 }
 0x2ac   : > { %v3108_v46 = vmul.f32 %v2333_v11, %v560_v37  ;;  %v3098_v6 = vmul.f32 %v2283_v32, %v550_v22  ;;  %v2278_v49 = vpop.permute.xlu0 %2277  ;;  %v2012_v22 = vmul.f32 %v4378_v21, %v374_v35  ;;  %v964_v21 = vld [vmem:[%s4737_s6 + $0x248] sm:$0xff] }
 0x2ad   : > { %v3097_v29 = vmul.f32 %v2278_v49, %v549_v30  ;;  %v966_v49 = vld [vmem:[%s4737_s6 + $0x258] sm:$0xff] }
 0x2ae   : > { %v3290_v56 = vadd.f32 %v3108_v46, %v2016_v31  ;;  %v3280_v4 = vadd.f32 %v3098_v6, %v2006_v57  ;;  %v2011_v57 = vmul.f32 %v4407_v42, %v373_v3  ;;  %v559_v42 = vld [vmem:[%s4853_s13 + $0x100] sm:$0xff] }
 0x2af   : > { %v3279_v61 = vadd.f32 %v3097_v29, %v2005_v5  ;;  %v965_v5 = vld [vmem:[%s4737_s6 + $0x250] sm:$0xff] }
 0x2b0   : > { %3473 = vst.msk [vmem:[%s4866_s15 + $0x108] sm:$0xff] %vm3439_vm0, %v3290_v56  ;;  %v377_v56 = vld [vmem:[%s4844_s9 + $0x100] sm:$0xff] }
 0x2b1   : > { %3463 = vst.msk [vmem:[%s4866_s15 + $0xb8] sm:$0xff] %vm3439_vm0, %v3280_v4  ;;  %2512 = vperm.xlu2 %4116, %v960_v8   ;;  %2507 = vperm.xlu1 %4115, %v959_v2   ;;  %v569_v4 = vld [vmem:[%s4853_s13 + $0x150] sm:$0xff]  ;;  %v376_v8 = vld [vmem:[%s4844_s9 + $0xf8] sm:$0xff]  ;;  %v2015_v47 = vmul.f32 %v4387_v27, %v377_v56  ;;  %v967_v27 = vld [vmem:[%s4737_s6 + $0x260] sm:$0xff] }
 0x2b2   : > { %3462 = vst.msk [vmem:[%s4866_s15 + $0xb0] sm:$0xff] %vm3439_vm0, %v3279_v61  ;;  %2502 = vperm.xlu0 %4114, %v958_v9   ;;  %v558_v2 = vld [vmem:[%s4853_s13 + $0xf8] sm:$0xff] }
 0x2b3   : > { %v2348_v36 = vpop.permute.xlu2 %2347  ;;  %v2298_v14 = vpop.permute.xlu1 %2297 }
 0x2b4   : > { %v3111_v23 = vmul.f32 %v2348_v36, %v563_v43  ;;  %v3101_v20 = vmul.f32 %v2298_v14, %v553_v28  ;;  %v2293_v62 = vpop.permute.xlu0 %2292 }
 0x2b5   : > { %v3100_v7 = vmul.f32 %v2293_v62, %v552_v16  ;;  %v2014_v16 = vmul.f32 %v4416_v52, %v376_v8  ;;  %v380_v62 = vld [vmem:[%s4844_s9 + $0x118] sm:$0xff] }
 0x2b6   : > { %v3293_v51 = vadd.f32 %v3111_v23, %v2019_v63  ;;  %v3283_v41 = vadd.f32 %v3101_v20, %v2009_v45  ;;  %v969_v63 = vld [vmem:[%s4737_s6 + $0x270] sm:$0xff]  ;;  %v968_v23 = vld [vmem:[%s4737_s6 + $0x268] sm:$0xff]  ;;  %v562_v52 = vld [vmem:[%s4853_s13 + $0x118] sm:$0xff] }
 0x2b7   : > { %v3282_v17 = vadd.f32 %v3100_v7, %v2008_v54  ;;  %v572_v54 = vld [vmem:[%s4853_s13 + $0x168] sm:$0xff]  ;;  %v379_v7 = vld [vmem:[%s4844_s9 + $0x110] sm:$0xff]  ;;  %v974_v8 = vld [vmem:[%s4737_s6 + $0x298] sm:$0xff] }
 0x2b8   : > { %3476 = vst.msk [vmem:[%s4866_s15 + $0x120] sm:$0xff] %vm3439_vm0, %v3293_v51  ;;  %v561_v51 = vld [vmem:[%s4853_s13 + $0x110] sm:$0xff] }
 0x2b9   : > { %3466 = vst.msk [vmem:[%s4866_s15 + $0xd0] sm:$0xff] %vm3439_vm0, %v3283_v41  ;;  %2527 = vperm.xlu2 %4116, %v963_v39   ;;  %2522 = vperm.xlu1 %4115, %v962_v55   ;;  %v2018_v55 = vmul.f32 %v4396_v33, %v380_v62  ;;  %v970_v33 = vld [vmem:[%s4737_s6 + $0x278] sm:$0xff] }
 0x2ba   : > { %3465 = vst.msk [vmem:[%s4866_s15 + $0xc8] sm:$0xff] %vm3439_vm0, %v3282_v17  ;;  %2517 = vperm.xlu0 %4114, %v961_v15   ;;  %v2028_v17 = vmul.f32 %v4463_v58, %v390_v38  ;;  %v393_v58 = vld [vmem:[%s4844_s9 + $0x180] sm:$0xff]  ;;  %v978_v62 = vld [vmem:[%s4737_s6 + $0x2b8] sm:$0xff]  ;;  %v977_v38 = vld [vmem:[%s4737_s6 + $0x2b0] sm:$0xff] }
 0x2bb   : > { %v2363_v53 = vpop.permute.xlu2 %2362  ;;  %v2313_v37 = vpop.permute.xlu1 %2312 }
 0x2bc   : > { %v3114_v30 = vmul.f32 %v2363_v53, %v566_v19  ;;  %v3104_v11 = vmul.f32 %v2313_v37, %v556_v34  ;;  %v2308_v32 = vpop.permute.xlu0 %2307  ;;  %v2017_v19 = vmul.f32 %v4425_v0, %v379_v7  ;;  %v972_v53 = vld [vmem:[%s4737_s6 + $0x288] sm:$0xff]  ;;  %v971_v37 = vld [vmem:[%s4737_s6 + $0x280] sm:$0xff]  ;;  %v565_v0 = vld [vmem:[%s4853_s13 + $0x130] sm:$0xff] }
 0x2bd   : > { %v3103_v31 = vmul.f32 %v2308_v32, %v555_v10  ;;  %v564_v32 = vld [vmem:[%s4853_s13 + $0x128] sm:$0xff]  ;;  %v581_v7 = vld [vmem:[%s4853_s13 + $0x1b0] sm:$0xff] }
 0x2be   : > { %v3296_v46 = vadd.f32 %v3114_v30, %v2022_v50  ;;  %v3286_v6 = vadd.f32 %v3104_v11, %v2012_v22  ;;  %v383_v50 = vld [vmem:[%s4844_s9 + $0x130] sm:$0xff]  ;;  %v575_v30 = vld [vmem:[%s4853_s13 + $0x180] sm:$0xff]  ;;  %v382_v11 = vld [vmem:[%s4844_s9 + $0x128] sm:$0xff] }
 0x2bf   : > { %v3285_v29 = vadd.f32 %v3103_v31, %v2011_v57 }
 0x2c0   : > { %3479 = vst.msk [vmem:[%s4866_s15 + $0x138] sm:$0xff] %vm3439_vm0, %v3296_v46  ;;  %v2021_v46 = vmul.f32 %v4405_v40, %v383_v50  ;;  %v973_v40 = vld [vmem:[%s4737_s6 + $0x290] sm:$0xff] }
 0x2c1   : > { %3469 = vst.msk [vmem:[%s4866_s15 + $0xe8] sm:$0xff] %vm3439_vm0, %v3286_v6  ;;  %2542 = vperm.xlu2 %4116, %v966_v49   ;;  %2537 = vperm.xlu1 %4115, %v965_v5   ;;  %v2031_v6 = vmul.f32 %v4472_v18, %v393_v58  ;;  %v396_v18 = vld [vmem:[%s4844_s9 + $0x198] sm:$0xff] }
 0x2c2   : > { %3468 = vst.msk [vmem:[%s4866_s15 + $0xe0] sm:$0xff] %vm3439_vm0, %v3285_v29  ;;  %2532 = vperm.xlu0 %4114, %v964_v21   ;;  %v2020_v21 = vmul.f32 %v4434_v12, %v382_v11  ;;  %v568_v12 = vld [vmem:[%s4853_s13 + $0x148] sm:$0xff]  ;;  %v392_v58 = vld [vmem:[%s4844_s9 + $0x178] sm:$0xff]  ;;  %v391_v11 = vld [vmem:[%s4844_s9 + $0x170] sm:$0xff] }
 0x2c3   : > { %v2378_v61 = vpop.permute.xlu2 %2377  ;;  %v2328_v9 = vpop.permute.xlu1 %2327 }
 0x2c4   : > { %v3117_v43 = vmul.f32 %v2378_v61, %v569_v4  ;;  %v3107_v28 = vmul.f32 %v2328_v9, %v559_v42  ;;  %v2323_v59 = vpop.permute.xlu0 %2322  ;;  %v975_v42 = vld [vmem:[%s4737_s6 + $0x2a0] sm:$0xff]  ;;  %v386_v61 = vld [vmem:[%s4844_s9 + $0x148] sm:$0xff]  ;;  %v578_v9 = vld [vmem:[%s4853_s13 + $0x198] sm:$0xff] }
 0x2c5   : > { %v3106_v36 = vmul.f32 %v2323_v59, %v558_v2  ;;  %v2024_v59 = vmul.f32 %v4414_v48, %v386_v61  ;;  %v976_v48 = vld [vmem:[%s4737_s6 + $0x2a8] sm:$0xff]  ;;  %v983_v61 = vld [vmem:[%s4737_s6 + $0x2e0] sm:$0xff] }
 0x2c6   : > { %v3299_v14 = vadd.f32 %v3117_v43, %v2025_v1  ;;  %v3289_v45 = vadd.f32 %v3107_v28, %v2015_v47  ;;  %v385_v47 = vld [vmem:[%s4844_s9 + $0x140] sm:$0xff] }
 0x2c7   : > { %v3288_v20 = vadd.f32 %v3106_v36, %v2014_v16  ;;  %v567_v1 = vld [vmem:[%s4853_s13 + $0x140] sm:$0xff]  ;;  %v2034_v16 = vmul.f32 %v4481_v44, %v396_v18  ;;  %v399_v44 = vld [vmem:[%s4844_s9 + $0x1b0] sm:$0xff] }
 0x2c8   : > { %3482 = vst.msk [vmem:[%s4866_s15 + $0x150] sm:$0xff] %vm3439_vm0, %v3299_v14 }
 0x2c9   : > { %3472 = vst.msk [vmem:[%s4866_s15 + $0x100] sm:$0xff] %vm3439_vm0, %v3289_v45  ;;  %2557 = vperm.xlu2 %4116, %v969_v63   ;;  %2552 = vperm.xlu1 %4115, %v968_v23   ;;  %v2023_v63 = vmul.f32 %v4443_v24, %v385_v47  ;;  %v571_v24 = vld [vmem:[%s4853_s13 + $0x160] sm:$0xff] }
 0x2ca   : > { %3471 = vst.msk [vmem:[%s4866_s15 + $0xf8] sm:$0xff] %vm3439_vm0, %v3288_v20  ;;  %2547 = vperm.xlu0 %4114, %v967_v27   ;;  %v405_v47 = vld [vmem:[%s4844_s9 + $0x1e0] sm:$0xff] }
 0x2cb   : > { %v2393_v41 = vpop.permute.xlu2 %2392  ;;  %v2343_v39 = vpop.permute.xlu1 %2342 }
 0x2cc   : > { %v3120_v15 = vmul.f32 %v2393_v41, %v572_v54  ;;  %v3110_v35 = vmul.f32 %v2343_v39, %v562_v52  ;;  %v2338_v13 = vpop.permute.xlu0 %2337  ;;  %v389_v52 = vld [vmem:[%s4844_s9 + $0x160] sm:$0xff]  ;;  %v570_v41 = vld [vmem:[%s4853_s13 + $0x158] sm:$0xff] }
 0x2cd   : > { %v3109_v34 = vmul.f32 %v2338_v13, %v561_v51  ;;  %v388_v51 = vld [vmem:[%s4844_s9 + $0x158] sm:$0xff] }
 0x2ce   : > { %v3302_v3 = vadd.f32 %v3120_v15, %v2028_v17  ;;  %v3292_v10 = vadd.f32 %v3110_v35, %v2018_v55  ;;  %v2027_v17 = vmul.f32 %v4423_v60, %v389_v52  ;;  %v2037_v15 = vmul.f32 %v4490_v26, %v399_v44  ;;  %v979_v60 = vld [vmem:[%s4737_s6 + $0x2c0] sm:$0xff]  ;;  %v402_v26 = vld [vmem:[%s4844_s9 + $0x1c8] sm:$0xff] }
 0x2cf   : > { %v3291_v22 = vadd.f32 %v3109_v34, %v2017_v19  ;;  %v6214_v34 = vld [vmem:[#allocation6_spill] sm:$0xff] }
 0x2d0   : > { %3485 = vst.msk [vmem:[%s4866_s15 + $0x168] sm:$0xff] %vm3439_vm0, %v3302_v3  ;;  %v2026_v3 = vmul.f32 %v6214_v34, %v388_v51 }
 0x2d1   : > { %3475 = vst.msk [vmem:[%s4866_s15 + $0x118] sm:$0xff] %vm3439_vm0, %v3292_v10  ;;  %2572 = vperm.xlu2 %4116, %v972_v53   ;;  %2567 = vperm.xlu1 %4115, %v971_v37  }
 0x2d2   : > { %3474 = vst.msk [vmem:[%s4866_s15 + $0x110] sm:$0xff] %vm3439_vm0, %v3291_v22  ;;  %2562 = vperm.xlu0 %4114, %v970_v33   ;;  %v981_v22 = vld [vmem:[%s4737_s6 + $0x2d0] sm:$0xff]  ;;  %v980_v33 = vld [vmem:[%s4737_s6 + $0x2c8] sm:$0xff] }
 0x2d3   : > { %v2408_v57 = vpop.permute.xlu2 %2407  ;;  %v2358_v31 = vpop.permute.xlu1 %2357 }
 0x2d4   : > { %v3123_v49 = vmul.f32 %v2408_v57, %v575_v30  ;;  %v3113_v5 = vmul.f32 %v2358_v31, %v565_v0  ;;  %v2353_v29 = vpop.permute.xlu0 %2352  ;;  %v584_v30 = vld [vmem:[%s4853_s13 + $0x1c8] sm:$0xff]  ;;  %v574_v0 = vld [vmem:[%s4853_s13 + $0x178] sm:$0xff] }
 0x2d5   : > { %v3112_v56 = vmul.f32 %v2353_v29, %v564_v32  ;;  %v573_v32 = vld [vmem:[%s4853_s13 + $0x170] sm:$0xff] }
 0x2d6   : > { %v3305_v25 = vadd.f32 %v3123_v49, %v2031_v6  ;;  %v3295_v4 = vadd.f32 %v3113_v5, %v2021_v46  ;;  %v6215_v46 = vld [vmem:[#allocation3_spill] sm:$0xff]  ;;  %v6216_v49 = vld [vmem:[#allocation17_spill] sm:$0xff] }
 0x2d7   : > { %v3294_v2 = vadd.f32 %v3112_v56, %v2020_v21  ;;  %v2030_v6 = vmul.f32 %v6215_v46, %v392_v58  ;;  %v2040_v5 = vmul.f32 %v6216_v49, %v402_v26  ;;  %v401_v46 = vld [vmem:[%s4844_s9 + $0x1c0] sm:$0xff]  ;;  %v593_v49 = vld [vmem:[%s4853_s13 + $0x210] sm:$0xff] }
 0x2d8   : > { %3488 = vst.msk [vmem:[%s4866_s15 + $0x180] sm:$0xff] %vm3439_vm0, %v3305_v25  ;;  %v6217_v25 = vld [vmem:[#allocation8_spill] sm:$0xff] }
 0x2d9   : > { %3478 = vst.msk [vmem:[%s4866_s15 + $0x130] sm:$0xff] %vm3439_vm0, %v3295_v4  ;;  %2587 = vperm.xlu2 %4116, %v975_v42   ;;  %2582 = vperm.xlu1 %4115, %v974_v8   ;;  %v2029_v4 = vmul.f32 %v6217_v25, %v391_v11  ;;  %v990_v11 = vld [vmem:[%s4737_s6 + $0x318] sm:$0xff] }
 0x2da   : > { %3477 = vst.msk [vmem:[%s4866_s15 + $0x128] sm:$0xff] %vm3439_vm0, %v3294_v2  ;;  %2577 = vperm.xlu0 %4114, %v973_v40   ;;  %v984_v40 = vld [vmem:[%s4737_s6 + $0x2e8] sm:$0xff] }
 0x2db   : > { %v2423_v43 = vpop.permute.xlu2 %2422  ;;  %v2373_v28 = vpop.permute.xlu1 %2372 }
 0x2dc   : > { %v3126_v36 = vmul.f32 %v2423_v43, %v578_v9  ;;  %v3116_v14 = vmul.f32 %v2373_v28, %v568_v12  ;;  %v2368_v45 = vpop.permute.xlu0 %2367  ;;  %v982_v9 = vld [vmem:[%s4737_s6 + $0x2d8] sm:$0xff]  ;;  %v395_v12 = vld [vmem:[%s4844_s9 + $0x190] sm:$0xff]  ;;  %v394_v28 = vld [vmem:[%s4844_s9 + $0x188] sm:$0xff] }
 0x2dd   : > { %v3115_v23 = vmul.f32 %v2368_v45, %v567_v1  ;;  %v587_v1 = vld [vmem:[%s4853_s13 + $0x1e0] sm:$0xff]  ;;  %v577_v43 = vld [vmem:[%s4853_s13 + $0x190] sm:$0xff] }
 0x2de   : > { %v3308_v20 = vadd.f32 %v3126_v36, %v2034_v16  ;;  %v3298_v27 = vadd.f32 %v3116_v14, %v2024_v59  ;;  %v576_v59 = vld [vmem:[%s4853_s13 + $0x188] sm:$0xff] }
 0x2df   : > { %v3297_v54 = vadd.f32 %v3115_v23, %v2023_v63  ;;  %v6218_v14 = vld [vmem:[#allocation4_spill] sm:$0xff] }
 0x2e0   : > { %3491 = vst.msk [vmem:[%s4866_s15 + $0x198] sm:$0xff] %vm3439_vm0, %v3308_v20  ;;  %v2033_v45 = vmul.f32 %v6218_v14, %v395_v12  ;;  %v6219_v63 = vld [vmem:[#allocation20_spill] sm:$0xff]  ;;  %v404_v14 = vld [vmem:[%s4844_s9 + $0x1d8] sm:$0xff] }
 0x2e1   : > { %3481 = vst.msk [vmem:[%s4866_s15 + $0x148] sm:$0xff] %vm3439_vm0, %v3298_v27  ;;  %2602 = vperm.xlu2 %4116, %v978_v62   ;;  %2597 = vperm.xlu1 %4115, %v977_v38   ;;  %v2043_v23 = vmul.f32 %v6219_v63, %v405_v47  ;;  %v6220_v38 = vld [vmem:[#allocation10_spill] sm:$0xff]  ;;  %v596_v63 = vld [vmem:[%s4853_s13 + $0x228] sm:$0xff] }
 0x2e2   : > { %3480 = vst.msk [vmem:[%s4866_s15 + $0x140] sm:$0xff] %vm3439_vm0, %v3297_v54  ;;  %2592 = vperm.xlu0 %4114, %v976_v48   ;;  %v2032_v54 = vmul.f32 %v6220_v38, %v394_v28  ;;  %v993_v28 = vld [vmem:[%s4737_s6 + $0x330] sm:$0xff] }
 0x2e3   : > { %v2438_v39 = vpop.permute.xlu2 %2437  ;;  %v2388_v55 = vpop.permute.xlu1 %2387 }
 0x2e4   : > { %v3129_v35 = vmul.f32 %v2438_v39, %v581_v7  ;;  %v3119_v13 = vmul.f32 %v2388_v55, %v571_v24  ;;  %v2383_v19 = vpop.permute.xlu0 %2382  ;;  %v987_v7 = vld [vmem:[%s4737_s6 + $0x300] sm:$0xff]  ;;  %v986_v24 = vld [vmem:[%s4737_s6 + $0x2f8] sm:$0xff]  ;;  %v398_v39 = vld [vmem:[%s4844_s9 + $0x1a8] sm:$0xff] }
 0x2e5   : > { %v3118_v10 = vmul.f32 %v2383_v19, %v570_v41  ;;  %v985_v41 = vld [vmem:[%s4737_s6 + $0x2f0] sm:$0xff]  ;;  %v408_v55 = vld [vmem:[%s4844_s9 + $0x1f8] sm:$0xff] }
 0x2e6   : > { %v3311_v53 = vadd.f32 %v3129_v35, %v2037_v15  ;;  %v3301_v37 = vadd.f32 %v3119_v13, %v2027_v17  ;;  %v590_v17 = vld [vmem:[%s4853_s13 + $0x1f8] sm:$0xff]  ;;  %v580_v15 = vld [vmem:[%s4853_s13 + $0x1a8] sm:$0xff]  ;;  %v397_v35 = vld [vmem:[%s4844_s9 + $0x1a0] sm:$0xff] }
 0x2e7   : > { %v3300_v50 = vadd.f32 %v3118_v10, %v2026_v3  ;;  %v579_v13 = vld [vmem:[%s4853_s13 + $0x1a0] sm:$0xff]  ;;  %v6221_v3 = vld [vmem:[#allocation5_spill] sm:$0xff] }
 0x2e8   : > { %3494 = vst.msk [vmem:[%s4866_s15 + $0x1b0] sm:$0xff] %vm3439_vm0, %v3311_v53  ;;  %v2036_v10 = vmul.f32 %v6221_v3, %v398_v39  ;;  %v6222_v53 = vld [vmem:[#allocation23_spill] sm:$0xff]  ;;  %v407_v3 = vld [vmem:[%s4844_s9 + $0x1f0] sm:$0xff] }
 0x2e9   : > { %3484 = vst.msk [vmem:[%s4866_s15 + $0x160] sm:$0xff] %vm3439_vm0, %v3301_v37  ;;  %2617 = vperm.xlu2 %4116, %v981_v22   ;;  %2612 = vperm.xlu1 %4115, %v980_v33   ;;  %v2046_v37 = vmul.f32 %v6222_v53, %v408_v55  ;;  %v599_v53 = vld [vmem:[%s4853_s13 + $0x240] sm:$0xff] }
 0x2ea   : > { %3483 = vst.msk [vmem:[%s4866_s15 + $0x158] sm:$0xff] %vm3439_vm0, %v3300_v50  ;;  %2607 = vperm.xlu0 %4114, %v979_v60   ;;  %v6223_v60 = vld [vmem:[#allocation12_spill] sm:$0xff] }
 0x2eb   : > { %v2453_v57 = vpop.permute.xlu2 %2452  ;;  %v2403_v31 = vpop.permute.xlu1 %2402  ;;  %v2035_v58 = vmul.f32 %v6223_v60, %v397_v35  ;;  %v996_v35 = vld [vmem:[%s4737_s6 + $0x348] sm:$0xff] }
 0x2ec   : > { %v3132_v29 = vmul.f32 %v2453_v57, %v584_v30  ;;  %v3122_v21 = vmul.f32 %v2403_v31, %v574_v0  ;;  %v2398_v56 = vpop.permute.xlu0 %2397  ;;  %v988_v31 = vld [vmem:[%s4737_s6 + $0x308] sm:$0xff] }
 0x2ed   : > { %v3121_v42 = vmul.f32 %v2398_v56, %v573_v32  ;;  %v989_v32 = vld [vmem:[%s4737_s6 + $0x310] sm:$0xff] }
 0x2ee   : > { %v3314_v8 = vadd.f32 %v3132_v29, %v2040_v5  ;;  %v3304_v2 = vadd.f32 %v3122_v21, %v2030_v6  ;;  %v411_v6 = vld [vmem:[%s4844_s9 + $0x210] sm:$0xff]  ;;  %v583_v5 = vld [vmem:[%s4853_s13 + $0x1c0] sm:$0xff]  ;;  %v400_v29 = vld [vmem:[%s4844_s9 + $0x1b8] sm:$0xff] }
 0x2ef   : > { %v3303_v18 = vadd.f32 %v3121_v42, %v2029_v4  ;;  %v582_v21 = vld [vmem:[%s4853_s13 + $0x1b8] sm:$0xff]  ;;  %v6224_v4 = vld [vmem:[#allocation7_spill] sm:$0xff] }
 0x2f0   : > { %3497 = vst.msk [vmem:[%s4866_s15 + $0x1c8] sm:$0xff] %vm3439_vm0, %v3314_v8  ;;  %v2039_v42 = vmul.f32 %v6224_v4, %v401_v46  ;;  %v6225_v8 = vld [vmem:[#allocation26_spill] sm:$0xff]  ;;  %v410_v4 = vld [vmem:[%s4844_s9 + $0x208] sm:$0xff] }
 0x2f1   : > { %3487 = vst.msk [vmem:[%s4866_s15 + $0x178] sm:$0xff] %vm3439_vm0, %v3304_v2  ;;  %2632 = vperm.xlu2 %4116, %v984_v40   ;;  %2627 = vperm.xlu1 %4115, %v983_v61   ;;  %v2049_v2 = vmul.f32 %v6225_v8, %v411_v6  ;;  %v602_v8 = vld [vmem:[%s4853_s13 + $0x258] sm:$0xff] }
 0x2f2   : > { %3486 = vst.msk [vmem:[%s4866_s15 + $0x170] sm:$0xff] %vm3439_vm0, %v3303_v18  ;;  %2622 = vperm.xlu0 %4114, %v982_v9   ;;  %v6226_v9 = vld [vmem:[#allocation14_spill] sm:$0xff] }
 0x2f3   : > { %v2468_v16 = vpop.permute.xlu2 %2467  ;;  %v2418_v36 = vpop.permute.xlu1 %2417  ;;  %v2038_v12 = vmul.f32 %v6226_v9, %v400_v29  ;;  %v999_v29 = vld [vmem:[%s4737_s6 + $0x360] sm:$0xff] }
 0x2f4   : > { %v3135_v20 = vmul.f32 %v2468_v16, %v587_v1  ;;  %v3125_v27 = vmul.f32 %v2418_v36, %v577_v43  ;;  %v2413_v62 = vpop.permute.xlu0 %2412  ;;  %v991_v36 = vld [vmem:[%s4737_s6 + $0x320] sm:$0xff] }
 0x2f5   : > { %v3124_v48 = vmul.f32 %v2413_v62, %v576_v59  ;;  %v992_v59 = vld [vmem:[%s4737_s6 + $0x328] sm:$0xff] }
 0x2f6   : > { %v3317_v52 = vadd.f32 %v3135_v20, %v2043_v23  ;;  %v3307_v44 = vadd.f32 %v3125_v27, %v2033_v45  ;;  %v414_v45 = vld [vmem:[%s4844_s9 + $0x228] sm:$0xff]  ;;  %v586_v23 = vld [vmem:[%s4853_s13 + $0x1d8] sm:$0xff]  ;;  %v403_v20 = vld [vmem:[%s4844_s9 + $0x1d0] sm:$0xff] }
 0x2f7   : > { %v3306_v51 = vadd.f32 %v3124_v48, %v2032_v54  ;;  %v585_v27 = vld [vmem:[%s4853_s13 + $0x1d0] sm:$0xff] }
 0x2f8   : > { %3500 = vst.msk [vmem:[%s4866_s15 + $0x1e0] sm:$0xff] %vm3439_vm0, %v3317_v52  ;;  %v6227_v54 = vld [vmem:[#allocation9_spill] sm:$0xff] }
 0x2f9   : > { %3490 = vst.msk [vmem:[%s4866_s15 + $0x190] sm:$0xff] %vm3439_vm0, %v3307_v44  ;;  %2647 = vperm.xlu2 %4116, %v987_v7   ;;  %2642 = vperm.xlu1 %4115, %v986_v24   ;;  %v2042_v48 = vmul.f32 %v6227_v54, %v404_v14  ;;  %v6228_v52 = vld [vmem:[#allocation29_spill] sm:$0xff]  ;;  %v413_v54 = vld [vmem:[%s4844_s9 + $0x220] sm:$0xff] }
 0x2fa   : > { %3489 = vst.msk [vmem:[%s4866_s15 + $0x188] sm:$0xff] %vm3439_vm0, %v3306_v51  ;;  %2637 = vperm.xlu0 %4114, %v985_v41   ;;  %v2052_v44 = vmul.f32 %v6228_v52, %v414_v45  ;;  %v6229_v41 = vld [vmem:[#allocation16_spill] sm:$0xff]  ;;  %v605_v52 = vld [vmem:[%s4853_s13 + $0x270] sm:$0xff] }
 0x2fb   : > { %v2483_v19 = vpop.permute.xlu2 %2482  ;;  %v2433_v34 = vpop.permute.xlu1 %2432  ;;  %v2041_v39 = vmul.f32 %v6229_v41, %v403_v20  ;;  %v1002_v20 = vld [vmem:[%s4737_s6 + $0x378] sm:$0xff] }
 0x2fc   : > { %v3138_v22 = vmul.f32 %v2483_v19, %v590_v17  ;;  %v3128_v33 = vmul.f32 %v2433_v34, %v580_v15  ;;  %v2428_v50 = vpop.permute.xlu0 %2427  ;;  %v994_v34 = vld [vmem:[%s4737_s6 + $0x338] sm:$0xff] }
 0x2fd   : > { %v3127_v26 = vmul.f32 %v2428_v50, %v579_v13  ;;  %v995_v13 = vld [vmem:[%s4737_s6 + $0x340] sm:$0xff] }
 0x2fe   : > { %v3320_v30 = vadd.f32 %v3138_v22, %v2046_v37  ;;  %v3310_v0 = vadd.f32 %v3128_v33, %v2036_v10  ;;  %v417_v10 = vld [vmem:[%s4844_s9 + $0x240] sm:$0xff]  ;;  %v589_v37 = vld [vmem:[%s4853_s13 + $0x1f0] sm:$0xff]  ;;  %v406_v22 = vld [vmem:[%s4844_s9 + $0x1e8] sm:$0xff] }
 0x2ff   : > { %v3309_v57 = vadd.f32 %v3127_v26, %v2035_v58  ;;  %v588_v33 = vld [vmem:[%s4853_s13 + $0x1e8] sm:$0xff]  ;;  %v6230_v58 = vld [vmem:[#allocation11_spill] sm:$0xff] }
 0x300   : > { %3503 = vst.msk [vmem:[%s4866_s15 + $0x1f8] sm:$0xff] %vm3439_vm0, %v3320_v30  ;;  %v2045_v26 = vmul.f32 %v6230_v58, %v407_v3  ;;  %v6231_v30 = vld [vmem:[#allocation32_spill] sm:$0xff]  ;;  %v416_v58 = vld [vmem:[%s4844_s9 + $0x238] sm:$0xff] }
 0x301   : > { %3493 = vst.msk [vmem:[%s4866_s15 + $0x1a8] sm:$0xff] %vm3439_vm0, %v3310_v0  ;;  %2662 = vperm.xlu2 %4116, %v990_v11   ;;  %2657 = vperm.xlu1 %4115, %v989_v32   ;;  %v2055_v0 = vmul.f32 %v6231_v30, %v417_v10  ;;  %v608_v30 = vld [vmem:[%s4853_s13 + $0x288] sm:$0xff] }
 0x302   : > { %3492 = vst.msk [vmem:[%s4866_s15 + $0x1a0] sm:$0xff] %vm3439_vm0, %v3309_v57  ;;  %2652 = vperm.xlu0 %4114, %v988_v31   ;;  %v6232_v31 = vld [vmem:[#allocation19_spill] sm:$0xff] }
 0x303   : > { %v2498_v56 = vpop.permute.xlu2 %2497  ;;  %v2448_v25 = vpop.permute.xlu1 %2447  ;;  %v2044_v46 = vmul.f32 %v6232_v31, %v406_v22  ;;  %v1005_v22 = vld [vmem:[%s4737_s6 + $0x390] sm:$0xff] }
 0x304   : > { %v3141_v40 = vmul.f32 %v2498_v56, %v593_v49  ;;  %v3131_v61 = vmul.f32 %v2448_v25, %v583_v5  ;;  %v2443_v18 = vpop.permute.xlu0 %2442  ;;  %v997_v25 = vld [vmem:[%s4737_s6 + $0x350] sm:$0xff] }
 0x305   : > { %v3130_v47 = vmul.f32 %v2443_v18, %v582_v21  ;;  %v998_v21 = vld [vmem:[%s4737_s6 + $0x358] sm:$0xff] }
 0x306   : > { %v3323_v1 = vadd.f32 %v3141_v40, %v2049_v2  ;;  %v3313_v43 = vadd.f32 %v3131_v61, %v2039_v42  ;;  %v420_v42 = vld [vmem:[%s4844_s9 + $0x258] sm:$0xff]  ;;  %v592_v2 = vld [vmem:[%s4853_s13 + $0x208] sm:$0xff]  ;;  %v409_v40 = vld [vmem:[%s4844_s9 + $0x200] sm:$0xff] }
 0x307   : > { %v3312_v16 = vadd.f32 %v3130_v47, %v2038_v12  ;;  %v591_v61 = vld [vmem:[%s4853_s13 + $0x200] sm:$0xff]  ;;  %v6233_v12 = vld [vmem:[#allocation13_spill] sm:$0xff] }
 0x308   : > { %3506 = vst.msk [vmem:[%s4866_s15 + $0x210] sm:$0xff] %vm3439_vm0, %v3323_v1  ;;  %v2048_v47 = vmul.f32 %v6233_v12, %v410_v4  ;;  %v6234_v1 = vld [vmem:[#allocation35_spill] sm:$0xff]  ;;  %v419_v12 = vld [vmem:[%s4844_s9 + $0x250] sm:$0xff] }
 0x309   : > { %3496 = vst.msk [vmem:[%s4866_s15 + $0x1c0] sm:$0xff] %vm3439_vm0, %v3313_v43  ;;  %2677 = vperm.xlu2 %4116, %v993_v28   ;;  %2672 = vperm.xlu1 %4115, %v992_v59   ;;  %v2058_v43 = vmul.f32 %v6234_v1, %v420_v42  ;;  %v611_v1 = vld [vmem:[%s4853_s13 + $0x2a0] sm:$0xff] }
 0x30a   : > { %3495 = vst.msk [vmem:[%s4866_s15 + $0x1b8] sm:$0xff] %vm3439_vm0, %v3312_v16  ;;  %2667 = vperm.xlu0 %4114, %v991_v36   ;;  %v6235_v36 = vld [vmem:[#allocation22_spill] sm:$0xff] }
 0x30b   : > { %v2513_v62 = vpop.permute.xlu2 %2512  ;;  %v2463_v38 = vpop.permute.xlu1 %2462  ;;  %v2047_v14 = vmul.f32 %v6235_v36, %v409_v40  ;;  %v1008_v40 = vld [vmem:[%s4737_s6 + $0x3a8] sm:$0xff] }
 0x30c   : > { %v3144_v7 = vmul.f32 %v2513_v62, %v596_v63  ;;  %v3134_v24 = vmul.f32 %v2463_v38, %v586_v23  ;;  %v2458_v51 = vpop.permute.xlu0 %2457  ;;  %v1000_v38 = vld [vmem:[%s4737_s6 + $0x368] sm:$0xff] }
 0x30d   : > { %v3133_v55 = vmul.f32 %v2458_v51, %v585_v27  ;;  %v1001_v27 = vld [vmem:[%s4737_s6 + $0x370] sm:$0xff] }
 0x30e   : > { %v3326_v17 = vadd.f32 %v3144_v7, %v2052_v44  ;;  %v3316_v15 = vadd.f32 %v3134_v24, %v2042_v48  ;;  %v423_v48 = vld [vmem:[%s4844_s9 + $0x270] sm:$0xff]  ;;  %v595_v44 = vld [vmem:[%s4853_s13 + $0x220] sm:$0xff]  ;;  %v412_v7 = vld [vmem:[%s4844_s9 + $0x218] sm:$0xff] }
 0x30f   : > { %v3315_v19 = vadd.f32 %v3133_v55, %v2041_v39  ;;  %v594_v24 = vld [vmem:[%s4853_s13 + $0x218] sm:$0xff]  ;;  %v6236_v39 = vld [vmem:[#allocation15_spill] sm:$0xff] }
 0x310   : > { %3509 = vst.msk [vmem:[%s4866_s15 + $0x228] sm:$0xff] %vm3439_vm0, %v3326_v17  ;;  %v2051_v55 = vmul.f32 %v6236_v39, %v413_v54  ;;  %v6237_v17 = vld [vmem:[#allocation38_spill] sm:$0xff]  ;;  %v422_v39 = vld [vmem:[%s4844_s9 + $0x268] sm:$0xff] }
 0x311   : > { %3499 = vst.msk [vmem:[%s4866_s15 + $0x1d8] sm:$0xff] %vm3439_vm0, %v3316_v15  ;;  %2692 = vperm.xlu2 %4116, %v996_v35   ;;  %2687 = vperm.xlu1 %4115, %v995_v13   ;;  %v2061_v15 = vmul.f32 %v6237_v17, %v423_v48  ;;  %v614_v17 = vld [vmem:[%s4853_s13 + $0x2b8] sm:$0xff] }
 0x312   : > { %3498 = vst.msk [vmem:[%s4866_s15 + $0x1d0] sm:$0xff] %vm3439_vm0, %v3315_v19  ;;  %2682 = vperm.xlu0 %4114, %v994_v34   ;;  %v6238_v34 = vld [vmem:[#allocation25_spill] sm:$0xff] }
 0x313   : > { %v2528_v50 = vpop.permute.xlu2 %2527  ;;  %v2478_v60 = vpop.permute.xlu1 %2477  ;;  %v2050_v3 = vmul.f32 %v6238_v34, %v412_v7  ;;  %v1011_v7 = vld [vmem:[%s4737_s6 + $0x3c0] sm:$0xff] }
 0x314   : > { %v3147_v11 = vmul.f32 %v2528_v50, %v599_v53  ;;  %v3137_v32 = vmul.f32 %v2478_v60, %v589_v37  ;;  %v2473_v57 = vpop.permute.xlu0 %2472  ;;  %v1003_v60 = vld [vmem:[%s4737_s6 + $0x380] sm:$0xff] }
 0x315   : > { %v3136_v6 = vmul.f32 %v2473_v57, %v588_v33  ;;  %v1004_v33 = vld [vmem:[%s4737_s6 + $0x388] sm:$0xff] }
 0x316   : > { %v3329_v49 = vadd.f32 %v3147_v11, %v2055_v0  ;;  %v3319_v5 = vadd.f32 %v3137_v32, %v2045_v26  ;;  %v426_v26 = vld [vmem:[%s4844_s9 + $0x288] sm:$0xff]  ;;  %v598_v0 = vld [vmem:[%s4853_s13 + $0x238] sm:$0xff]  ;;  %v415_v11 = vld [vmem:[%s4844_s9 + $0x230] sm:$0xff] }
 0x317   : > { %v3318_v56 = vadd.f32 %v3136_v6, %v2044_v46  ;;  %v597_v32 = vld [vmem:[%s4853_s13 + $0x230] sm:$0xff]  ;;  %v6239_v46 = vld [vmem:[#allocation18_spill] sm:$0xff] }
 0x318   : > { %3512 = vst.msk [vmem:[%s4866_s15 + $0x240] sm:$0xff] %vm3439_vm0, %v3329_v49  ;;  %v2054_v6 = vmul.f32 %v6239_v46, %v416_v58  ;;  %v6240_v49 = vld [vmem:[#allocation41_spill] sm:$0xff]  ;;  %v425_v46 = vld [vmem:[%s4844_s9 + $0x280] sm:$0xff] }
 0x319   : > { %3502 = vst.msk [vmem:[%s4866_s15 + $0x1f0] sm:$0xff] %vm3439_vm0, %v3319_v5  ;;  %2707 = vperm.xlu2 %4116, %v999_v29   ;;  %2702 = vperm.xlu1 %4115, %v998_v21   ;;  %v2064_v5 = vmul.f32 %v6240_v49, %v426_v26  ;;  %v617_v49 = vld [vmem:[%s4853_s13 + $0x2d0] sm:$0xff] }
 0x31a   : > { %3501 = vst.msk [vmem:[%s4866_s15 + $0x1e8] sm:$0xff] %vm3439_vm0, %v3318_v56  ;;  %2697 = vperm.xlu0 %4114, %v997_v25   ;;  %v6241_v25 = vld [vmem:[#allocation28_spill] sm:$0xff] }
 0x31b   : > { %v2543_v18 = vpop.permute.xlu2 %2542  ;;  %v2493_v9 = vpop.permute.xlu1 %2492  ;;  %v2053_v4 = vmul.f32 %v6241_v25, %v415_v11  ;;  %v1014_v11 = vld [vmem:[%s4737_s6 + $0x3d8] sm:$0xff] }
 0x31c   : > { %v3150_v28 = vmul.f32 %v2543_v18, %v602_v8  ;;  %v3140_v59 = vmul.f32 %v2493_v9, %v592_v2  ;;  %v2488_v16 = vpop.permute.xlu0 %2487  ;;  %v1006_v9 = vld [vmem:[%s4737_s6 + $0x398] sm:$0xff] }
 0x31d   : > { %v3139_v45 = vmul.f32 %v2488_v16, %v591_v61  ;;  %v1007_v61 = vld [vmem:[%s4737_s6 + $0x3a0] sm:$0xff] }
 0x31e   : > { %v3332_v63 = vadd.f32 %v3150_v28, %v2058_v43  ;;  %v3322_v23 = vadd.f32 %v3140_v59, %v2048_v47  ;;  %v429_v47 = vld [vmem:[%s4844_s9 + $0x2a0] sm:$0xff]  ;;  %v601_v43 = vld [vmem:[%s4853_s13 + $0x250] sm:$0xff]  ;;  %v418_v28 = vld [vmem:[%s4844_s9 + $0x248] sm:$0xff] }
 0x31f   : > { %v3321_v62 = vadd.f32 %v3139_v45, %v2047_v14  ;;  %v600_v59 = vld [vmem:[%s4853_s13 + $0x248] sm:$0xff]  ;;  %v6242_v14 = vld [vmem:[#allocation21_spill] sm:$0xff] }
 0x320   : > { %3515 = vst.msk [vmem:[%s4866_s15 + $0x258] sm:$0xff] %vm3439_vm0, %v3332_v63  ;;  %v2057_v45 = vmul.f32 %v6242_v14, %v419_v12  ;;  %v6243_v63 = vld [vmem:[#allocation44_spill] sm:$0xff]  ;;  %v428_v14 = vld [vmem:[%s4844_s9 + $0x298] sm:$0xff] }
 0x321   : > { %3505 = vst.msk [vmem:[%s4866_s15 + $0x208] sm:$0xff] %vm3439_vm0, %v3322_v23  ;;  %2722 = vperm.xlu2 %4116, %v1002_v20   ;;  %2717 = vperm.xlu1 %4115, %v1001_v27   ;;  %v2067_v23 = vmul.f32 %v6243_v63, %v429_v47  ;;  %v620_v63 = vld [vmem:[%s4853_s13 + $0x2e8] sm:$0xff] }
 0x322   : > { %3504 = vst.msk [vmem:[%s4866_s15 + $0x200] sm:$0xff] %vm3439_vm0, %v3321_v62  ;;  %2712 = vperm.xlu0 %4114, %v1000_v38   ;;  %v6244_v38 = vld [vmem:[#allocation31_spill] sm:$0xff] }
 0x323   : > { %v2558_v51 = vpop.permute.xlu2 %2557  ;;  %v2508_v41 = vpop.permute.xlu1 %2507  ;;  %v2056_v54 = vmul.f32 %v6244_v38, %v418_v28  ;;  %v1017_v28 = vld [vmem:[%s4737_s6 + $0x3f0] sm:$0xff] }
 0x324   : > { %v3153_v35 = vmul.f32 %v2558_v51, %v605_v52  ;;  %v3143_v13 = vmul.f32 %v2508_v41, %v595_v44  ;;  %v2503_v19 = vpop.permute.xlu0 %2502  ;;  %v1009_v41 = vld [vmem:[%s4737_s6 + $0x3b0] sm:$0xff] }
 0x325   : > { %v3142_v10 = vmul.f32 %v2503_v19, %v594_v24  ;;  %v1010_v24 = vld [vmem:[%s4737_s6 + $0x3b8] sm:$0xff] }
 0x326   : > { %v3335_v53 = vadd.f32 %v3153_v35, %v2061_v15  ;;  %v3325_v37 = vadd.f32 %v3143_v13, %v2051_v55  ;;  %v432_v55 = vld [vmem:[%s4844_s9 + $0x2b8] sm:$0xff]  ;;  %v604_v15 = vld [vmem:[%s4853_s13 + $0x268] sm:$0xff]  ;;  %v421_v35 = vld [vmem:[%s4844_s9 + $0x260] sm:$0xff] }
 0x327   : > { %v3324_v50 = vadd.f32 %v3142_v10, %v2050_v3  ;;  %v603_v13 = vld [vmem:[%s4853_s13 + $0x260] sm:$0xff]  ;;  %v6245_v3 = vld [vmem:[#allocation24_spill] sm:$0xff] }
 0x328   : > { %3518 = vst.msk [vmem:[%s4866_s15 + $0x270] sm:$0xff] %vm3439_vm0, %v3335_v53  ;;  %v2060_v10 = vmul.f32 %v6245_v3, %v422_v39  ;;  %v6246_v53 = vld [vmem:[#allocation47_spill] sm:$0xff]  ;;  %v431_v3 = vld [vmem:[%s4844_s9 + $0x2b0] sm:$0xff] }
 0x329   : > { %3508 = vst.msk [vmem:[%s4866_s15 + $0x220] sm:$0xff] %vm3439_vm0, %v3325_v37  ;;  %2737 = vperm.xlu2 %4116, %v1005_v22   ;;  %2732 = vperm.xlu1 %4115, %v1004_v33   ;;  %v2070_v37 = vmul.f32 %v6246_v53, %v432_v55  ;;  %v623_v53 = vld [vmem:[%s4853_s13 + $0x300] sm:$0xff] }
 0x32a   : > { %3507 = vst.msk [vmem:[%s4866_s15 + $0x218] sm:$0xff] %vm3439_vm0, %v3324_v50  ;;  %2727 = vperm.xlu0 %4114, %v1003_v60   ;;  %v6247_v60 = vld [vmem:[#allocation34_spill] sm:$0xff] }
 0x32b   : > { %v2573_v57 = vpop.permute.xlu2 %2572  ;;  %v2523_v31 = vpop.permute.xlu1 %2522  ;;  %v2059_v58 = vmul.f32 %v6247_v60, %v421_v35  ;;  %v1020_v35 = vld [vmem:[%s4737_s6 + $0x408] sm:$0xff] }
 0x32c   : > { %v3156_v29 = vmul.f32 %v2573_v57, %v608_v30  ;;  %v3146_v21 = vmul.f32 %v2523_v31, %v598_v0  ;;  %v2518_v56 = vpop.permute.xlu0 %2517  ;;  %v1012_v31 = vld [vmem:[%s4737_s6 + $0x3c8] sm:$0xff] }
 0x32d   : > { %v3145_v42 = vmul.f32 %v2518_v56, %v597_v32  ;;  %v1013_v32 = vld [vmem:[%s4737_s6 + $0x3d0] sm:$0xff] }
 0x32e   : > { %v3338_v8 = vadd.f32 %v3156_v29, %v2064_v5  ;;  %v3328_v2 = vadd.f32 %v3146_v21, %v2054_v6  ;;  %v435_v6 = vld [vmem:[%s4844_s9 + $0x2d0] sm:$0xff]  ;;  %v607_v5 = vld [vmem:[%s4853_s13 + $0x280] sm:$0xff]  ;;  %v424_v29 = vld [vmem:[%s4844_s9 + $0x278] sm:$0xff] }
 0x32f   : > { %v3327_v18 = vadd.f32 %v3145_v42, %v2053_v4  ;;  %v606_v21 = vld [vmem:[%s4853_s13 + $0x278] sm:$0xff]  ;;  %v6248_v4 = vld [vmem:[#allocation27_spill] sm:$0xff] }
 0x330   : > { %3521 = vst.msk [vmem:[%s4866_s15 + $0x288] sm:$0xff] %vm3439_vm0, %v3338_v8  ;;  %v2063_v42 = vmul.f32 %v6248_v4, %v425_v46  ;;  %v6249_v8 = vld [vmem:[#allocation50_spill] sm:$0xff]  ;;  %v434_v4 = vld [vmem:[%s4844_s9 + $0x2c8] sm:$0xff] }
 0x331   : > { %3511 = vst.msk [vmem:[%s4866_s15 + $0x238] sm:$0xff] %vm3439_vm0, %v3328_v2  ;;  %2752 = vperm.xlu2 %4116, %v1008_v40   ;;  %2747 = vperm.xlu1 %4115, %v1007_v61   ;;  %v2073_v2 = vmul.f32 %v6249_v8, %v435_v6  ;;  %v626_v8 = vld [vmem:[%s4853_s13 + $0x318] sm:$0xff] }
 0x332   : > { %3510 = vst.msk [vmem:[%s4866_s15 + $0x230] sm:$0xff] %vm3439_vm0, %v3327_v18  ;;  %2742 = vperm.xlu0 %4114, %v1006_v9   ;;  %v6250_v9 = vld [vmem:[#allocation37_spill] sm:$0xff] }
 0x333   : > { %v2588_v16 = vpop.permute.xlu2 %2587  ;;  %v2538_v36 = vpop.permute.xlu1 %2537  ;;  %v2062_v12 = vmul.f32 %v6250_v9, %v424_v29  ;;  %v1023_v29 = vld [vmem:[%s4737_s6 + $0x420] sm:$0xff] }
 0x334   : > { %v3159_v20 = vmul.f32 %v2588_v16, %v611_v1  ;;  %v3149_v27 = vmul.f32 %v2538_v36, %v601_v43  ;;  %v2533_v62 = vpop.permute.xlu0 %2532  ;;  %v1015_v36 = vld [vmem:[%s4737_s6 + $0x3e0] sm:$0xff] }
 0x335   : > { %v3148_v48 = vmul.f32 %v2533_v62, %v600_v59  ;;  %v1016_v59 = vld [vmem:[%s4737_s6 + $0x3e8] sm:$0xff] }
 0x336   : > { %v3341_v52 = vadd.f32 %v3159_v20, %v2067_v23  ;;  %v3331_v44 = vadd.f32 %v3149_v27, %v2057_v45  ;;  %v438_v45 = vld [vmem:[%s4844_s9 + $0x2e8] sm:$0xff]  ;;  %v610_v23 = vld [vmem:[%s4853_s13 + $0x298] sm:$0xff]  ;;  %v427_v20 = vld [vmem:[%s4844_s9 + $0x290] sm:$0xff] }
 0x337   : > { %v3330_v51 = vadd.f32 %v3148_v48, %v2056_v54  ;;  %v609_v27 = vld [vmem:[%s4853_s13 + $0x290] sm:$0xff]  ;;  %v6251_v54 = vld [vmem:[#allocation30_spill] sm:$0xff] }
 0x338   : > { %3524 = vst.msk [vmem:[%s4866_s15 + $0x2a0] sm:$0xff] %vm3439_vm0, %v3341_v52  ;;  %v2066_v48 = vmul.f32 %v6251_v54, %v428_v14  ;;  %v6252_v52 = vld [vmem:[#allocation53_spill] sm:$0xff]  ;;  %v437_v54 = vld [vmem:[%s4844_s9 + $0x2e0] sm:$0xff] }
 0x339   : > { %3514 = vst.msk [vmem:[%s4866_s15 + $0x250] sm:$0xff] %vm3439_vm0, %v3331_v44  ;;  %2767 = vperm.xlu2 %4116, %v1011_v7   ;;  %2762 = vperm.xlu1 %4115, %v1010_v24   ;;  %v2076_v44 = vmul.f32 %v6252_v52, %v438_v45  ;;  %v629_v52 = vld [vmem:[%s4853_s13 + $0x330] sm:$0xff] }
 0x33a   : > { %3513 = vst.msk [vmem:[%s4866_s15 + $0x248] sm:$0xff] %vm3439_vm0, %v3330_v51  ;;  %2757 = vperm.xlu0 %4114, %v1009_v41   ;;  %v6253_v41 = vld [vmem:[#allocation40_spill] sm:$0xff] }
 0x33b   : > { %v2603_v19 = vpop.permute.xlu2 %2602  ;;  %v2553_v34 = vpop.permute.xlu1 %2552  ;;  %v2065_v39 = vmul.f32 %v6253_v41, %v427_v20  ;;  %v1026_v20 = vld [vmem:[%s4737_s6 + $0x438] sm:$0xff] }
 0x33c   : > { %v3162_v22 = vmul.f32 %v2603_v19, %v614_v17  ;;  %v3152_v33 = vmul.f32 %v2553_v34, %v604_v15  ;;  %v2548_v50 = vpop.permute.xlu0 %2547  ;;  %v1018_v34 = vld [vmem:[%s4737_s6 + $0x3f8] sm:$0xff] }
 0x33d   : > { %v3151_v26 = vmul.f32 %v2548_v50, %v603_v13  ;;  %v1019_v13 = vld [vmem:[%s4737_s6 + $0x400] sm:$0xff] }
 0x33e   : > { %v3344_v30 = vadd.f32 %v3162_v22, %v2070_v37  ;;  %v3334_v0 = vadd.f32 %v3152_v33, %v2060_v10  ;;  %v441_v10 = vld [vmem:[%s4844_s9 + $0x300] sm:$0xff]  ;;  %v613_v37 = vld [vmem:[%s4853_s13 + $0x2b0] sm:$0xff]  ;;  %v430_v22 = vld [vmem:[%s4844_s9 + $0x2a8] sm:$0xff] }
 0x33f   : > { %v3333_v57 = vadd.f32 %v3151_v26, %v2059_v58  ;;  %v612_v33 = vld [vmem:[%s4853_s13 + $0x2a8] sm:$0xff]  ;;  %v6254_v58 = vld [vmem:[#allocation33_spill] sm:$0xff] }
 0x340   : > { %3527 = vst.msk [vmem:[%s4866_s15 + $0x2b8] sm:$0xff] %vm3439_vm0, %v3344_v30  ;;  %v2069_v26 = vmul.f32 %v6254_v58, %v431_v3  ;;  %v6255_v30 = vld [vmem:[#allocation56_spill] sm:$0xff]  ;;  %v440_v58 = vld [vmem:[%s4844_s9 + $0x2f8] sm:$0xff] }
 0x341   : > { %3517 = vst.msk [vmem:[%s4866_s15 + $0x268] sm:$0xff] %vm3439_vm0, %v3334_v0  ;;  %2782 = vperm.xlu2 %4116, %v1014_v11   ;;  %2777 = vperm.xlu1 %4115, %v1013_v32   ;;  %v2079_v0 = vmul.f32 %v6255_v30, %v441_v10  ;;  %v632_v30 = vld [vmem:[%s4853_s13 + $0x348] sm:$0xff] }
 0x342   : > { %3516 = vst.msk [vmem:[%s4866_s15 + $0x260] sm:$0xff] %vm3439_vm0, %v3333_v57  ;;  %2772 = vperm.xlu0 %4114, %v1012_v31   ;;  %v6256_v31 = vld [vmem:[#allocation43_spill] sm:$0xff] }
 0x343   : > { %v2618_v56 = vpop.permute.xlu2 %2617  ;;  %v2568_v25 = vpop.permute.xlu1 %2567  ;;  %v2068_v46 = vmul.f32 %v6256_v31, %v430_v22  ;;  %v1029_v22 = vld [vmem:[%s4737_s6 + $0x450] sm:$0xff] }
 0x344   : > { %v3165_v40 = vmul.f32 %v2618_v56, %v617_v49  ;;  %v3155_v61 = vmul.f32 %v2568_v25, %v607_v5  ;;  %v2563_v18 = vpop.permute.xlu0 %2562  ;;  %v1021_v25 = vld [vmem:[%s4737_s6 + $0x410] sm:$0xff] }
 0x345   : > { %v3154_v47 = vmul.f32 %v2563_v18, %v606_v21  ;;  %v1022_v21 = vld [vmem:[%s4737_s6 + $0x418] sm:$0xff] }
 0x346   : > { %v3347_v1 = vadd.f32 %v3165_v40, %v2073_v2  ;;  %v3337_v43 = vadd.f32 %v3155_v61, %v2063_v42  ;;  %v444_v42 = vld [vmem:[%s4844_s9 + $0x318] sm:$0xff]  ;;  %v616_v2 = vld [vmem:[%s4853_s13 + $0x2c8] sm:$0xff]  ;;  %v433_v40 = vld [vmem:[%s4844_s9 + $0x2c0] sm:$0xff] }
 0x347   : > { %v3336_v16 = vadd.f32 %v3154_v47, %v2062_v12  ;;  %v615_v61 = vld [vmem:[%s4853_s13 + $0x2c0] sm:$0xff]  ;;  %v6257_v12 = vld [vmem:[#allocation36_spill] sm:$0xff] }
 0x348   : > { %3530 = vst.msk [vmem:[%s4866_s15 + $0x2d0] sm:$0xff] %vm3439_vm0, %v3347_v1  ;;  %v2072_v47 = vmul.f32 %v6257_v12, %v434_v4  ;;  %v6258_v1 = vld [vmem:[#allocation59_spill] sm:$0xff]  ;;  %v443_v12 = vld [vmem:[%s4844_s9 + $0x310] sm:$0xff] }
 0x349   : > { %3520 = vst.msk [vmem:[%s4866_s15 + $0x280] sm:$0xff] %vm3439_vm0, %v3337_v43  ;;  %2797 = vperm.xlu2 %4116, %v1017_v28   ;;  %2792 = vperm.xlu1 %4115, %v1016_v59   ;;  %v2082_v43 = vmul.f32 %v6258_v1, %v444_v42  ;;  %v635_v1 = vld [vmem:[%s4853_s13 + $0x360] sm:$0xff] }
 0x34a   : > { %3519 = vst.msk [vmem:[%s4866_s15 + $0x278] sm:$0xff] %vm3439_vm0, %v3336_v16  ;;  %2787 = vperm.xlu0 %4114, %v1015_v36   ;;  %v6259_v36 = vld [vmem:[#allocation46_spill] sm:$0xff] }
 0x34b   : > { %v2633_v62 = vpop.permute.xlu2 %2632  ;;  %v2583_v38 = vpop.permute.xlu1 %2582  ;;  %v2071_v14 = vmul.f32 %v6259_v36, %v433_v40  ;;  %v1032_v40 = vld [vmem:[%s4737_s6 + $0x468] sm:$0xff] }
 0x34c   : > { %v3168_v7 = vmul.f32 %v2633_v62, %v620_v63  ;;  %v3158_v24 = vmul.f32 %v2583_v38, %v610_v23  ;;  %v2578_v51 = vpop.permute.xlu0 %2577  ;;  %v1024_v38 = vld [vmem:[%s4737_s6 + $0x428] sm:$0xff] }
 0x34d   : > { %v3157_v55 = vmul.f32 %v2578_v51, %v609_v27  ;;  %v1025_v27 = vld [vmem:[%s4737_s6 + $0x430] sm:$0xff] }
 0x34e   : > { %v3350_v17 = vadd.f32 %v3168_v7, %v2076_v44  ;;  %v3340_v15 = vadd.f32 %v3158_v24, %v2066_v48  ;;  %v447_v48 = vld [vmem:[%s4844_s9 + $0x330] sm:$0xff]  ;;  %v619_v44 = vld [vmem:[%s4853_s13 + $0x2e0] sm:$0xff]  ;;  %v436_v7 = vld [vmem:[%s4844_s9 + $0x2d8] sm:$0xff] }
 0x34f   : > { %v3339_v19 = vadd.f32 %v3157_v55, %v2065_v39  ;;  %v618_v24 = vld [vmem:[%s4853_s13 + $0x2d8] sm:$0xff]  ;;  %v6260_v39 = vld [vmem:[#allocation39_spill] sm:$0xff] }
 0x350   : > { %3533 = vst.msk [vmem:[%s4866_s15 + $0x2e8] sm:$0xff] %vm3439_vm0, %v3350_v17  ;;  %v2075_v55 = vmul.f32 %v6260_v39, %v437_v54  ;;  %v6261_v17 = vld [vmem:[#allocation62_spill] sm:$0xff]  ;;  %v446_v39 = vld [vmem:[%s4844_s9 + $0x328] sm:$0xff] }
 0x351   : > { %3523 = vst.msk [vmem:[%s4866_s15 + $0x298] sm:$0xff] %vm3439_vm0, %v3340_v15  ;;  %2812 = vperm.xlu2 %4116, %v1020_v35   ;;  %2807 = vperm.xlu1 %4115, %v1019_v13   ;;  %v2085_v15 = vmul.f32 %v6261_v17, %v447_v48  ;;  %v638_v17 = vld [vmem:[%s4853_s13 + $0x378] sm:$0xff] }
 0x352   : > { %3522 = vst.msk [vmem:[%s4866_s15 + $0x290] sm:$0xff] %vm3439_vm0, %v3339_v19  ;;  %2802 = vperm.xlu0 %4114, %v1018_v34   ;;  %v6262_v34 = vld [vmem:[#allocation49_spill] sm:$0xff] }
 0x353   : > { %v2648_v50 = vpop.permute.xlu2 %2647  ;;  %v2598_v60 = vpop.permute.xlu1 %2597  ;;  %v2074_v3 = vmul.f32 %v6262_v34, %v436_v7  ;;  %v1035_v7 = vld [vmem:[%s4737_s6 + $0x480] sm:$0xff] }
 0x354   : > { %v3171_v11 = vmul.f32 %v2648_v50, %v623_v53  ;;  %v3161_v32 = vmul.f32 %v2598_v60, %v613_v37  ;;  %v2593_v57 = vpop.permute.xlu0 %2592  ;;  %v1027_v60 = vld [vmem:[%s4737_s6 + $0x440] sm:$0xff] }
 0x355   : > { %v3160_v6 = vmul.f32 %v2593_v57, %v612_v33  ;;  %v1028_v33 = vld [vmem:[%s4737_s6 + $0x448] sm:$0xff] }
 0x356   : > { %v3353_v49 = vadd.f32 %v3171_v11, %v2079_v0  ;;  %v3343_v5 = vadd.f32 %v3161_v32, %v2069_v26  ;;  %v450_v26 = vld [vmem:[%s4844_s9 + $0x348] sm:$0xff]  ;;  %v622_v0 = vld [vmem:[%s4853_s13 + $0x2f8] sm:$0xff]  ;;  %v439_v11 = vld [vmem:[%s4844_s9 + $0x2f0] sm:$0xff] }
 0x357   : > { %v3342_v56 = vadd.f32 %v3160_v6, %v2068_v46  ;;  %v621_v32 = vld [vmem:[%s4853_s13 + $0x2f0] sm:$0xff]  ;;  %v6263_v46 = vld [vmem:[#allocation42_spill] sm:$0xff] }
 0x358   : > { %3536 = vst.msk [vmem:[%s4866_s15 + $0x300] sm:$0xff] %vm3439_vm0, %v3353_v49  ;;  %v2078_v6 = vmul.f32 %v6263_v46, %v440_v58  ;;  %v6264_v49 = vld [vmem:[#allocation65_spill] sm:$0xff]  ;;  %v449_v46 = vld [vmem:[%s4844_s9 + $0x340] sm:$0xff] }
 0x359   : > { %3526 = vst.msk [vmem:[%s4866_s15 + $0x2b0] sm:$0xff] %vm3439_vm0, %v3343_v5  ;;  %2827 = vperm.xlu2 %4116, %v1023_v29   ;;  %2822 = vperm.xlu1 %4115, %v1022_v21   ;;  %v2088_v5 = vmul.f32 %v6264_v49, %v450_v26  ;;  %v641_v49 = vld [vmem:[%s4853_s13 + $0x390] sm:$0xff] }
 0x35a   : > { %3525 = vst.msk [vmem:[%s4866_s15 + $0x2a8] sm:$0xff] %vm3439_vm0, %v3342_v56  ;;  %2817 = vperm.xlu0 %4114, %v1021_v25   ;;  %v6265_v25 = vld [vmem:[#allocation52_spill] sm:$0xff] }
 0x35b   : > { %v2663_v18 = vpop.permute.xlu2 %2662  ;;  %v2613_v9 = vpop.permute.xlu1 %2612  ;;  %v2077_v4 = vmul.f32 %v6265_v25, %v439_v11  ;;  %v1038_v11 = vld [vmem:[%s4737_s6 + $0x498] sm:$0xff] }
 0x35c   : > { %v3174_v28 = vmul.f32 %v2663_v18, %v626_v8  ;;  %v3164_v59 = vmul.f32 %v2613_v9, %v616_v2  ;;  %v2608_v16 = vpop.permute.xlu0 %2607  ;;  %v1030_v9 = vld [vmem:[%s4737_s6 + $0x458] sm:$0xff] }
 0x35d   : > { %v3163_v45 = vmul.f32 %v2608_v16, %v615_v61  ;;  %v1031_v61 = vld [vmem:[%s4737_s6 + $0x460] sm:$0xff] }
 0x35e   : > { %v3356_v63 = vadd.f32 %v3174_v28, %v2082_v43  ;;  %v3346_v23 = vadd.f32 %v3164_v59, %v2072_v47  ;;  %v453_v47 = vld [vmem:[%s4844_s9 + $0x360] sm:$0xff]  ;;  %v625_v43 = vld [vmem:[%s4853_s13 + $0x310] sm:$0xff]  ;;  %v442_v28 = vld [vmem:[%s4844_s9 + $0x308] sm:$0xff] }
 0x35f   : > { %v3345_v62 = vadd.f32 %v3163_v45, %v2071_v14  ;;  %v624_v59 = vld [vmem:[%s4853_s13 + $0x308] sm:$0xff]  ;;  %v6266_v14 = vld [vmem:[#allocation45_spill] sm:$0xff] }
 0x360   : > { %3539 = vst.msk [vmem:[%s4866_s15 + $0x318] sm:$0xff] %vm3439_vm0, %v3356_v63  ;;  %v2081_v45 = vmul.f32 %v6266_v14, %v443_v12  ;;  %v6267_v63 = vld [vmem:[#allocation68_spill] sm:$0xff]  ;;  %v452_v14 = vld [vmem:[%s4844_s9 + $0x358] sm:$0xff] }
 0x361   : > { %3529 = vst.msk [vmem:[%s4866_s15 + $0x2c8] sm:$0xff] %vm3439_vm0, %v3346_v23  ;;  %2842 = vperm.xlu2 %4116, %v1026_v20   ;;  %2837 = vperm.xlu1 %4115, %v1025_v27   ;;  %v2091_v23 = vmul.f32 %v6267_v63, %v453_v47  ;;  %v644_v63 = vld [vmem:[%s4853_s13 + $0x3a8] sm:$0xff] }
 0x362   : > { %3528 = vst.msk [vmem:[%s4866_s15 + $0x2c0] sm:$0xff] %vm3439_vm0, %v3345_v62  ;;  %2832 = vperm.xlu0 %4114, %v1024_v38   ;;  %v6268_v38 = vld [vmem:[#allocation55_spill] sm:$0xff] }
 0x363   : > { %v2678_v51 = vpop.permute.xlu2 %2677  ;;  %v2628_v41 = vpop.permute.xlu1 %2627  ;;  %v2080_v54 = vmul.f32 %v6268_v38, %v442_v28  ;;  %v1041_v28 = vld [vmem:[%s4737_s6 + $0x4b0] sm:$0xff] }
 0x364   : > { %v3177_v35 = vmul.f32 %v2678_v51, %v629_v52  ;;  %v3167_v13 = vmul.f32 %v2628_v41, %v619_v44  ;;  %v2623_v19 = vpop.permute.xlu0 %2622  ;;  %v1033_v41 = vld [vmem:[%s4737_s6 + $0x470] sm:$0xff] }
 0x365   : > { %v3166_v10 = vmul.f32 %v2623_v19, %v618_v24  ;;  %v1034_v24 = vld [vmem:[%s4737_s6 + $0x478] sm:$0xff] }
 0x366   : > { %v3359_v53 = vadd.f32 %v3177_v35, %v2085_v15  ;;  %v3349_v37 = vadd.f32 %v3167_v13, %v2075_v55  ;;  %v456_v55 = vld [vmem:[%s4844_s9 + $0x378] sm:$0xff]  ;;  %v628_v15 = vld [vmem:[%s4853_s13 + $0x328] sm:$0xff]  ;;  %v445_v35 = vld [vmem:[%s4844_s9 + $0x320] sm:$0xff] }
 0x367   : > { %v3348_v50 = vadd.f32 %v3166_v10, %v2074_v3  ;;  %v627_v13 = vld [vmem:[%s4853_s13 + $0x320] sm:$0xff]  ;;  %v6269_v3 = vld [vmem:[#allocation48_spill] sm:$0xff] }
 0x368   : > { %3542 = vst.msk [vmem:[%s4866_s15 + $0x330] sm:$0xff] %vm3439_vm0, %v3359_v53  ;;  %v2084_v10 = vmul.f32 %v6269_v3, %v446_v39  ;;  %v6270_v53 = vld [vmem:[#allocation71_spill] sm:$0xff]  ;;  %v455_v3 = vld [vmem:[%s4844_s9 + $0x370] sm:$0xff] }
 0x369   : > { %3532 = vst.msk [vmem:[%s4866_s15 + $0x2e0] sm:$0xff] %vm3439_vm0, %v3349_v37  ;;  %2857 = vperm.xlu2 %4116, %v1029_v22   ;;  %2852 = vperm.xlu1 %4115, %v1028_v33   ;;  %v2094_v37 = vmul.f32 %v6270_v53, %v456_v55  ;;  %v647_v53 = vld [vmem:[%s4853_s13 + $0x3c0] sm:$0xff] }
 0x36a   : > { %3531 = vst.msk [vmem:[%s4866_s15 + $0x2d8] sm:$0xff] %vm3439_vm0, %v3348_v50  ;;  %2847 = vperm.xlu0 %4114, %v1027_v60   ;;  %v6271_v60 = vld [vmem:[#allocation58_spill] sm:$0xff] }
 0x36b   : > { %v2693_v57 = vpop.permute.xlu2 %2692  ;;  %v2643_v31 = vpop.permute.xlu1 %2642  ;;  %v2083_v58 = vmul.f32 %v6271_v60, %v445_v35  ;;  %v1044_v35 = vld [vmem:[%s4737_s6 + $0x4c8] sm:$0xff] }
 0x36c   : > { %v3180_v29 = vmul.f32 %v2693_v57, %v632_v30  ;;  %v3170_v21 = vmul.f32 %v2643_v31, %v622_v0  ;;  %v2638_v56 = vpop.permute.xlu0 %2637  ;;  %v1036_v31 = vld [vmem:[%s4737_s6 + $0x488] sm:$0xff] }
 0x36d   : > { %v3169_v42 = vmul.f32 %v2638_v56, %v621_v32  ;;  %v1037_v32 = vld [vmem:[%s4737_s6 + $0x490] sm:$0xff] }
 0x36e   : > { %v3362_v8 = vadd.f32 %v3180_v29, %v2088_v5  ;;  %v3352_v2 = vadd.f32 %v3170_v21, %v2078_v6  ;;  %v459_v6 = vld [vmem:[%s4844_s9 + $0x390] sm:$0xff]  ;;  %v631_v5 = vld [vmem:[%s4853_s13 + $0x340] sm:$0xff]  ;;  %v448_v29 = vld [vmem:[%s4844_s9 + $0x338] sm:$0xff] }
 0x36f   : > { %v3351_v18 = vadd.f32 %v3169_v42, %v2077_v4  ;;  %v630_v21 = vld [vmem:[%s4853_s13 + $0x338] sm:$0xff]  ;;  %v6272_v4 = vld [vmem:[#allocation51_spill] sm:$0xff] }
 0x370   : > { %3545 = vst.msk [vmem:[%s4866_s15 + $0x348] sm:$0xff] %vm3439_vm0, %v3362_v8  ;;  %v2087_v42 = vmul.f32 %v6272_v4, %v449_v46  ;;  %v6273_v8 = vld [vmem:[#allocation74_spill] sm:$0xff]  ;;  %v458_v4 = vld [vmem:[%s4844_s9 + $0x388] sm:$0xff] }
 0x371   : > { %3535 = vst.msk [vmem:[%s4866_s15 + $0x2f8] sm:$0xff] %vm3439_vm0, %v3352_v2  ;;  %2872 = vperm.xlu2 %4116, %v1032_v40   ;;  %2867 = vperm.xlu1 %4115, %v1031_v61   ;;  %v2097_v2 = vmul.f32 %v6273_v8, %v459_v6  ;;  %v650_v8 = vld [vmem:[%s4853_s13 + $0x3d8] sm:$0xff] }
 0x372   : > { %3534 = vst.msk [vmem:[%s4866_s15 + $0x2f0] sm:$0xff] %vm3439_vm0, %v3351_v18  ;;  %2862 = vperm.xlu0 %4114, %v1030_v9   ;;  %v6274_v9 = vld [vmem:[#allocation61_spill] sm:$0xff] }
 0x373   : > { %v2708_v16 = vpop.permute.xlu2 %2707  ;;  %v2658_v36 = vpop.permute.xlu1 %2657  ;;  %v2086_v12 = vmul.f32 %v6274_v9, %v448_v29  ;;  %v1047_v29 = vld [vmem:[%s4737_s6 + $0x4e0] sm:$0xff] }
 0x374   : > { %v3183_v20 = vmul.f32 %v2708_v16, %v635_v1  ;;  %v3173_v27 = vmul.f32 %v2658_v36, %v625_v43  ;;  %v2653_v62 = vpop.permute.xlu0 %2652  ;;  %v1039_v36 = vld [vmem:[%s4737_s6 + $0x4a0] sm:$0xff] }
 0x375   : > { %v3172_v48 = vmul.f32 %v2653_v62, %v624_v59  ;;  %v1040_v59 = vld [vmem:[%s4737_s6 + $0x4a8] sm:$0xff] }
 0x376   : > { %v3365_v52 = vadd.f32 %v3183_v20, %v2091_v23  ;;  %v3355_v44 = vadd.f32 %v3173_v27, %v2081_v45  ;;  %v462_v45 = vld [vmem:[%s4844_s9 + $0x3a8] sm:$0xff]  ;;  %v634_v23 = vld [vmem:[%s4853_s13 + $0x358] sm:$0xff]  ;;  %v451_v20 = vld [vmem:[%s4844_s9 + $0x350] sm:$0xff] }
 0x377   : > { %v3354_v51 = vadd.f32 %v3172_v48, %v2080_v54  ;;  %v633_v27 = vld [vmem:[%s4853_s13 + $0x350] sm:$0xff]  ;;  %v6275_v54 = vld [vmem:[#allocation54_spill] sm:$0xff] }
 0x378   : > { %3548 = vst.msk [vmem:[%s4866_s15 + $0x360] sm:$0xff] %vm3439_vm0, %v3365_v52  ;;  %v2090_v48 = vmul.f32 %v6275_v54, %v452_v14  ;;  %v6276_v52 = vld [vmem:[#allocation77_spill] sm:$0xff]  ;;  %v461_v54 = vld [vmem:[%s4844_s9 + $0x3a0] sm:$0xff] }
 0x379   : > { %3538 = vst.msk [vmem:[%s4866_s15 + $0x310] sm:$0xff] %vm3439_vm0, %v3355_v44  ;;  %2887 = vperm.xlu2 %4116, %v1035_v7   ;;  %2882 = vperm.xlu1 %4115, %v1034_v24   ;;  %v2100_v44 = vmul.f32 %v6276_v52, %v462_v45  ;;  %v653_v52 = vld [vmem:[%s4853_s13 + $0x3f0] sm:$0xff] }
 0x37a   : > { %3537 = vst.msk [vmem:[%s4866_s15 + $0x308] sm:$0xff] %vm3439_vm0, %v3354_v51  ;;  %2877 = vperm.xlu0 %4114, %v1033_v41   ;;  %v6277_v41 = vld [vmem:[#allocation64_spill] sm:$0xff] }
 0x37b   : > { %v2723_v19 = vpop.permute.xlu2 %2722  ;;  %v2673_v34 = vpop.permute.xlu1 %2672  ;;  %v2089_v39 = vmul.f32 %v6277_v41, %v451_v20  ;;  %v1050_v20 = vld [vmem:[%s4737_s6 + $0x4f8] sm:$0xff] }
 0x37c   : > { %v3186_v22 = vmul.f32 %v2723_v19, %v638_v17  ;;  %v3176_v33 = vmul.f32 %v2673_v34, %v628_v15  ;;  %v2668_v50 = vpop.permute.xlu0 %2667  ;;  %v1042_v34 = vld [vmem:[%s4737_s6 + $0x4b8] sm:$0xff] }
 0x37d   : > { %v3175_v26 = vmul.f32 %v2668_v50, %v627_v13  ;;  %v1043_v13 = vld [vmem:[%s4737_s6 + $0x4c0] sm:$0xff] }
 0x37e   : > { %v3368_v30 = vadd.f32 %v3186_v22, %v2094_v37  ;;  %v3358_v0 = vadd.f32 %v3176_v33, %v2084_v10  ;;  %v465_v10 = vld [vmem:[%s4844_s9 + $0x3c0] sm:$0xff]  ;;  %v637_v37 = vld [vmem:[%s4853_s13 + $0x370] sm:$0xff]  ;;  %v454_v22 = vld [vmem:[%s4844_s9 + $0x368] sm:$0xff] }
 0x37f   : > { %v3357_v57 = vadd.f32 %v3175_v26, %v2083_v58  ;;  %v636_v33 = vld [vmem:[%s4853_s13 + $0x368] sm:$0xff]  ;;  %v6278_v58 = vld [vmem:[#allocation57_spill] sm:$0xff] }
 0x380   : > { %3551 = vst.msk [vmem:[%s4866_s15 + $0x378] sm:$0xff] %vm3439_vm0, %v3368_v30  ;;  %v2093_v26 = vmul.f32 %v6278_v58, %v455_v3  ;;  %v6279_v30 = vld [vmem:[#allocation80_spill] sm:$0xff]  ;;  %v464_v58 = vld [vmem:[%s4844_s9 + $0x3b8] sm:$0xff] }
 0x381   : > { %3541 = vst.msk [vmem:[%s4866_s15 + $0x328] sm:$0xff] %vm3439_vm0, %v3358_v0  ;;  %2902 = vperm.xlu2 %4116, %v1038_v11   ;;  %2897 = vperm.xlu1 %4115, %v1037_v32   ;;  %v2103_v0 = vmul.f32 %v6279_v30, %v465_v10  ;;  %v656_v30 = vld [vmem:[%s4853_s13 + $0x408] sm:$0xff] }
 0x382   : > { %3540 = vst.msk [vmem:[%s4866_s15 + $0x320] sm:$0xff] %vm3439_vm0, %v3357_v57  ;;  %2892 = vperm.xlu0 %4114, %v1036_v31   ;;  %v6280_v31 = vld [vmem:[#allocation67_spill] sm:$0xff] }
 0x383   : > { %v2738_v56 = vpop.permute.xlu2 %2737  ;;  %v2688_v25 = vpop.permute.xlu1 %2687  ;;  %v2092_v46 = vmul.f32 %v6280_v31, %v454_v22  ;;  %v1053_v22 = vld [vmem:[%s4737_s6 + $0x510] sm:$0xff] }
 0x384   : > { %v3189_v40 = vmul.f32 %v2738_v56, %v641_v49  ;;  %v3179_v61 = vmul.f32 %v2688_v25, %v631_v5  ;;  %v2683_v18 = vpop.permute.xlu0 %2682  ;;  %v1045_v25 = vld [vmem:[%s4737_s6 + $0x4d0] sm:$0xff] }
 0x385   : > { %v3178_v47 = vmul.f32 %v2683_v18, %v630_v21  ;;  %v1046_v21 = vld [vmem:[%s4737_s6 + $0x4d8] sm:$0xff] }
 0x386   : > { %v3371_v1 = vadd.f32 %v3189_v40, %v2097_v2  ;;  %v3361_v43 = vadd.f32 %v3179_v61, %v2087_v42  ;;  %v468_v42 = vld [vmem:[%s4844_s9 + $0x3d8] sm:$0xff]  ;;  %v640_v2 = vld [vmem:[%s4853_s13 + $0x388] sm:$0xff]  ;;  %v457_v40 = vld [vmem:[%s4844_s9 + $0x380] sm:$0xff] }
 0x387   : > { %v3360_v16 = vadd.f32 %v3178_v47, %v2086_v12  ;;  %v639_v61 = vld [vmem:[%s4853_s13 + $0x380] sm:$0xff]  ;;  %v6281_v12 = vld [vmem:[#allocation60_spill] sm:$0xff] }
 0x388   : > { %3554 = vst.msk [vmem:[%s4866_s15 + $0x390] sm:$0xff] %vm3439_vm0, %v3371_v1  ;;  %v2096_v47 = vmul.f32 %v6281_v12, %v458_v4  ;;  %v6282_v1 = vld [vmem:[#allocation83_spill] sm:$0xff]  ;;  %v467_v12 = vld [vmem:[%s4844_s9 + $0x3d0] sm:$0xff] }
 0x389   : > { %3544 = vst.msk [vmem:[%s4866_s15 + $0x340] sm:$0xff] %vm3439_vm0, %v3361_v43  ;;  %2917 = vperm.xlu2 %4116, %v1041_v28   ;;  %2912 = vperm.xlu1 %4115, %v1040_v59   ;;  %v2106_v43 = vmul.f32 %v6282_v1, %v468_v42  ;;  %v659_v1 = vld [vmem:[%s4853_s13 + $0x420] sm:$0xff] }
 0x38a   : > { %3543 = vst.msk [vmem:[%s4866_s15 + $0x338] sm:$0xff] %vm3439_vm0, %v3360_v16  ;;  %2907 = vperm.xlu0 %4114, %v1039_v36   ;;  %v6283_v36 = vld [vmem:[#allocation70_spill] sm:$0xff] }
 0x38b   : > { %v2753_v62 = vpop.permute.xlu2 %2752  ;;  %v2703_v38 = vpop.permute.xlu1 %2702  ;;  %v2095_v14 = vmul.f32 %v6283_v36, %v457_v40  ;;  %v1056_v40 = vld [vmem:[%s4737_s6 + $0x528] sm:$0xff] }
 0x38c   : > { %v3192_v7 = vmul.f32 %v2753_v62, %v644_v63  ;;  %v3182_v24 = vmul.f32 %v2703_v38, %v634_v23  ;;  %v2698_v51 = vpop.permute.xlu0 %2697  ;;  %v1048_v38 = vld [vmem:[%s4737_s6 + $0x4e8] sm:$0xff] }
 0x38d   : > { %v3181_v55 = vmul.f32 %v2698_v51, %v633_v27  ;;  %v1049_v27 = vld [vmem:[%s4737_s6 + $0x4f0] sm:$0xff] }
 0x38e   : > { %v3374_v17 = vadd.f32 %v3192_v7, %v2100_v44  ;;  %v3364_v15 = vadd.f32 %v3182_v24, %v2090_v48  ;;  %v471_v48 = vld [vmem:[%s4844_s9 + $0x3f0] sm:$0xff]  ;;  %v643_v44 = vld [vmem:[%s4853_s13 + $0x3a0] sm:$0xff]  ;;  %v460_v7 = vld [vmem:[%s4844_s9 + $0x398] sm:$0xff] }
 0x38f   : > { %v3363_v19 = vadd.f32 %v3181_v55, %v2089_v39  ;;  %v642_v24 = vld [vmem:[%s4853_s13 + $0x398] sm:$0xff]  ;;  %v6284_v39 = vld [vmem:[#allocation63_spill] sm:$0xff] }
 0x390   : > { %3557 = vst.msk [vmem:[%s4866_s15 + $0x3a8] sm:$0xff] %vm3439_vm0, %v3374_v17  ;;  %v2099_v55 = vmul.f32 %v6284_v39, %v461_v54  ;;  %v6285_v17 = vld [vmem:[#allocation86_spill] sm:$0xff]  ;;  %v470_v39 = vld [vmem:[%s4844_s9 + $0x3e8] sm:$0xff] }
 0x391   : > { %3547 = vst.msk [vmem:[%s4866_s15 + $0x358] sm:$0xff] %vm3439_vm0, %v3364_v15  ;;  %2932 = vperm.xlu2 %4116, %v1044_v35   ;;  %2927 = vperm.xlu1 %4115, %v1043_v13   ;;  %v2109_v15 = vmul.f32 %v6285_v17, %v471_v48  ;;  %v662_v17 = vld [vmem:[%s4853_s13 + $0x438] sm:$0xff] }
 0x392   : > { %3546 = vst.msk [vmem:[%s4866_s15 + $0x350] sm:$0xff] %vm3439_vm0, %v3363_v19  ;;  %2922 = vperm.xlu0 %4114, %v1042_v34   ;;  %v6286_v34 = vld [vmem:[#allocation73_spill] sm:$0xff] }
 0x393   : > { %v2768_v50 = vpop.permute.xlu2 %2767  ;;  %v2718_v60 = vpop.permute.xlu1 %2717  ;;  %v2098_v3 = vmul.f32 %v6286_v34, %v460_v7  ;;  %v1059_v7 = vld [vmem:[%s4737_s6 + $0x540] sm:$0xff] }
 0x394   : > { %v3195_v11 = vmul.f32 %v2768_v50, %v647_v53  ;;  %v3185_v32 = vmul.f32 %v2718_v60, %v637_v37  ;;  %v2713_v57 = vpop.permute.xlu0 %2712  ;;  %v1051_v60 = vld [vmem:[%s4737_s6 + $0x500] sm:$0xff] }
 0x395   : > { %v3184_v6 = vmul.f32 %v2713_v57, %v636_v33  ;;  %v1052_v33 = vld [vmem:[%s4737_s6 + $0x508] sm:$0xff] }
 0x396   : > { %v3377_v49 = vadd.f32 %v3195_v11, %v2103_v0  ;;  %v3367_v5 = vadd.f32 %v3185_v32, %v2093_v26  ;;  %v474_v26 = vld [vmem:[%s4844_s9 + $0x408] sm:$0xff]  ;;  %v646_v0 = vld [vmem:[%s4853_s13 + $0x3b8] sm:$0xff]  ;;  %v463_v11 = vld [vmem:[%s4844_s9 + $0x3b0] sm:$0xff] }
 0x397   : > { %v3366_v56 = vadd.f32 %v3184_v6, %v2092_v46  ;;  %v645_v32 = vld [vmem:[%s4853_s13 + $0x3b0] sm:$0xff]  ;;  %v6287_v46 = vld [vmem:[#allocation66_spill] sm:$0xff] }
 0x398   : > { %3560 = vst.msk [vmem:[%s4866_s15 + $0x3c0] sm:$0xff] %vm3439_vm0, %v3377_v49  ;;  %v2102_v6 = vmul.f32 %v6287_v46, %v464_v58  ;;  %v6288_v49 = vld [vmem:[#allocation89_spill] sm:$0xff]  ;;  %v473_v46 = vld [vmem:[%s4844_s9 + $0x400] sm:$0xff] }
 0x399   : > { %3550 = vst.msk [vmem:[%s4866_s15 + $0x370] sm:$0xff] %vm3439_vm0, %v3367_v5  ;;  %2947 = vperm.xlu2 %4116, %v1047_v29   ;;  %2942 = vperm.xlu1 %4115, %v1046_v21   ;;  %v2112_v5 = vmul.f32 %v6288_v49, %v474_v26  ;;  %v665_v49 = vld [vmem:[%s4853_s13 + $0x450] sm:$0xff] }
 0x39a   : > { %3549 = vst.msk [vmem:[%s4866_s15 + $0x368] sm:$0xff] %vm3439_vm0, %v3366_v56  ;;  %2937 = vperm.xlu0 %4114, %v1045_v25   ;;  %v6289_v25 = vld [vmem:[#allocation76_spill] sm:$0xff] }
 0x39b   : > { %v2783_v18 = vpop.permute.xlu2 %2782  ;;  %v2733_v9 = vpop.permute.xlu1 %2732  ;;  %v2101_v4 = vmul.f32 %v6289_v25, %v463_v11  ;;  %v1062_v11 = vld [vmem:[%s4737_s6 + $0x558] sm:$0xff] }
 0x39c   : > { %v3198_v28 = vmul.f32 %v2783_v18, %v650_v8  ;;  %v3188_v59 = vmul.f32 %v2733_v9, %v640_v2  ;;  %v2728_v16 = vpop.permute.xlu0 %2727  ;;  %v1054_v9 = vld [vmem:[%s4737_s6 + $0x518] sm:$0xff] }
 0x39d   : > { %v3187_v45 = vmul.f32 %v2728_v16, %v639_v61  ;;  %v1055_v61 = vld [vmem:[%s4737_s6 + $0x520] sm:$0xff] }
 0x39e   : > { %v3380_v63 = vadd.f32 %v3198_v28, %v2106_v43  ;;  %v3370_v23 = vadd.f32 %v3188_v59, %v2096_v47  ;;  %v477_v47 = vld [vmem:[%s4844_s9 + $0x420] sm:$0xff]  ;;  %v649_v43 = vld [vmem:[%s4853_s13 + $0x3d0] sm:$0xff]  ;;  %v466_v28 = vld [vmem:[%s4844_s9 + $0x3c8] sm:$0xff] }
 0x39f   : > { %v3369_v62 = vadd.f32 %v3187_v45, %v2095_v14  ;;  %v648_v59 = vld [vmem:[%s4853_s13 + $0x3c8] sm:$0xff]  ;;  %v6290_v14 = vld [vmem:[#allocation69_spill] sm:$0xff] }
 0x3a0   : > { %3563 = vst.msk [vmem:[%s4866_s15 + $0x3d8] sm:$0xff] %vm3439_vm0, %v3380_v63  ;;  %v2105_v45 = vmul.f32 %v6290_v14, %v467_v12  ;;  %v6291_v63 = vld [vmem:[#allocation92_spill] sm:$0xff]  ;;  %v476_v14 = vld [vmem:[%s4844_s9 + $0x418] sm:$0xff] }
 0x3a1   : > { %3553 = vst.msk [vmem:[%s4866_s15 + $0x388] sm:$0xff] %vm3439_vm0, %v3370_v23  ;;  %2962 = vperm.xlu2 %4116, %v1050_v20   ;;  %2957 = vperm.xlu1 %4115, %v1049_v27   ;;  %v2115_v23 = vmul.f32 %v6291_v63, %v477_v47  ;;  %v668_v63 = vld [vmem:[%s4853_s13 + $0x468] sm:$0xff] }
 0x3a2   : > { %3552 = vst.msk [vmem:[%s4866_s15 + $0x380] sm:$0xff] %vm3439_vm0, %v3369_v62  ;;  %2952 = vperm.xlu0 %4114, %v1048_v38   ;;  %v6292_v38 = vld [vmem:[#allocation79_spill] sm:$0xff] }
 0x3a3   : > { %v2798_v51 = vpop.permute.xlu2 %2797  ;;  %v2748_v41 = vpop.permute.xlu1 %2747  ;;  %v2104_v54 = vmul.f32 %v6292_v38, %v466_v28  ;;  %v1065_v28 = vld [vmem:[%s4737_s6 + $0x570] sm:$0xff] }
 0x3a4   : > { %v3201_v35 = vmul.f32 %v2798_v51, %v653_v52  ;;  %v3191_v13 = vmul.f32 %v2748_v41, %v643_v44  ;;  %v2743_v19 = vpop.permute.xlu0 %2742  ;;  %v1057_v41 = vld [vmem:[%s4737_s6 + $0x530] sm:$0xff] }
 0x3a5   : > { %v3190_v10 = vmul.f32 %v2743_v19, %v642_v24  ;;  %v1058_v24 = vld [vmem:[%s4737_s6 + $0x538] sm:$0xff] }
 0x3a6   : > { %v3383_v53 = vadd.f32 %v3201_v35, %v2109_v15  ;;  %v3373_v37 = vadd.f32 %v3191_v13, %v2099_v55  ;;  %v480_v55 = vld [vmem:[%s4844_s9 + $0x438] sm:$0xff]  ;;  %v652_v15 = vld [vmem:[%s4853_s13 + $0x3e8] sm:$0xff]  ;;  %v469_v35 = vld [vmem:[%s4844_s9 + $0x3e0] sm:$0xff] }
 0x3a7   : > { %v3372_v50 = vadd.f32 %v3190_v10, %v2098_v3  ;;  %v651_v13 = vld [vmem:[%s4853_s13 + $0x3e0] sm:$0xff]  ;;  %v6293_v3 = vld [vmem:[#allocation72_spill] sm:$0xff] }
 0x3a8   : > { %3566 = vst.msk [vmem:[%s4866_s15 + $0x3f0] sm:$0xff] %vm3439_vm0, %v3383_v53  ;;  %v2108_v10 = vmul.f32 %v6293_v3, %v470_v39  ;;  %v6294_v53 = vld [vmem:[#allocation95_spill] sm:$0xff]  ;;  %v479_v3 = vld [vmem:[%s4844_s9 + $0x430] sm:$0xff] }
 0x3a9   : > { %3556 = vst.msk [vmem:[%s4866_s15 + $0x3a0] sm:$0xff] %vm3439_vm0, %v3373_v37  ;;  %2977 = vperm.xlu2 %4116, %v1053_v22   ;;  %2972 = vperm.xlu1 %4115, %v1052_v33   ;;  %v2118_v37 = vmul.f32 %v6294_v53, %v480_v55  ;;  %v671_v53 = vld [vmem:[%s4853_s13 + $0x480] sm:$0xff] }
 0x3aa   : > { %3555 = vst.msk [vmem:[%s4866_s15 + $0x398] sm:$0xff] %vm3439_vm0, %v3372_v50  ;;  %2967 = vperm.xlu0 %4114, %v1051_v60   ;;  %v6295_v60 = vld [vmem:[#allocation82_spill] sm:$0xff] }
 0x3ab   : > { %v2813_v57 = vpop.permute.xlu2 %2812  ;;  %v2763_v31 = vpop.permute.xlu1 %2762  ;;  %v2107_v58 = vmul.f32 %v6295_v60, %v469_v35  ;;  %v1068_v35 = vld [vmem:[%s4737_s6 + $0x588] sm:$0xff] }
 0x3ac   : > { %v3204_v29 = vmul.f32 %v2813_v57, %v656_v30  ;;  %v3194_v21 = vmul.f32 %v2763_v31, %v646_v0  ;;  %v2758_v56 = vpop.permute.xlu0 %2757  ;;  %v1060_v31 = vld [vmem:[%s4737_s6 + $0x548] sm:$0xff] }
 0x3ad   : > { %v3193_v42 = vmul.f32 %v2758_v56, %v645_v32  ;;  %v1061_v32 = vld [vmem:[%s4737_s6 + $0x550] sm:$0xff] }
 0x3ae   : > { %v3386_v8 = vadd.f32 %v3204_v29, %v2112_v5  ;;  %v3376_v2 = vadd.f32 %v3194_v21, %v2102_v6  ;;  %v483_v6 = vld [vmem:[%s4844_s9 + $0x450] sm:$0xff]  ;;  %v655_v5 = vld [vmem:[%s4853_s13 + $0x400] sm:$0xff]  ;;  %v472_v29 = vld [vmem:[%s4844_s9 + $0x3f8] sm:$0xff] }
 0x3af   : > { %v3375_v18 = vadd.f32 %v3193_v42, %v2101_v4  ;;  %v654_v21 = vld [vmem:[%s4853_s13 + $0x3f8] sm:$0xff]  ;;  %v6296_v4 = vld [vmem:[#allocation75_spill] sm:$0xff] }
 0x3b0   : > { %3569 = vst.msk [vmem:[%s4866_s15 + $0x408] sm:$0xff] %vm3439_vm0, %v3386_v8  ;;  %v2111_v42 = vmul.f32 %v6296_v4, %v473_v46  ;;  %v6297_v8 = vld [vmem:[#allocation98_spill] sm:$0xff]  ;;  %v482_v4 = vld [vmem:[%s4844_s9 + $0x448] sm:$0xff] }
 0x3b1   : > { %3559 = vst.msk [vmem:[%s4866_s15 + $0x3b8] sm:$0xff] %vm3439_vm0, %v3376_v2  ;;  %2992 = vperm.xlu2 %4116, %v1056_v40   ;;  %2987 = vperm.xlu1 %4115, %v1055_v61   ;;  %v2121_v2 = vmul.f32 %v6297_v8, %v483_v6  ;;  %v674_v8 = vld [vmem:[%s4853_s13 + $0x498] sm:$0xff] }
 0x3b2   : > { %3558 = vst.msk [vmem:[%s4866_s15 + $0x3b0] sm:$0xff] %vm3439_vm0, %v3375_v18  ;;  %2982 = vperm.xlu0 %4114, %v1054_v9   ;;  %v6298_v9 = vld [vmem:[#allocation85_spill] sm:$0xff] }
 0x3b3   : > { %v2828_v16 = vpop.permute.xlu2 %2827  ;;  %v2778_v36 = vpop.permute.xlu1 %2777  ;;  %v2110_v12 = vmul.f32 %v6298_v9, %v472_v29  ;;  %v1071_v29 = vld [vmem:[%s4737_s6 + $0x5a0] sm:$0xff] }
 0x3b4   : > { %v3207_v20 = vmul.f32 %v2828_v16, %v659_v1  ;;  %v3197_v27 = vmul.f32 %v2778_v36, %v649_v43  ;;  %v2773_v62 = vpop.permute.xlu0 %2772  ;;  %v1063_v36 = vld [vmem:[%s4737_s6 + $0x560] sm:$0xff] }
 0x3b5   : > { %v3196_v48 = vmul.f32 %v2773_v62, %v648_v59  ;;  %v1064_v59 = vld [vmem:[%s4737_s6 + $0x568] sm:$0xff] }
 0x3b6   : > { %v3389_v52 = vadd.f32 %v3207_v20, %v2115_v23  ;;  %v3379_v44 = vadd.f32 %v3197_v27, %v2105_v45  ;;  %v486_v45 = vld [vmem:[%s4844_s9 + $0x468] sm:$0xff]  ;;  %v658_v23 = vld [vmem:[%s4853_s13 + $0x418] sm:$0xff]  ;;  %v475_v20 = vld [vmem:[%s4844_s9 + $0x410] sm:$0xff] }
 0x3b7   : > { %v3378_v51 = vadd.f32 %v3196_v48, %v2104_v54  ;;  %v657_v27 = vld [vmem:[%s4853_s13 + $0x410] sm:$0xff]  ;;  %v6299_v54 = vld [vmem:[#allocation78_spill] sm:$0xff] }
 0x3b8   : > { %3572 = vst.msk [vmem:[%s4866_s15 + $0x420] sm:$0xff] %vm3439_vm0, %v3389_v52  ;;  %v2114_v48 = vmul.f32 %v6299_v54, %v476_v14  ;;  %v6300_v52 = vld [vmem:[#allocation101_spill] sm:$0xff] }
 0x3b9   : > { %3562 = vst.msk [vmem:[%s4866_s15 + $0x3d0] sm:$0xff] %vm3439_vm0, %v3379_v44  ;;  %3007 = vperm.xlu2 %4116, %v1059_v7   ;;  %3002 = vperm.xlu1 %4115, %v1058_v24   ;;  %v2124_v44 = vmul.f32 %v6300_v52, %v486_v45  ;;  %v677_v54 = vld [vmem:[%s4853_s13 + $0x4b0] sm:$0xff]  ;;  %v484_v52 = vld [vmem:[%s4844_s9 + $0x458] sm:$0xff] }
 0x3ba   : > { %3561 = vst.msk [vmem:[%s4866_s15 + $0x3c8] sm:$0xff] %vm3439_vm0, %v3378_v51  ;;  %2997 = vperm.xlu0 %4114, %v1057_v41   ;;  %v6301_v41 = vld [vmem:[#allocation88_spill] sm:$0xff] }
 0x3bb   : > { %v2843_v19 = vpop.permute.xlu2 %2842  ;;  %v2793_v34 = vpop.permute.xlu1 %2792  ;;  %v2113_v39 = vmul.f32 %v6301_v41, %v475_v20 }
 0x3bc   : > { %v3210_v22 = vmul.f32 %v2843_v19, %v662_v17  ;;  %v3200_v33 = vmul.f32 %v2793_v34, %v652_v15  ;;  %v2788_v50 = vpop.permute.xlu0 %2787  ;;  %v1066_v34 = vld [vmem:[%s4737_s6 + $0x578] sm:$0xff] }
 0x3bd   : > { %v3199_v26 = vmul.f32 %v2788_v50, %v651_v13  ;;  %v1067_v13 = vld [vmem:[%s4737_s6 + $0x580] sm:$0xff] }
 0x3be   : > { %v3392_v30 = vadd.f32 %v3210_v22, %v2118_v37  ;;  %v3382_v0 = vadd.f32 %v3200_v33, %v2108_v10  ;;  %v489_v10 = vld [vmem:[%s4844_s9 + $0x480] sm:$0xff]  ;;  %v661_v37 = vld [vmem:[%s4853_s13 + $0x430] sm:$0xff]  ;;  %v478_v22 = vld [vmem:[%s4844_s9 + $0x428] sm:$0xff] }
 0x3bf   : > { %v3381_v57 = vadd.f32 %v3199_v26, %v2107_v58  ;;  %v660_v33 = vld [vmem:[%s4853_s13 + $0x428] sm:$0xff]  ;;  %v6302_v58 = vld [vmem:[#allocation81_spill] sm:$0xff] }
 0x3c0   : > { %3575 = vst.msk [vmem:[%s4866_s15 + $0x438] sm:$0xff] %vm3439_vm0, %v3392_v30  ;;  %v2117_v26 = vmul.f32 %v6302_v58, %v479_v3  ;;  %v6303_v30 = vld [vmem:[#allocation104_spill] sm:$0xff]  ;;  %v669_v58 = vld [vmem:[%s4853_s13 + $0x470] sm:$0xff] }
 0x3c1   : > { %3565 = vst.msk [vmem:[%s4866_s15 + $0x3e8] sm:$0xff] %vm3439_vm0, %v3382_v0  ;;  %3022 = vperm.xlu2 %4116, %v1062_v11   ;;  %3017 = vperm.xlu1 %4115, %v1061_v32   ;;  %v2127_v0 = vmul.f32 %v6303_v30, %v489_v10 }
 0x3c2   : > { %3564 = vst.msk [vmem:[%s4866_s15 + $0x3e0] sm:$0xff] %vm3439_vm0, %v3381_v57  ;;  %3012 = vperm.xlu0 %4114, %v1060_v31   ;;  %v6304_v31 = vld [vmem:[#allocation91_spill] sm:$0xff] }
 0x3c3   : > { %v2858_v56 = vpop.permute.xlu2 %2857  ;;  %v2808_v25 = vpop.permute.xlu1 %2807  ;;  %v2116_v46 = vmul.f32 %v6304_v31, %v478_v22  ;;  %v498_v22 = vld [vmem:[%s4844_s9 + $0x4c8] sm:$0xff] }
 0x3c4   : > { %v3213_v40 = vmul.f32 %v2858_v56, %v665_v49  ;;  %v3203_v61 = vmul.f32 %v2808_v25, %v655_v5  ;;  %v2803_v18 = vpop.permute.xlu0 %2802  ;;  %v1069_v25 = vld [vmem:[%s4737_s6 + $0x590] sm:$0xff] }
 0x3c5   : > { %v3202_v47 = vmul.f32 %v2803_v18, %v654_v21  ;;  %v1070_v21 = vld [vmem:[%s4737_s6 + $0x598] sm:$0xff] }
 0x3c6   : > { %v3395_v1 = vadd.f32 %v3213_v40, %v2121_v2  ;;  %v3385_v43 = vadd.f32 %v3203_v61, %v2111_v42  ;;  %v492_v42 = vld [vmem:[%s4844_s9 + $0x498] sm:$0xff]  ;;  %v664_v2 = vld [vmem:[%s4853_s13 + $0x448] sm:$0xff]  ;;  %v481_v40 = vld [vmem:[%s4844_s9 + $0x440] sm:$0xff] }
 0x3c7   : > { %v3384_v16 = vadd.f32 %v3202_v47, %v2110_v12  ;;  %v663_v61 = vld [vmem:[%s4853_s13 + $0x440] sm:$0xff]  ;;  %v6305_v12 = vld [vmem:[#allocation84_spill] sm:$0xff] }
 0x3c8   : > { %3578 = vst.msk [vmem:[%s4866_s15 + $0x450] sm:$0xff] %vm3439_vm0, %v3395_v1  ;;  %v2120_v47 = vmul.f32 %v6305_v12, %v482_v4  ;;  %v6306_v1 = vld [vmem:[#allocation107_spill] sm:$0xff]  ;;  %v491_v4 = vld [vmem:[%s4844_s9 + $0x490] sm:$0xff] }
 0x3c9   : > { %3568 = vst.msk [vmem:[%s4866_s15 + $0x400] sm:$0xff] %vm3439_vm0, %v3385_v43  ;;  %3037 = vperm.xlu2 %4116, %v1065_v28   ;;  %3032 = vperm.xlu1 %4115, %v1064_v59   ;;  %v2130_v43 = vmul.f32 %v6306_v1, %v492_v42  ;;  %v501_v42 = vld [vmem:[%s4844_s9 + $0x4e0] sm:$0xff]  ;;  %v6314_v12 = vld [vmem:[#allocation93_spill] sm:$0xff]  ;;  %v6315_v1 = vld [vmem:[#allocation116_spill] sm:$0xff] }
 0x3ca   : > { %3567 = vst.msk [vmem:[%s4866_s15 + $0x3f8] sm:$0xff] %vm3439_vm0, %v3384_v16  ;;  %3027 = vperm.xlu0 %4114, %v1063_v36   ;;  %v6307_v36 = vld [vmem:[#allocation94_spill] sm:$0xff] }
 0x3cb   : > { %v2873_v62 = vpop.permute.xlu2 %2872  ;;  %v2823_v38 = vpop.permute.xlu1 %2822  ;;  %v2119_v14 = vmul.f32 %v6307_v36, %v481_v40  ;;  %v490_v40 = vld [vmem:[%s4844_s9 + $0x488] sm:$0xff]  ;;  %v6316_v36 = vld [vmem:[#allocation103_spill] sm:$0xff] }
 0x3cc   : > { %v3216_v7 = vmul.f32 %v2873_v62, %v668_v63  ;;  %v3206_v24 = vmul.f32 %v2823_v38, %v658_v23  ;;  %v2818_v51 = vpop.permute.xlu0 %2817  ;;  %v485_v62 = vld [vmem:[%s4844_s9 + $0x460] sm:$0xff]  ;;  %v495_v38 = vld [vmem:[%s4844_s9 + $0x4b0] sm:$0xff] }
 0x3cd   : > { %v3205_v55 = vmul.f32 %v2818_v51, %v657_v27  ;;  %v1072_v27 = vld [vmem:[%s4737_s6 + $0x5a8] sm:$0xff]  ;;  %v6308_v51 = vld [vmem:[#allocation87_spill] sm:$0xff] }
 0x3ce   : > { %v3398_v17 = vadd.f32 %v3216_v7, %v2124_v44  ;;  %v3388_v15 = vadd.f32 %v3206_v24, %v2114_v48  ;;  %v667_v48 = vld [vmem:[%s4853_s13 + $0x460] sm:$0xff]  ;;  %v666_v44 = vld [vmem:[%s4853_s13 + $0x458] sm:$0xff]  ;;  %v2123_v41 = vmul.f32 %v6308_v51, %v485_v62 }
 0x3cf   : > { %v3387_v19 = vadd.f32 %v3205_v55, %v2113_v39  ;;  %v6309_v39 = vld [vmem:[#allocation110_spill] sm:$0xff] }
 0x3d0   : > { %3581 = vst.msk [vmem:[%s4866_s15 + $0x468] sm:$0xff] %vm3439_vm0, %v3398_v17  ;;  %v2133_v55 = vmul.f32 %v6309_v39, %v495_v38  ;;  %v504_v62 = vld [vmem:[%s4844_s9 + $0x4f8] sm:$0xff] }
 0x3d1   : > { %3571 = vst.msk [vmem:[%s4866_s15 + $0x418] sm:$0xff] %vm3439_vm0, %v3388_v15  ;;  %3052 = vperm.xlu2 %4116, %v1068_v35   ;;  %3047 = vperm.xlu1 %4115, %v1067_v13   ;;  %v6310_v13 = vld [vmem:[#allocation97_spill] sm:$0xff]  ;;  %v686_v38 = vld [vmem:[%s4853_s13 + $0x4f8] sm:$0xff] }
 0x3d2   : > { %3570 = vst.msk [vmem:[%s4866_s15 + $0x410] sm:$0xff] %vm3439_vm0, %v3387_v19  ;;  %3042 = vperm.xlu0 %4114, %v1066_v34   ;;  %v2122_v19 = vmul.f32 %v6310_v13, %v484_v52  ;;  %v675_v52 = vld [vmem:[%s4853_s13 + $0x4a0] sm:$0xff] }
 0x3d3   : > { %v2888_v50 = vpop.permute.xlu2 %2887  ;;  %v2838_v60 = vpop.permute.xlu1 %2837 }
 0x3d4   : > { %v3219_v11 = vmul.f32 %v2888_v50, %v671_v53  ;;  %v3209_v32 = vmul.f32 %v2838_v60, %v661_v37  ;;  %v2833_v57 = vpop.permute.xlu0 %2832  ;;  %v488_v37 = vld [vmem:[%s4844_s9 + $0x478] sm:$0xff]  ;;  %v487_v60 = vld [vmem:[%s4844_s9 + $0x470] sm:$0xff] }
 0x3d5   : > { %v3208_v6 = vmul.f32 %v2833_v57, %v660_v33  ;;  %v680_v33 = vld [vmem:[%s4853_s13 + $0x4c8] sm:$0xff]  ;;  %v670_v50 = vld [vmem:[%s4853_s13 + $0x478] sm:$0xff] }
 0x3d6   : > { %v3401_v49 = vadd.f32 %v3219_v11, %v2127_v0  ;;  %v3391_v5 = vadd.f32 %v3209_v32, %v2117_v26  ;;  %v6311_v0 = vld [vmem:[#allocation90_spill] sm:$0xff]  ;;  %v6312_v32 = vld [vmem:[#allocation113_spill] sm:$0xff] }
 0x3d7   : > { %v3390_v56 = vadd.f32 %v3208_v6, %v2116_v46  ;;  %v2126_v11 = vmul.f32 %v6311_v0, %v488_v37  ;;  %v2136_v57 = vmul.f32 %v6312_v32, %v498_v22  ;;  %v507_v37 = vld [vmem:[%s4844_s9 + $0x510] sm:$0xff] }
 0x3d8   : > { %3584 = vst.msk [vmem:[%s4866_s15 + $0x480] sm:$0xff] %vm3439_vm0, %v3401_v49  ;;  %v6313_v49 = vld [vmem:[#allocation100_spill] sm:$0xff]  ;;  %v689_v22 = vld [vmem:[%s4853_s13 + $0x510] sm:$0xff] }
 0x3d9   : > { %3574 = vst.msk [vmem:[%s4866_s15 + $0x430] sm:$0xff] %vm3439_vm0, %v3391_v5  ;;  %3067 = vperm.xlu2 %4116, %v1071_v29   ;;  %3062 = vperm.xlu1 %4115, %v1070_v21   ;;  %v2125_v5 = vmul.f32 %v6313_v49, %v487_v60  ;;  %v678_v60 = vld [vmem:[%s4853_s13 + $0x4b8] sm:$0xff] }
 0x3da   : > { %3573 = vst.msk [vmem:[%s4866_s15 + $0x428] sm:$0xff] %vm3439_vm0, %v3390_v56  ;;  %3057 = vperm.xlu0 %4114, %v1069_v25  }
 0x3db   : > { %v2903_v18 = vpop.permute.xlu2 %2902  ;;  %v2853_v9 = vpop.permute.xlu1 %2852 }
 0x3dc   : > { %v3222_v28 = vmul.f32 %v2903_v18, %v674_v8  ;;  %v3212_v59 = vmul.f32 %v2853_v9, %v664_v2  ;;  %v2848_v16 = vpop.permute.xlu0 %2847  ;;  %v683_v8 = vld [vmem:[%s4853_s13 + $0x4e0] sm:$0xff]  ;;  %v673_v2 = vld [vmem:[%s4853_s13 + $0x490] sm:$0xff] }
 0x3dd   : > { %v3211_v45 = vmul.f32 %v2848_v16, %v663_v61  ;;  %v672_v61 = vld [vmem:[%s4853_s13 + $0x488] sm:$0xff] }
 0x3de   : > { %v3404_v63 = vadd.f32 %v3222_v28, %v2130_v43  ;;  %v3394_v23 = vadd.f32 %v3212_v59, %v2120_v47  ;;  %v2129_v47 = vmul.f32 %v6314_v12, %v491_v4  ;;  %v2139_v43 = vmul.f32 %v6315_v1, %v501_v42  ;;  %v510_v4 = vld [vmem:[%s4844_s9 + $0x528] sm:$0xff] }
 0x3df   : > { %v3393_v20 = vadd.f32 %v3211_v45, %v2119_v14  ;;  %v2128_v14 = vmul.f32 %v6316_v36, %v490_v40  ;;  %v692_v42 = vld [vmem:[%s4853_s13 + $0x528] sm:$0xff]  ;;  %v681_v40 = vld [vmem:[%s4853_s13 + $0x4d0] sm:$0xff] }
 0x3e0   : > { %3587 = vst.msk [vmem:[%s4866_s15 + $0x498] sm:$0xff] %vm3439_vm0, %v3404_v63 }
 0x3e1   : > { %3577 = vst.msk [vmem:[%s4866_s15 + $0x448] sm:$0xff] %vm3439_vm0, %v3394_v23 }
 0x3e2   : > { %3576 = vst.msk [vmem:[%s4866_s15 + $0x440] sm:$0xff] %vm3439_vm0, %v3393_v20  ;;  %3072 = vperm.xlu0 %4114, %v1072_v27   ;;  %v494_v27 = vld [vmem:[%s4844_s9 + $0x4a8] sm:$0xff] }
 0x3e3   : > { %v2918_v7 = vpop.permute.xlu2 %2917  ;;  %v2868_v24 = vpop.permute.xlu1 %2867 }
 0x3e4   : > { %v3225_v17 = vmul.f32 %v2918_v7, %v677_v54  ;;  %v3215_v15 = vmul.f32 %v2868_v24, %v667_v48  ;;  %v2863_v35 = vpop.permute.xlu0 %2862  ;;  %v676_v54 = vld [vmem:[%s4853_s13 + $0x4a8] sm:$0xff]  ;;  %v493_v48 = vld [vmem:[%s4844_s9 + $0x4a0] sm:$0xff] }
 0x3e5   : > { %v3214_v34 = vmul.f32 %v2863_v35, %v666_v44  ;;  %v6317_v24 = vld [vmem:[#allocation96_spill] sm:$0xff]  ;;  %v6319_v35 = vld [vmem:[#allocation106_spill] sm:$0xff] }
 0x3e6   : > { %v3407_v3 = vadd.f32 %v3225_v17, %v2133_v55  ;;  %v3397_v10 = vadd.f32 %v3215_v15, %v2123_v41  ;;  %v2132_v51 = vmul.f32 %v6317_v24, %v494_v27  ;;  %v6318_v41 = vld [vmem:[#allocation119_spill] sm:$0xff]  ;;  %v2131_v13 = vmul.f32 %v6319_v35, %v493_v48  ;;  %v684_v48 = vld [vmem:[%s4853_s13 + $0x4e8] sm:$0xff] }
 0x3e7   : > { %v3396_v53 = vadd.f32 %v3214_v34, %v2122_v19  ;;  %v2142_v39 = vmul.f32 %v6318_v41, %v504_v62  ;;  %v513_v27 = vld [vmem:[%s4844_s9 + $0x540] sm:$0xff] }
 0x3e8   : > { %3590 = vst.msk [vmem:[%s4866_s15 + $0x4b0] sm:$0xff] %vm3439_vm0, %v3407_v3  ;;  %v695_v62 = vld [vmem:[%s4853_s13 + $0x540] sm:$0xff] }
 0x3e9   : > { %3580 = vst.msk [vmem:[%s4866_s15 + $0x460] sm:$0xff] %vm3439_vm0, %v3397_v10 }
 0x3ea   : > { %3579 = vst.msk [vmem:[%s4866_s15 + $0x458] sm:$0xff] %vm3439_vm0, %v3396_v53  ;;  %v497_v53 = vld [vmem:[%s4844_s9 + $0x4c0] sm:$0xff] }
 0x3eb   : > { %v2933_v26 = vpop.permute.xlu2 %2932  ;;  %v2883_v30 = vpop.permute.xlu1 %2882 }
 0x3ec   : > { %v3228_v31 = vmul.f32 %v2933_v26, %v680_v33  ;;  %v3218_v46 = vmul.f32 %v2883_v30, %v670_v50  ;;  %v2878_v6 = vpop.permute.xlu0 %2877  ;;  %v679_v33 = vld [vmem:[%s4853_s13 + $0x4c0] sm:$0xff]  ;;  %v496_v50 = vld [vmem:[%s4844_s9 + $0x4b8] sm:$0xff] }
 0x3ed   : > { %v3217_v29 = vmul.f32 %v2878_v6, %v669_v58  ;;  %v6320_v30 = vld [vmem:[#allocation99_spill] sm:$0xff]  ;;  %v6322_v6 = vld [vmem:[#allocation109_spill] sm:$0xff] }
 0x3ee   : > { %v3410_v21 = vadd.f32 %v3228_v31, %v2136_v57  ;;  %v3400_v56 = vadd.f32 %v3218_v46, %v2126_v11  ;;  %v2135_v0 = vmul.f32 %v6320_v30, %v497_v53  ;;  %v6321_v11 = vld [vmem:[#allocation122_spill] sm:$0xff]  ;;  %v2134_v49 = vmul.f32 %v6322_v6, %v496_v50  ;;  %v687_v50 = vld [vmem:[%s4853_s13 + $0x500] sm:$0xff] }
 0x3ef   : > { %v3399_v25 = vadd.f32 %v3217_v29, %v2125_v5  ;;  %v2145_v32 = vmul.f32 %v6321_v11, %v507_v37  ;;  %v516_v53 = vld [vmem:[%s4844_s9 + $0x558] sm:$0xff] }
 0x3f0   : > { %3593 = vst.msk [vmem:[%s4866_s15 + $0x4c8] sm:$0xff] %vm3439_vm0, %v3410_v21  ;;  %v698_v37 = vld [vmem:[%s4853_s13 + $0x558] sm:$0xff] }
 0x3f1   : > { %3583 = vst.msk [vmem:[%s4866_s15 + $0x478] sm:$0xff] %vm3439_vm0, %v3400_v56 }
 0x3f2   : > { %3582 = vst.msk [vmem:[%s4866_s15 + $0x470] sm:$0xff] %vm3439_vm0, %v3399_v25  ;;  %v500_v25 = vld [vmem:[%s4844_s9 + $0x4d8] sm:$0xff] }
 0x3f3   : > { %v2948_v18 = vpop.permute.xlu2 %2947  ;;  %v2898_v9 = vpop.permute.xlu1 %2897 }
 0x3f4   : > { %v3231_v28 = vmul.f32 %v2948_v18, %v683_v8  ;;  %v3221_v59 = vmul.f32 %v2898_v9, %v673_v2  ;;  %v2893_v16 = vpop.permute.xlu0 %2892  ;;  %v682_v8 = vld [vmem:[%s4853_s13 + $0x4d8] sm:$0xff]  ;;  %v499_v2 = vld [vmem:[%s4844_s9 + $0x4d0] sm:$0xff] }
 0x3f5   : > { %v3220_v45 = vmul.f32 %v2893_v16, %v672_v61  ;;  %v6323_v9 = vld [vmem:[#allocation102_spill] sm:$0xff]  ;;  %v6325_v16 = vld [vmem:[#allocation112_spill] sm:$0xff] }
 0x3f6   : > { %v3413_v63 = vadd.f32 %v3231_v28, %v2139_v43  ;;  %v3403_v23 = vadd.f32 %v3221_v59, %v2129_v47  ;;  %v2138_v12 = vmul.f32 %v6323_v9, %v500_v25  ;;  %v6324_v47 = vld [vmem:[#allocation125_spill] sm:$0xff]  ;;  %v2137_v36 = vmul.f32 %v6325_v16, %v499_v2  ;;  %v690_v2 = vld [vmem:[%s4853_s13 + $0x518] sm:$0xff] }
 0x3f7   : > { %v3402_v20 = vadd.f32 %v3220_v45, %v2128_v14  ;;  %v2148_v1 = vmul.f32 %v6324_v47, %v510_v4  ;;  %v519_v25 = vld [vmem:[%s4844_s9 + $0x570] sm:$0xff] }
 0x3f8   : > { %3596 = vst.msk [vmem:[%s4866_s15 + $0x4e0] sm:$0xff] %vm3439_vm0, %v3413_v63  ;;  %v701_v4 = vld [vmem:[%s4853_s13 + $0x570] sm:$0xff] }
 0x3f9   : > { %3586 = vst.msk [vmem:[%s4866_s15 + $0x490] sm:$0xff] %vm3439_vm0, %v3403_v23 }
 0x3fa   : > { %3585 = vst.msk [vmem:[%s4866_s15 + $0x488] sm:$0xff] %vm3439_vm0, %v3402_v20  ;;  %v503_v20 = vld [vmem:[%s4844_s9 + $0x4f0] sm:$0xff] }
 0x3fb   : > { %v2963_v44 = vpop.permute.xlu2 %2962  ;;  %v2913_v7 = vpop.permute.xlu1 %2912 }
 0x3fc   : > { %v3234_v55 = vmul.f32 %v2963_v44, %v686_v38  ;;  %v3224_v17 = vmul.f32 %v2913_v7, %v676_v54  ;;  %v2908_v15 = vpop.permute.xlu0 %2907  ;;  %v685_v38 = vld [vmem:[%s4853_s13 + $0x4f0] sm:$0xff]  ;;  %v502_v54 = vld [vmem:[%s4844_s9 + $0x4e8] sm:$0xff] }
 0x3fd   : > { %v3223_v19 = vmul.f32 %v2908_v15, %v675_v52  ;;  %v6326_v7 = vld [vmem:[#allocation105_spill] sm:$0xff]  ;;  %v6328_v15 = vld [vmem:[#allocation115_spill] sm:$0xff] }
 0x3fe   : > { %v3416_v34 = vadd.f32 %v3234_v55, %v2142_v39  ;;  %v3406_v3 = vadd.f32 %v3224_v17, %v2132_v51  ;;  %v2141_v24 = vmul.f32 %v6326_v7, %v503_v20  ;;  %v6327_v51 = vld [vmem:[#allocation128_spill] sm:$0xff]  ;;  %v2140_v35 = vmul.f32 %v6328_v15, %v502_v54  ;;  %v693_v54 = vld [vmem:[%s4853_s13 + $0x530] sm:$0xff] }
 0x3ff   : > { %v3405_v10 = vadd.f32 %v3223_v19, %v2131_v13  ;;  %v2151_v41 = vmul.f32 %v6327_v51, %v513_v27  ;;  %v522_v20 = vld [vmem:[%s4844_s9 + $0x588] sm:$0xff] }
 0x400   : > { %3599 = vst.msk [vmem:[%s4866_s15 + $0x4f8] sm:$0xff] %vm3439_vm0, %v3416_v34  ;;  %v704_v27 = vld [vmem:[%s4853_s13 + $0x588] sm:$0xff] }
 0x401   : > { %3589 = vst.msk [vmem:[%s4866_s15 + $0x4a8] sm:$0xff] %vm3439_vm0, %v3406_v3 }
 0x402   : > { %3588 = vst.msk [vmem:[%s4866_s15 + $0x4a0] sm:$0xff] %vm3439_vm0, %v3405_v10  ;;  %v506_v10 = vld [vmem:[%s4844_s9 + $0x508] sm:$0xff] }
 0x403   : > { %v2978_v58 = vpop.permute.xlu2 %2977  ;;  %v2928_v26 = vpop.permute.xlu1 %2927 }
 0x404   : > { %v3237_v57 = vmul.f32 %v2978_v58, %v689_v22  ;;  %v3227_v31 = vmul.f32 %v2928_v26, %v679_v33  ;;  %v2923_v46 = vpop.permute.xlu0 %2922  ;;  %v688_v22 = vld [vmem:[%s4853_s13 + $0x508] sm:$0xff]  ;;  %v505_v33 = vld [vmem:[%s4844_s9 + $0x500] sm:$0xff] }
 0x405   : > { %v3226_v5 = vmul.f32 %v2923_v46, %v678_v60  ;;  %v6329_v26 = vld [vmem:[#allocation108_spill] sm:$0xff]  ;;  %v6331_v46 = vld [vmem:[#allocation118_spill] sm:$0xff] }
 0x406   : > { %v3419_v29 = vadd.f32 %v3237_v57, %v2145_v32  ;;  %v3409_v21 = vadd.f32 %v3227_v31, %v2135_v0  ;;  %v2144_v30 = vmul.f32 %v6329_v26, %v506_v10  ;;  %v6330_v0 = vld [vmem:[#allocation130_spill] sm:$0xff]  ;;  %v2143_v6 = vmul.f32 %v6331_v46, %v505_v33  ;;  %v525_v10 = vld [vmem:[%s4844_s9 + $0x5a0] sm:$0xff]  ;;  %v696_v33 = vld [vmem:[%s4853_s13 + $0x548] sm:$0xff] }
 0x407   : > { %v3408_v56 = vadd.f32 %v3226_v5, %v2134_v49  ;;  %v2154_v11 = vmul.f32 %v6330_v0, %v516_v53  ;;  %v707_v53 = vld [vmem:[%s4853_s13 + $0x5a0] sm:$0xff] }
 0x408   : > { %3602 = vst.msk [vmem:[%s4866_s15 + $0x510] sm:$0xff] %vm3439_vm0, %v3419_v29 }
 0x409   : > { %3592 = vst.msk [vmem:[%s4866_s15 + $0x4c0] sm:$0xff] %vm3439_vm0, %v3409_v21 }
 0x40a   : > { %3591 = vst.msk [vmem:[%s4866_s15 + $0x4b8] sm:$0xff] %vm3439_vm0, %v3408_v56  ;;  %v509_v56 = vld [vmem:[%s4844_s9 + $0x520] sm:$0xff] }
 0x40b   : > { %v2993_v61 = vpop.permute.xlu2 %2992  ;;  %v2943_v18 = vpop.permute.xlu1 %2942 }
 0x40c   : > { %v3240_v43 = vmul.f32 %v2993_v61, %v692_v42  ;;  %v3230_v28 = vmul.f32 %v2943_v18, %v682_v8  ;;  %v2938_v59 = vpop.permute.xlu0 %2937  ;;  %v691_v42 = vld [vmem:[%s4853_s13 + $0x520] sm:$0xff]  ;;  %v508_v8 = vld [vmem:[%s4844_s9 + $0x518] sm:$0xff] }
 0x40d   : > { %v3229_v14 = vmul.f32 %v2938_v59, %v681_v40  ;;  %v6332_v18 = vld [vmem:[#allocation111_spill] sm:$0xff]  ;;  %v6334_v59 = vld [vmem:[#allocation121_spill] sm:$0xff] }
 0x40e   : > { %v3422_v45 = vadd.f32 %v3240_v43, %v2148_v1  ;;  %v3412_v63 = vadd.f32 %v3230_v28, %v2138_v12  ;;  %v2147_v9 = vmul.f32 %v6332_v18, %v509_v56  ;;  %v6333_v12 = vld [vmem:[#allocation132_spill] sm:$0xff]  ;;  %v2146_v16 = vmul.f32 %v6334_v59, %v508_v8  ;;  %v6342_v18 = vld [vmem:[#allocation129_spill] sm:$0xff]  ;;  %v520_v59 = vld [vmem:[%s4844_s9 + $0x578] sm:$0xff] }
 0x40f   : > { %v3411_v23 = vadd.f32 %v3229_v14, %v2137_v36  ;;  %v2157_v47 = vmul.f32 %v6333_v12, %v519_v25  ;;  %v700_v56 = vld [vmem:[%s4853_s13 + $0x568] sm:$0xff]  ;;  %v517_v25 = vld [vmem:[%s4844_s9 + $0x560] sm:$0xff] }
 0x410   : > { %3605 = vst.msk [vmem:[%s4866_s15 + $0x528] sm:$0xff] %vm3439_vm0, %v3422_v45  ;;  %v6341_v8 = vld [vmem:[#allocation120_spill] sm:$0xff] }
 0x411   : > { %3595 = vst.msk [vmem:[%s4866_s15 + $0x4d8] sm:$0xff] %vm3439_vm0, %v3412_v63 }
 0x412   : > { %3594 = vst.msk [vmem:[%s4866_s15 + $0x4d0] sm:$0xff] %vm3439_vm0, %v3411_v23  ;;  %v512_v23 = vld [vmem:[%s4844_s9 + $0x538] sm:$0xff] }
 0x413   : > { %v3008_v52 = vpop.permute.xlu2 %3007  ;;  %v2958_v44 = vpop.permute.xlu1 %2957 }
 0x414   : > { %v3243_v39 = vmul.f32 %v3008_v52, %v695_v62  ;;  %v3233_v55 = vmul.f32 %v2958_v44, %v685_v38  ;;  %v2953_v17 = vpop.permute.xlu0 %2952  ;;  %v694_v62 = vld [vmem:[%s4853_s13 + $0x538] sm:$0xff]  ;;  %v511_v38 = vld [vmem:[%s4844_s9 + $0x530] sm:$0xff] }
 0x415   : > { %v3232_v13 = vmul.f32 %v2953_v17, %v684_v48  ;;  %v6335_v44 = vld [vmem:[#allocation114_spill] sm:$0xff]  ;;  %v6337_v17 = vld [vmem:[#allocation124_spill] sm:$0xff] }
 0x416   : > { %v3425_v19 = vadd.f32 %v3243_v39, %v2151_v41  ;;  %v3415_v34 = vadd.f32 %v3233_v55, %v2141_v24  ;;  %v2150_v7 = vmul.f32 %v6335_v44, %v512_v23  ;;  %v6336_v24 = vld [vmem:[#allocation134_spill] sm:$0xff]  ;;  %v2149_v15 = vmul.f32 %v6337_v17, %v511_v38  ;;  %v523_v44 = vld [vmem:[%s4844_s9 + $0x590] sm:$0xff] }
 0x417   : > { %v3414_v3 = vadd.f32 %v3232_v13, %v2140_v35  ;;  %v2160_v51 = vmul.f32 %v6336_v24, %v522_v20  ;;  %v6344_v20 = vld [vmem:[#allocation131_spill] sm:$0xff]  ;;  %v6346_v17 = vld [vmem:[#allocation133_spill] sm:$0xff] }
 0x418   : > { %3608 = vst.msk [vmem:[%s4866_s15 + $0x540] sm:$0xff] %vm3439_vm0, %v3425_v19 }
 0x419   : > { %3598 = vst.msk [vmem:[%s4866_s15 + $0x4f0] sm:$0xff] %vm3439_vm0, %v3415_v34 }
 0x41a   : > { %3597 = vst.msk [vmem:[%s4866_s15 + $0x4e8] sm:$0xff] %vm3439_vm0, %v3414_v3  ;;  %v515_v3 = vld [vmem:[%s4844_s9 + $0x550] sm:$0xff] }
 0x41b   : > { %v3023_v60 = vpop.permute.xlu2 %3022  ;;  %v2973_v58 = vpop.permute.xlu1 %2972 }
 0x41c   : > { %v3246_v32 = vmul.f32 %v3023_v60, %v698_v37  ;;  %v3236_v57 = vmul.f32 %v2973_v58, %v688_v22  ;;  %v2968_v31 = vpop.permute.xlu0 %2967  ;;  %v697_v37 = vld [vmem:[%s4853_s13 + $0x550] sm:$0xff]  ;;  %v514_v22 = vld [vmem:[%s4844_s9 + $0x548] sm:$0xff] }
 0x41d   : > { %v3235_v49 = vmul.f32 %v2968_v31, %v687_v50  ;;  %v6338_v58 = vld [vmem:[#allocation117_spill] sm:$0xff]  ;;  %v6340_v31 = vld [vmem:[#allocation127_spill] sm:$0xff] }
 0x41e   : > { %v3428_v5 = vadd.f32 %v3246_v32, %v2154_v11  ;;  %v3418_v29 = vadd.f32 %v3236_v57, %v2144_v30  ;;  %v2153_v26 = vmul.f32 %v6338_v58, %v515_v3  ;;  %v6339_v30 = vld [vmem:[#allocation136_spill] sm:$0xff]  ;;  %v2152_v46 = vmul.f32 %v6340_v31, %v514_v22 }
 0x41f   : > { %v3417_v21 = vadd.f32 %v3235_v49, %v2143_v6  ;;  %v2163_v0 = vmul.f32 %v6339_v30, %v525_v10  ;;  %v708_v3 = vld [vmem:[%s4853_s13 + $0x5a8] sm:$0xff] }
 0x420   : > { %3611 = vst.msk [vmem:[%s4866_s15 + $0x558] sm:$0xff] %vm3439_vm0, %v3428_v5 }
 0x421   : > { %3601 = vst.msk [vmem:[%s4866_s15 + $0x508] sm:$0xff] %vm3439_vm0, %v3418_v29 }
 0x422   : > { %3600 = vst.msk [vmem:[%s4866_s15 + $0x500] sm:$0xff] %vm3439_vm0, %v3417_v21  ;;  %v518_v21 = vld [vmem:[%s4844_s9 + $0x568] sm:$0xff] }
 0x423   : > { %v3038_v40 = vpop.permute.xlu2 %3037  ;;  %v2988_v61 = vpop.permute.xlu1 %2987 }
 0x424   : > { %v3249_v1 = vmul.f32 %v3038_v40, %v701_v4  ;;  %v3239_v43 = vmul.f32 %v2988_v61, %v691_v42  ;;  %v2983_v28 = vpop.permute.xlu0 %2982  ;;  %v699_v4 = vld [vmem:[%s4853_s13 + $0x560] sm:$0xff] }
 0x425   : > { %v3238_v36 = vmul.f32 %v2983_v28, %v690_v2  ;;  %v2156_v2 = vmul.f32 %v6341_v8, %v518_v21  ;;  %v703_v28 = vld [vmem:[%s4853_s13 + $0x580] sm:$0xff] }
 0x426   : > { %v3431_v14 = vadd.f32 %v3249_v1, %v2157_v47  ;;  %v3421_v45 = vadd.f32 %v3239_v43, %v2147_v9  ;;  %v2155_v9 = vmul.f32 %v6342_v18, %v517_v25  ;;  %v521_v43 = vld [vmem:[%s4844_s9 + $0x580] sm:$0xff] }
 0x427   : > { %v3420_v63 = vadd.f32 %v3238_v36, %v2146_v16  ;;  %v702_v16 = vld [vmem:[%s4853_s13 + $0x578] sm:$0xff] }
 0x428   : > { %3614 = vst.msk [vmem:[%s4866_s15 + $0x570] sm:$0xff] %vm3439_vm0, %v3431_v14  ;;  %v6343_v14 = vld [vmem:[#allocation123_spill] sm:$0xff] }
 0x429   : > { %3604 = vst.msk [vmem:[%s4866_s15 + $0x520] sm:$0xff] %vm3439_vm0, %v3421_v45  ;;  %v2159_v45 = vmul.f32 %v6343_v14, %v521_v43 }
 0x42a   : > { %3603 = vst.msk [vmem:[%s4866_s15 + $0x518] sm:$0xff] %vm3439_vm0, %v3420_v63 }
 0x42b   : > { %v3053_v48 = vpop.permute.xlu2 %3052  ;;  %v3003_v52 = vpop.permute.xlu1 %3002 }
 0x42c   : > { %v3252_v41 = vmul.f32 %v3053_v48, %v704_v27  ;;  %v3242_v39 = vmul.f32 %v3003_v52, %v694_v62  ;;  %v2998_v55 = vpop.permute.xlu0 %2997  ;;  %v2158_v27 = vmul.f32 %v6344_v20, %v520_v59  ;;  %v524_v48 = vld [vmem:[%s4844_s9 + $0x598] sm:$0xff] }
 0x42d   : > { %v3241_v35 = vmul.f32 %v2998_v55, %v693_v54  ;;  %v706_v52 = vld [vmem:[%s4853_s13 + $0x598] sm:$0xff] }
 0x42e   : > { %v3434_v13 = vadd.f32 %v3252_v41, %v2160_v51  ;;  %v3424_v19 = vadd.f32 %v3242_v39, %v2150_v7  ;;  %v705_v7 = vld [vmem:[%s4853_s13 + $0x590] sm:$0xff]  ;;  %v6345_v51 = vld [vmem:[#allocation126_spill] sm:$0xff] }
 0x42f   : > { %v3423_v34 = vadd.f32 %v3241_v35, %v2149_v15  ;;  %v2162_v41 = vmul.f32 %v6345_v51, %v524_v48  ;;  %v2161_v15 = vmul.f32 %v6346_v17, %v523_v44 }
 0x430   : > { %3617 = vst.msk [vmem:[%s4866_s15 + $0x588] sm:$0xff] %vm3439_vm0, %v3434_v13 }
 0x431   : > { %3607 = vst.msk [vmem:[%s4866_s15 + $0x538] sm:$0xff] %vm3439_vm0, %v3424_v19 }
 0x432   : > { %3606 = vst.msk [vmem:[%s4866_s15 + $0x530] sm:$0xff] %vm3439_vm0, %v3423_v34  ;;  %v526_v34 = vld [vmem:[%s4844_s9 + $0x5a8] sm:$0xff] }
 0x433   : > { %v3068_v50 = vpop.permute.xlu2 %3067  ;;  %v3018_v60 = vpop.permute.xlu1 %3017 }
 0x434   : > { %v3255_v11 = vmul.f32 %v3068_v50, %v707_v53  ;;  %v3245_v32 = vmul.f32 %v3018_v60, %v697_v37  ;;  %v3013_v57 = vpop.permute.xlu0 %3012  ;;  %v6347_v53 = vld [vmem:[#allocation135_spill] sm:$0xff] }
 0x435   : > { %v3244_v6 = vmul.f32 %v3013_v57, %v696_v33  ;;  %v2164_v37 = vmul.f32 %v6347_v53, %v526_v34 }
 0x436   : > { %v3437_v49 = vadd.f32 %v3255_v11, %v2163_v0  ;;  %v3427_v5 = vadd.f32 %v3245_v32, %v2153_v26 }
 0x437   : > { %v3426_v29 = vadd.f32 %v3244_v6, %v2152_v46 }
 0x438   : > { %3620 = vst.msk [vmem:[%s4866_s15 + $0x5a0] sm:$0xff] %vm3439_vm0, %v3437_v49 }
 0x439   : > { %3610 = vst.msk [vmem:[%s4866_s15 + $0x550] sm:$0xff] %vm3439_vm0, %v3427_v5 }
 0x43a   : > { %3609 = vst.msk [vmem:[%s4866_s15 + $0x548] sm:$0xff] %vm3439_vm0, %v3426_v29 }
 0x43b   : > { %v3033_v42 = vpop.permute.xlu1 %3032 }
 0x43c   : > { %v3248_v40 = vmul.f32 %v3033_v42, %v700_v56  ;;  %v3028_v61 = vpop.permute.xlu0 %3027 }
 0x43d   : > { %v3247_v12 = vmul.f32 %v3028_v61, %v699_v4 }
 0x43e   : > { %v3430_v47 = vadd.f32 %v3248_v40, %v2156_v2 }
 0x43f   : > { %v3429_v1 = vadd.f32 %v3247_v12, %v2155_v9 }
 0x440   : > { %3613 = vst.msk [vmem:[%s4866_s15 + $0x568] sm:$0xff] %vm3439_vm0, %v3430_v47 }
 0x441   : > { %3612 = vst.msk [vmem:[%s4866_s15 + $0x560] sm:$0xff] %vm3439_vm0, %v3429_v1 }
 0x443   : > { %v3048_v36 = vpop.permute.xlu1 %3047 }
 0x444   : > { %v3251_v63 = vmul.f32 %v3048_v36, %v703_v28  ;;  %v3043_v23 = vpop.permute.xlu0 %3042 }
 0x445   : > { %v3250_v62 = vmul.f32 %v3043_v23, %v702_v16 }
 0x446   : > { %v3433_v38 = vadd.f32 %v3251_v63, %v2159_v45 }
 0x447   : > { %v3432_v54 = vadd.f32 %v3250_v62, %v2158_v27 }
 0x448   : > { %3616 = vst.msk [vmem:[%s4866_s15 + $0x580] sm:$0xff] %vm3439_vm0, %v3433_v38 }
 0x449   : > { %3615 = vst.msk [vmem:[%s4866_s15 + $0x578] sm:$0xff] %vm3439_vm0, %v3432_v54 }
 0x44b   : > { %v3063_v24 = vpop.permute.xlu1 %3062 }
 0x44c   : > { %v3254_v39 = vmul.f32 %v3063_v24, %v706_v52  ;;  %v3058_v55 = vpop.permute.xlu0 %3057 }
 0x44d   : > { %v3253_v35 = vmul.f32 %v3058_v55, %v705_v7 }
 0x44e   : > { %v3436_v13 = vadd.f32 %v3254_v39, %v2162_v41 }
 0x44f   : > { %v3435_v19 = vadd.f32 %v3253_v35, %v2161_v15 }
 0x450   : > { %3619 = vst.msk [vmem:[%s4866_s15 + $0x598] sm:$0xff] %vm3439_vm0, %v3436_v13 }
 0x451   : > { %3618 = vst.msk [vmem:[%s4866_s15 + $0x590] sm:$0xff] %vm3439_vm0, %v3435_v19 }
 0x454   : > { %v3073_v10 = vpop.permute.xlu0 %3072 }
 0x455   : > { %v3256_v22 = vmul.f32 %v3073_v10, %v708_v3  ;;  %3628 = sbr.rel (!%p4256_p4) target bundleno = 1178 (0x49a), region = 40 }
 0x457   : > { %v3438_v33 = vadd.f32 %v3256_v22, %v2164_v37 }
 0x459   : > { %3621 = vst.msk [vmem:[%s4866_s15 + $0x5a8] sm:$0xff] %vm3439_vm0, %v3438_v33 }
 0x45a   : > { %s6357_s17 = smov (!%p3631_p8, %s3630_s17), 182 }
 0x45b   : > { %s4006_s27 = sshll.u32 %s6357_s17, 3 }
 0x45c   : > { %p4009_p9 = scmp.eq.s32.totalorder %s4006_s27, 0 }
 0x45d   : > { %s5945_s28 = sshrl.u32 (!%p4009_p9), %s6357_s17, 5 }
 0x45e   : > { %3639 = sbr.rel (%p4009_p9) target bundleno = 1178 (0x49a), region = 44  ;;  %p4010_p10 = scmp.le.s32.totalorder (!%p4009_p9), %s5945_s28, 0 }
 0x463   : > { %3936 = sbr.rel (%p4010_p10) target bundleno = 1161 (0x489), region = 129  ;;  %s6348_s18 = smov (!%p4010_p10), %s5939_s26 }
 0x464   : > { %s6349_s23 = smov (!%p4010_p10), %s4866_s15  ;;  %s5954_s24 = smov (!%p4010_p10), 0  }
 0x465   : > { %s5956_s29 = smov (!%p4010_p10), 0  }
 0x468 LB: >> { %v3764_v50 = vld [vmem:[%s4179_s23] sm:$0xff]  ;;  %v3766_v60 = vld [vmem:[%s4179_s23 + $0x8] sm:$0xff]  ;;  %v3768_v58 = vld [vmem:[%s4179_s23 + $0x10] sm:$0xff]  ;;  %s3828_s30 = sadd.s32 1, %s4183_s24  ;;  %s3758_s29 = sadd.s32 1, %s4187_s29   ;;  %s4187_s29 = sphi %s5956_s29, %s3758_s29   ;;  %s4183_s24 = sphi %s5954_s24, %s6352_s24   ;;  %s4179_s23 = sphi %s6349_s23, %s6351_s23   ;;  %s4175_s18 = sphi %s6348_s18, %s6350_s18  }
 0x469   : >> { %3765 = vst [vmem:[%s4175_s18] sm:$0xff] %v3764_v50  ;;  %v3770_v26 = vld [vmem:[%s4179_s23 + $0x18] sm:$0xff]  ;;  %p3829_p11 = scmp.ge.s32.totalorder %s3828_s30, %s5945_s28  ;;  %v3772_v30 = vld [vmem:[%s4179_s23 + $0x20] sm:$0xff]  ;;  %v3774_v0 = vld [vmem:[%s4179_s23 + $0x28] sm:$0xff]  ;;  %p3757_p12 = scmp.ge.s32.totalorder %s3758_s29, %s5945_s28 }
 0x46a   : >> { %3767 = vst [vmem:[%s4175_s18 + $0x8] sm:$0xff] %v3766_v60  ;;  %v3776_v11 = vld [vmem:[%s4179_s23 + $0x30] sm:$0xff]  ;;  %v3778_v32 = vld [vmem:[%s4179_s23 + $0x38] sm:$0xff]  ;;  %v3780_v57 = vld [vmem:[%s4179_s23 + $0x40] sm:$0xff] }
 0x46b   : >> { %3769 = vst [vmem:[%s4175_s18 + $0x10] sm:$0xff] %v3768_v58  ;;  %s6359_s30 = smov (%p3829_p11, %s3828_s30), 0  ;;  %v3782_v31 = vld [vmem:[%s4179_s23 + $0x48] sm:$0xff]  ;;  %v3784_v46 = vld [vmem:[%s4179_s23 + $0x50] sm:$0xff]  ;;  %v3786_v6 = vld [vmem:[%s4179_s23 + $0x58] sm:$0xff] }
 0x46c   : >> { %3771 = vst [vmem:[%s4175_s18 + $0x18] sm:$0xff] %v3770_v26  ;;  %s4011_s5 = sshll.u32 %s6359_s30, 8  ;;  %v3788_v49 = vld [vmem:[%s4179_s23 + $0x60] sm:$0xff]  ;;  %v3790_v5 = vld [vmem:[%s4179_s23 + $0x68] sm:$0xff]  ;;  %v3792_v29 = vld [vmem:[%s4179_s23 + $0x70] sm:$0xff]  ;;  %s6352_s24 = smov %s6359_s30 }
 0x46d   : >> { %3773 = vst [vmem:[%s4175_s18 + $0x20] sm:$0xff] %v3772_v30  ;;  %s5988_s6 = scalar_lea.vmem %s4866_s15, %s4011_s5 [#allocation2]   ;;  %s5991_s7 = scalar_lea.vmem %s5939_s26, %s4011_s5   ;;  %v3794_v21 = vld [vmem:[%s4179_s23 + $0x78] sm:$0xff]  ;;  %v3796_v56 = vld [vmem:[%s4179_s23 + $0x80] sm:$0xff]  ;;  %v3798_v25 = vld [vmem:[%s4179_s23 + $0x88] sm:$0xff] }
 0x46e   : >> { %3775 = vst [vmem:[%s4175_s18 + $0x28] sm:$0xff] %v3774_v0  ;;  %v3800_v4 = vld [vmem:[%s4179_s23 + $0x90] sm:$0xff]  ;;  %v3802_v42 = vld [vmem:[%s4179_s23 + $0x98] sm:$0xff]  ;;  %v3804_v8 = vld [vmem:[%s4179_s23 + $0xa0] sm:$0xff] }
 0x46f   : >> { %3777 = vst [vmem:[%s4175_s18 + $0x30] sm:$0xff] %v3776_v11  ;;  %v3806_v2 = vld [vmem:[%s4179_s23 + $0xa8] sm:$0xff]  ;;  %v3808_v40 = vld [vmem:[%s4179_s23 + $0xb0] sm:$0xff]  ;;  %v3810_v61 = vld [vmem:[%s4179_s23 + $0xb8] sm:$0xff] }
 0x470   : >> { %3779 = vst [vmem:[%s4175_s18 + $0x38] sm:$0xff] %v3778_v32  ;;  %v3812_v18 = vld [vmem:[%s4179_s23 + $0xc0] sm:$0xff]  ;;  %v3814_v9 = vld [vmem:[%s4179_s23 + $0xc8] sm:$0xff]  ;;  %v3816_v12 = vld [vmem:[%s4179_s23 + $0xd0] sm:$0xff] }
 0x471   : >> { %3781 = vst [vmem:[%s4175_s18 + $0x40] sm:$0xff] %v3780_v57  ;;  %v3818_v47 = vld [vmem:[%s4179_s23 + $0xd8] sm:$0xff]  ;;  %v3820_v1 = vld [vmem:[%s4179_s23 + $0xe0] sm:$0xff]  ;;  %v3822_v43 = vld [vmem:[%s4179_s23 + $0xe8] sm:$0xff] }
 0x472   : >> { %3783 = vst [vmem:[%s4175_s18 + $0x48] sm:$0xff] %v3782_v31  ;;  %v3824_v28 = vld [vmem:[%s4179_s23 + $0xf0] sm:$0xff]  ;;  %v3826_v59 = vld [vmem:[%s4179_s23 + $0xf8] sm:$0xff]  ;;  %s6351_s23 = smov %s5988_s6 }
 0x473   : >> { %3785 = vst [vmem:[%s4175_s18 + $0x50] sm:$0xff] %v3784_v46 }
 0x474   : >> { %3787 = vst [vmem:[%s4175_s18 + $0x58] sm:$0xff] %v3786_v6 }
 0x475   : >> { %3789 = vst [vmem:[%s4175_s18 + $0x60] sm:$0xff] %v3788_v49 }
 0x476   : >> { %3791 = vst [vmem:[%s4175_s18 + $0x68] sm:$0xff] %v3790_v5 }
 0x477   : >> { %3793 = vst [vmem:[%s4175_s18 + $0x70] sm:$0xff] %v3792_v29 }
 0x478   : >> { %3795 = vst [vmem:[%s4175_s18 + $0x78] sm:$0xff] %v3794_v21 }
 0x479   : >> { %3797 = vst [vmem:[%s4175_s18 + $0x80] sm:$0xff] %v3796_v56 }
 0x47a   : >> { %3799 = vst [vmem:[%s4175_s18 + $0x88] sm:$0xff] %v3798_v25 }
 0x47b   : >> { %3801 = vst [vmem:[%s4175_s18 + $0x90] sm:$0xff] %v3800_v4 }
 0x47c   : >> { %3803 = vst [vmem:[%s4175_s18 + $0x98] sm:$0xff] %v3802_v42 }
 0x47d   : >> { %3805 = vst [vmem:[%s4175_s18 + $0xa0] sm:$0xff] %v3804_v8 }
 0x47e   : >> { %3807 = vst [vmem:[%s4175_s18 + $0xa8] sm:$0xff] %v3806_v2 }
 0x47f   : >> { %3809 = vst [vmem:[%s4175_s18 + $0xb0] sm:$0xff] %v3808_v40 }
 0x480   : >> { %3811 = vst [vmem:[%s4175_s18 + $0xb8] sm:$0xff] %v3810_v61 }
 0x481   : >> { %3813 = vst [vmem:[%s4175_s18 + $0xc0] sm:$0xff] %v3812_v18 }
 0x482   : >> { %3815 = vst [vmem:[%s4175_s18 + $0xc8] sm:$0xff] %v3814_v9 }
 0x483   : >> { %3817 = vst [vmem:[%s4175_s18 + $0xd0] sm:$0xff] %v3816_v12 }
 0x484   : >> { %3819 = vst [vmem:[%s4175_s18 + $0xd8] sm:$0xff] %v3818_v47  ;;  %3760 = sbr.rel (!%p3757_p12) target bundleno = 1128 (0x468), region = 135 }
 0x485   : >> { %3821 = vst [vmem:[%s4175_s18 + $0xe0] sm:$0xff] %v3820_v1 }
 0x486   : >> { %3823 = vst [vmem:[%s4175_s18 + $0xe8] sm:$0xff] %v3822_v43 }
 0x487   : >> { %3825 = vst [vmem:[%s4175_s18 + $0xf0] sm:$0xff] %v3824_v28 }
 0x488   : >> { %3827 = vst [vmem:[%s4175_s18 + $0xf8] sm:$0xff] %v3826_v59  ;;  %s6350_s18 = smov %s5991_s7 }
 0x489 PF: > { %s6056_s8 = sand.u32 31, %s6357_s17   ;;  %s4022_s9 = sshll.u32 %s5945_s28, 8 }
 0x48a   : > { %s3839_s10 = scalar_lea.vmem %s4866_s15, %s4022_s9 [#allocation2]   ;;  %s3841_s11 = scalar_lea.vmem %s5939_s26, %s4022_s9  }
 0x48b   : > { %p4016_p13 = scmp.le.s32.totalorder %s6056_s8, 0 }
 0x48c   : > { %s4189_s12 = smov (!%p4016_p13), %s3841_s11   ;;  %s4193_s13 = smov (!%p4016_p13), %s3839_s10  }
 0x48d   : > { %3950 = sbr.rel (%p4016_p13) target bundleno = 1178 (0x49a), region = 140  ;;  %s4197_s14 = smov (!%p4016_p13), 0  }
 0x48e   : > { %s4201_s20 = smov (!%p4016_p13), 0  }
 0x492 LB: >> { %v3851_v16 = vld [vmem:[%s4195_s13] sm:$0xff]  ;;  %s3853_s17 = sadd.s32 1, %s4199_s14  ;;  %s3845_s20 = sadd.s32 1, %s4203_s20   ;;  %s4203_s20 = sphi %s4201_s20, %s3845_s20   ;;  %s4199_s14 = sphi %s4197_s14, %s4198_s14   ;;  %s4195_s13 = sphi %s4193_s13, %s3858_s13   ;;  %s4191_s12 = sphi %s4189_s12, %s3859_s12  }
 0x493   : >> { %3852 = vst [vmem:[%s4191_s12] sm:$0xff] %v3851_v16  ;;  %p3854_p0 = scmp.ge.s32.totalorder %s3853_s17, %s6056_s8  ;;  %p3844_p1 = scmp.ge.s32.totalorder %s3845_s20, %s6056_s8 }
 0x495   : >> { %s6361_s17 = smov (%p3854_p0, %s3853_s17), 0  ;;  %3847 = sbr.rel (!%p3844_p1) target bundleno = 1170 (0x492), region = 146 }
 0x496   : >> { %s4017_s15 = sshll.u32 %s6361_s17, 3  ;;  %s4198_s14 = smov %s6361_s17  }
 0x497   : >> { %s3858_s13 = scalar_lea.vmem %s3839_s10, %s4017_s15 [#allocation2]   ;;  %s3859_s12 = scalar_lea.vmem %s3841_s11, %s4017_s15  }
 0x49a PF: > { %p11_p2 = scmp.ge.s32.totalorder %s4246_s19, 4   ;;  %s6353_s15 = smov %s4167_s16 }
 0x49b   : > { %s6354_s16 = smov %s4254_s22  ;;  %s6355_s17 = smov %s4246_s19 }
 0x49c   :  { %13 = sbr.rel (!%p11_p2) target bundleno = 2 (0x2), region = 157 }

</bundles_post_ra>
